<compile_context>
chip_gen: v7x
topology: tpu7x:2x2x1
jax: 0.10.0
libtpu: 0.0.40
codegen_flags: <defaults>
</compile_context>

<pallas_src>
import jax
import jax.numpy as jnp
from jax.experimental import pallas as pl
from jax.experimental.pallas import tpu as pltpu


def _make_basic_block_kernel(H, W, Cin, Cmid, Cout):
    Ho, Wo = H, W          # stride = 1, pad = 1  ->  same spatial size
    HW = Ho * Wo

    def kernel(xp_ref, w1_ref, b1_ref, w2_ref, b2_ref, o_ref, hpad_ref):
        # xp_ref : (1, H+2, W+2, Cin)   pre-padded NHWC input block
        # w*_ref : (9, Cin, Cout)       BN-folded weights, tap-major
        # b*_ref : (1, Cout)            BN-folded bias
        # o_ref  : (1, Ho, Wo, Cout)
        # hpad   : (Ho+2, Wo+2, Cmid)   VMEM scratch for padded intermediate

        # ---------- conv1 (3x3) + folded BN1 + ReLU -------------------------
        def tap_in(k):
            dy, dx = k // 3, k % 3
            patch = xp_ref[0, dy:dy + Ho, dx:dx + Wo, :].astype(jnp.float32)
            return jnp.dot(patch.reshape(HW, Cin), w1_ref[k],
                           preferred_element_type=jnp.float32)

        acc1 = tap_in(0)                       # init from first tap (no zeros)
        for k in range(1, 9):
            acc1 = acc1 + tap_in(k)
        h = jnp.maximum(acc1 + b1_ref[...], 0.0)            # (HW, Cmid) f32

        # ---------- stage h into zero-padded VMEM scratch -------------------
        # Only the 1-pixel border needs zeros; the interior is overwritten.
        zrow = jnp.zeros((1, Wo + 2, Cmid), jnp.float32)
        hpad_ref[0:1, :, :] = zrow
        hpad_ref[Ho + 1:Ho + 2, :, :] = zrow
        zcol = jnp.zeros((Ho + 2, 1, Cmid), jnp.float32)
        hpad_ref[:, 0:1, :] = zcol
        hpad_ref[:, Wo + 1:Wo + 2, :] = zcol
        hpad_ref[1:Ho + 1, 1:Wo + 1, :] = h.reshape(Ho, Wo, Cmid)

        # ---------- conv2 (3x3) + folded BN2 --------------------------------
        def tap_mid(k):
            dy, dx = k // 3, k % 3
            patch = hpad_ref[dy:dy + Ho, dx:dx + Wo, :]
            return jnp.dot(patch.reshape(HW, Cmid), w2_ref[k],
                           preferred_element_type=jnp.float32)

        acc2 = tap_mid(0)
        for k in range(1, 9):
            acc2 = acc2 + tap_mid(k)
        y = acc2 + b2_ref[...]                               # (HW, Cout) f32

        # ---------- identity shortcut + final ReLU --------------------------
        shortcut = xp_ref[0, 1:1 + Ho, 1:1 + Wo, :].astype(jnp.float32)
        out = jnp.maximum(y + shortcut.reshape(HW, Cout), 0.0)

        # single store of the output block (written exactly once)
        o_ref[...] = out.reshape(1, Ho, Wo, Cout).astype(o_ref.dtype)

    return kernel


def basic_block_forward(x, w1, g1, be1, m1, v1, w2, g2, be2, m2, v2, eps=1e-5):
    """x: (N, Cin, H, W) NCHW, conv weights OIHW. Returns (N, Cout, H, W)."""
    N, Cin, H, W = x.shape
    Cmid = w1.shape[0]
    Cout = w2.shape[0]
    assert w1.shape == (Cmid, Cin, 3, 3) and w2.shape == (Cout, Cmid, 3, 3)
    assert Cin == Cout, "identity shortcut requires inplanes == planes"

    # ---- fold BatchNorm (inference) into conv weight + bias ----------------
    s1 = g1 / jnp.sqrt(v1 + eps)
    s2 = g2 / jnp.sqrt(v2 + eps)
    w1f = (w1 * s1[:, None, None, None]).astype(jnp.float32)
    w2f = (w2 * s2[:, None, None, None]).astype(jnp.float32)
    bias1 = (be1 - m1 * s1).reshape(1, Cmid).astype(jnp.float32)
    bias2 = (be2 - m2 * s2).reshape(1, Cout).astype(jnp.float32)

    # OIHW -> (kh*kw, I, O): tap-major weights for the 9 shifted matmuls
    w1k = jnp.transpose(w1f, (2, 3, 1, 0)).reshape(9, Cin, Cmid)
    w2k = jnp.transpose(w2f, (2, 3, 1, 0)).reshape(9, Cmid, Cout)

    # NCHW -> NHWC, pre-pad spatial dims by 1 (conv1's halo)
    x_nhwc = jnp.transpose(x, (0, 2, 3, 1)).astype(jnp.float32)
    x_pad = jnp.pad(x_nhwc, ((0, 0), (1, 1), (1, 1), (0, 0)))
    Hp, Wp = H + 2, W + 2

    kernel = _make_basic_block_kernel(H, W, Cin, Cmid, Cout)

    out_nhwc = pl.pallas_call(
        kernel,
        out_shape=jax.ShapeDtypeStruct((N, H, W, Cout), x.dtype),
        grid_spec=pltpu.PrefetchScalarGridSpec(
            num_scalar_prefetch=0,
            grid=(N,),
            in_specs=[
                pl.BlockSpec((1, Hp, Wp, Cin), lambda n: (n, 0, 0, 0)),
                pl.BlockSpec((9, Cin, Cmid), lambda n: (0, 0, 0)),
                pl.BlockSpec((1, Cmid), lambda n: (0, 0)),
                pl.BlockSpec((9, Cmid, Cout), lambda n: (0, 0, 0)),
                pl.BlockSpec((1, Cout), lambda n: (0, 0)),
            ],
            out_specs=pl.BlockSpec((1, H, W, Cout), lambda n: (n, 0, 0, 0)),
            scratch_shapes=[pltpu.VMEM((H + 2, W + 2, Cmid), jnp.float32)],
        ),
        compiler_params=pltpu.CompilerParams(
            dimension_semantics=("parallel",),
        ),
    )(x_pad, w1k, bias1, w2k, bias2)

    # NHWC -> NCHW to match PyTorch
    return jnp.transpose(out_nhwc, (0, 3, 1, 2))


def _reference_forward(x, w1, g1, be1, m1, v1, w2, g2, be2, m2, v2, eps=1e-5):
    """Pure-JAX reference of the PyTorch BasicBlock (eval-mode BN)."""
    def conv3x3(t, w):
        return jax.lax.conv_general_dilated(
            t, w, window_strides=(1, 1), padding=((1, 1), (1, 1)),
            dimension_numbers=("NCHW", "OIHW", "NCHW"))

    def bn(t, g, b, m, v):
        inv = g / jnp.sqrt(v + eps)
        return t * inv[None, :, None, None] + (b - m * inv)[None, :, None, None]

    r = jax.nn.relu(bn(conv3x3(x, w1), g1, be1, m1, v1))
    r = bn(conv3x3(r, w2), g2, be2, m2, v2)
    return jax.nn.relu(x + r)


if __name__ == "__main__":
    # BasicBlock(inplanes=8, planes=8, stride=1, downsample=None)
    N, C, H, W = 2, 8, 16, 16

    key = jax.random.PRNGKey(0)
    ks = jax.random.split(key, 11)
    x = jax.random.normal(ks[0], (N, C, H, W), dtype=jnp.float32)

    w1 = jax.random.normal(ks[1], (C, C, 3, 3), dtype=jnp.float32) * 0.1
    g1 = 1.0 + 0.1 * jax.random.normal(ks[2], (C,), dtype=jnp.float32)
    be1 = 0.1 * jax.random.normal(ks[3], (C,), dtype=jnp.float32)
    m1 = 0.1 * jax.random.normal(ks[4], (C,), dtype=jnp.float32)
    v1 = jax.random.uniform(ks[5], (C,), minval=0.5, maxval=1.5, dtype=jnp.float32)

    w2 = jax.random.normal(ks[6], (C, C, 3, 3), dtype=jnp.float32) * 0.1
    g2 = 1.0 + 0.1 * jax.random.normal(ks[7], (C,), dtype=jnp.float32)
    be2 = 0.1 * jax.random.normal(ks[8], (C,), dtype=jnp.float32)
    m2 = 0.1 * jax.random.normal(ks[9], (C,), dtype=jnp.float32)
    v2 = jax.random.uniform(ks[10], (C,), minval=0.5, maxval=1.5, dtype=jnp.float32)

    out = basic_block_forward(x, w1, g1, be1, m1, v1, w2, g2, be2, m2, v2)
    out = jax.block_until_ready(out)

    ref = _reference_forward(x, w1, g1, be1, m1, v1, w2, g2, be2, m2, v2)
    ref = jax.block_until_ready(ref)

    assert out.shape == (N, C, H, W)
    assert jnp.allclose(out, ref, atol=1e-4, rtol=1e-4), (
        float(jnp.max(jnp.abs(out - ref))))

    print("KERNEL_OK")
</pallas_src>

<mosaic_0001>
module attributes {stable_mosaic.version = 11 : i64} {
  func.func @kernel(%arg0: i32, %arg1: memref<1x18x18x8xf32, #tpu.memory_space<vmem>>, %arg2: memref<9x8x8xf32, #tpu.memory_space<vmem>>, %arg3: memref<1x8xf32, #tpu.memory_space<vmem>>, %arg4: memref<9x8x8xf32, #tpu.memory_space<vmem>>, %arg5: memref<1x8xf32, #tpu.memory_space<vmem>>, %arg6: memref<1x16x16x8xf32, #tpu.memory_space<vmem>>, %arg7: memref<18x18x8xf32, #tpu.memory_space<vmem>>) attributes {dimension_semantics = [#tpu.dimension_semantics<parallel>], iteration_bounds = array<i64: 2>, scalar_prefetch = 0 : i64, scratch_operands = 1 : i64, tpu.core_type = #tpu.core_type<tc>, window_params = [{transform_indices = @transform_0, window_bounds = array<i64: 1, 18, 18, 8>}, {pipeline_mode = #tpu.pipeline_mode<synchronous>, transform_indices = @transform_1, window_bounds = array<i64: 9, 8, 8>}, {pipeline_mode = #tpu.pipeline_mode<synchronous>, transform_indices = @transform_2, window_bounds = array<i64: 1, 8>}, {pipeline_mode = #tpu.pipeline_mode<synchronous>, transform_indices = @transform_3, window_bounds = array<i64: 9, 8, 8>}, {pipeline_mode = #tpu.pipeline_mode<synchronous>, transform_indices = @transform_4, window_bounds = array<i64: 1, 8>}, {transform_indices = @transform_5, window_bounds = array<i64: 1, 16, 16, 8>}]} {
    %c0 = arith.constant 0 : index
    %c0_0 = arith.constant 0 : index
    %c0_1 = arith.constant 0 : index
    %c0_2 = arith.constant 0 : index
    %0 = vector.load %arg1[%c0, %c0_0, %c0_1, %c0_2] : memref<1x18x18x8xf32, #tpu.memory_space<vmem>>, vector<1x16x16x8xf32>
    %1 = vector.shape_cast %0 : vector<1x16x16x8xf32> to vector<16x16x8xf32>
    %2 = vector.shape_cast %1 : vector<16x16x8xf32> to vector<256x8xf32>
    %c0_3 = arith.constant 0 : index
    %c0_4 = arith.constant 0 : index
    %c0_5 = arith.constant 0 : index
    %3 = vector.load %arg2[%c0_3, %c0_4, %c0_5] : memref<9x8x8xf32, #tpu.memory_space<vmem>>, vector<1x8x8xf32>
    %4 = vector.shape_cast %3 : vector<1x8x8xf32> to vector<8x8xf32>
    %cst = arith.constant dense<0.000000e+00> : vector<256x8xf32>
    %5 = tpu.matmul %2, %4, %cst {dimension_numbers = #tpu.dot_dimension_numbers<[1], [0], [0], [1], [0, 0, 1, 1], [], []>} : vector<256x8xf32>, vector<8x8xf32>, vector<256x8xf32> -> vector<256x8xf32>
    %c0_6 = arith.constant 0 : index
    %c0_7 = arith.constant 0 : index
    %c1 = arith.constant 1 : index
    %c0_8 = arith.constant 0 : index
    %6 = vector.load %arg1[%c0_6, %c0_7, %c1, %c0_8] : memref<1x18x18x8xf32, #tpu.memory_space<vmem>>, vector<1x16x16x8xf32>
    %7 = vector.shape_cast %6 : vector<1x16x16x8xf32> to vector<16x16x8xf32>
    %8 = vector.shape_cast %7 : vector<16x16x8xf32> to vector<256x8xf32>
    %c1_9 = arith.constant 1 : index
    %c0_10 = arith.constant 0 : index
    %c0_11 = arith.constant 0 : index
    %9 = vector.load %arg2[%c1_9, %c0_10, %c0_11] : memref<9x8x8xf32, #tpu.memory_space<vmem>>, vector<1x8x8xf32>
    %10 = vector.shape_cast %9 : vector<1x8x8xf32> to vector<8x8xf32>
    %cst_12 = arith.constant dense<0.000000e+00> : vector<256x8xf32>
    %11 = tpu.matmul %8, %10, %cst_12 {dimension_numbers = #tpu.dot_dimension_numbers<[1], [0], [0], [1], [0, 0, 1, 1], [], []>} : vector<256x8xf32>, vector<8x8xf32>, vector<256x8xf32> -> vector<256x8xf32>
    %12 = arith.addf %5, %11 : vector<256x8xf32>
    %c0_13 = arith.constant 0 : index
    %c0_14 = arith.constant 0 : index
    %c2 = arith.constant 2 : index
    %c0_15 = arith.constant 0 : index
    %13 = vector.load %arg1[%c0_13, %c0_14, %c2, %c0_15] : memref<1x18x18x8xf32, #tpu.memory_space<vmem>>, vector<1x16x16x8xf32>
    %14 = vector.shape_cast %13 : vector<1x16x16x8xf32> to vector<16x16x8xf32>
    %15 = vector.shape_cast %14 : vector<16x16x8xf32> to vector<256x8xf32>
    %c2_16 = arith.constant 2 : index
    %c0_17 = arith.constant 0 : index
    %c0_18 = arith.constant 0 : index
    %16 = vector.load %arg2[%c2_16, %c0_17, %c0_18] : memref<9x8x8xf32, #tpu.memory_space<vmem>>, vector<1x8x8xf32>
    %17 = vector.shape_cast %16 : vector<1x8x8xf32> to vector<8x8xf32>
    %cst_19 = arith.constant dense<0.000000e+00> : vector<256x8xf32>
    %18 = tpu.matmul %15, %17, %cst_19 {dimension_numbers = #tpu.dot_dimension_numbers<[1], [0], [0], [1], [0, 0, 1, 1], [], []>} : vector<256x8xf32>, vector<8x8xf32>, vector<256x8xf32> -> vector<256x8xf32>
    %19 = arith.addf %12, %18 : vector<256x8xf32>
    %c0_20 = arith.constant 0 : index
    %c1_21 = arith.constant 1 : index
    %c0_22 = arith.constant 0 : index
    %c0_23 = arith.constant 0 : index
    %20 = vector.load %arg1[%c0_20, %c1_21, %c0_22, %c0_23] : memref<1x18x18x8xf32, #tpu.memory_space<vmem>>, vector<1x16x16x8xf32>
    %21 = vector.shape_cast %20 : vector<1x16x16x8xf32> to vector<16x16x8xf32>
    %22 = vector.shape_cast %21 : vector<16x16x8xf32> to vector<256x8xf32>
    %c3 = arith.constant 3 : index
    %c0_24 = arith.constant 0 : index
    %c0_25 = arith.constant 0 : index
    %23 = vector.load %arg2[%c3, %c0_24, %c0_25] : memref<9x8x8xf32, #tpu.memory_space<vmem>>, vector<1x8x8xf32>
    %24 = vector.shape_cast %23 : vector<1x8x8xf32> to vector<8x8xf32>
    %cst_26 = arith.constant dense<0.000000e+00> : vector<256x8xf32>
    %25 = tpu.matmul %22, %24, %cst_26 {dimension_numbers = #tpu.dot_dimension_numbers<[1], [0], [0], [1], [0, 0, 1, 1], [], []>} : vector<256x8xf32>, vector<8x8xf32>, vector<256x8xf32> -> vector<256x8xf32>
    %26 = arith.addf %19, %25 : vector<256x8xf32>
    %c0_27 = arith.constant 0 : index
    %c1_28 = arith.constant 1 : index
    %c1_29 = arith.constant 1 : index
    %c0_30 = arith.constant 0 : index
    %27 = vector.load %arg1[%c0_27, %c1_28, %c1_29, %c0_30] : memref<1x18x18x8xf32, #tpu.memory_space<vmem>>, vector<1x16x16x8xf32>
    %28 = vector.shape_cast %27 : vector<1x16x16x8xf32> to vector<16x16x8xf32>
    %29 = vector.shape_cast %28 : vector<16x16x8xf32> to vector<256x8xf32>
    %c4 = arith.constant 4 : index
    %c0_31 = arith.constant 0 : index
    %c0_32 = arith.constant 0 : index
    %30 = vector.load %arg2[%c4, %c0_31, %c0_32] : memref<9x8x8xf32, #tpu.memory_space<vmem>>, vector<1x8x8xf32>
    %31 = vector.shape_cast %30 : vector<1x8x8xf32> to vector<8x8xf32>
    %cst_33 = arith.constant dense<0.000000e+00> : vector<256x8xf32>
    %32 = tpu.matmul %29, %31, %cst_33 {dimension_numbers = #tpu.dot_dimension_numbers<[1], [0], [0], [1], [0, 0, 1, 1], [], []>} : vector<256x8xf32>, vector<8x8xf32>, vector<256x8xf32> -> vector<256x8xf32>
    %33 = arith.addf %26, %32 : vector<256x8xf32>
    %c0_34 = arith.constant 0 : index
    %c1_35 = arith.constant 1 : index
    %c2_36 = arith.constant 2 : index
    %c0_37 = arith.constant 0 : index
    %34 = vector.load %arg1[%c0_34, %c1_35, %c2_36, %c0_37] : memref<1x18x18x8xf32, #tpu.memory_space<vmem>>, vector<1x16x16x8xf32>
    %35 = vector.shape_cast %34 : vector<1x16x16x8xf32> to vector<16x16x8xf32>
    %36 = vector.shape_cast %35 : vector<16x16x8xf32> to vector<256x8xf32>
    %c5 = arith.constant 5 : index
    %c0_38 = arith.constant 0 : index
    %c0_39 = arith.constant 0 : index
    %37 = vector.load %arg2[%c5, %c0_38, %c0_39] : memref<9x8x8xf32, #tpu.memory_space<vmem>>, vector<1x8x8xf32>
    %38 = vector.shape_cast %37 : vector<1x8x8xf32> to vector<8x8xf32>
    %cst_40 = arith.constant dense<0.000000e+00> : vector<256x8xf32>
    %39 = tpu.matmul %36, %38, %cst_40 {dimension_numbers = #tpu.dot_dimension_numbers<[1], [0], [0], [1], [0, 0, 1, 1], [], []>} : vector<256x8xf32>, vector<8x8xf32>, vector<256x8xf32> -> vector<256x8xf32>
    %40 = arith.addf %33, %39 : vector<256x8xf32>
    %c0_41 = arith.constant 0 : index
    %c2_42 = arith.constant 2 : index
    %c0_43 = arith.constant 0 : index
    %c0_44 = arith.constant 0 : index
    %41 = vector.load %arg1[%c0_41, %c2_42, %c0_43, %c0_44] : memref<1x18x18x8xf32, #tpu.memory_space<vmem>>, vector<1x16x16x8xf32>
    %42 = vector.shape_cast %41 : vector<1x16x16x8xf32> to vector<16x16x8xf32>
    %43 = vector.shape_cast %42 : vector<16x16x8xf32> to vector<256x8xf32>
    %c6 = arith.constant 6 : index
    %c0_45 = arith.constant 0 : index
    %c0_46 = arith.constant 0 : index
    %44 = vector.load %arg2[%c6, %c0_45, %c0_46] : memref<9x8x8xf32, #tpu.memory_space<vmem>>, vector<1x8x8xf32>
    %45 = vector.shape_cast %44 : vector<1x8x8xf32> to vector<8x8xf32>
    %cst_47 = arith.constant dense<0.000000e+00> : vector<256x8xf32>
    %46 = tpu.matmul %43, %45, %cst_47 {dimension_numbers = #tpu.dot_dimension_numbers<[1], [0], [0], [1], [0, 0, 1, 1], [], []>} : vector<256x8xf32>, vector<8x8xf32>, vector<256x8xf32> -> vector<256x8xf32>
    %47 = arith.addf %40, %46 : vector<256x8xf32>
    %c0_48 = arith.constant 0 : index
    %c2_49 = arith.constant 2 : index
    %c1_50 = arith.constant 1 : index
    %c0_51 = arith.constant 0 : index
    %48 = vector.load %arg1[%c0_48, %c2_49, %c1_50, %c0_51] : memref<1x18x18x8xf32, #tpu.memory_space<vmem>>, vector<1x16x16x8xf32>
    %49 = vector.shape_cast %48 : vector<1x16x16x8xf32> to vector<16x16x8xf32>
    %50 = vector.shape_cast %49 : vector<16x16x8xf32> to vector<256x8xf32>
    %c7 = arith.constant 7 : index
    %c0_52 = arith.constant 0 : index
    %c0_53 = arith.constant 0 : index
    %51 = vector.load %arg2[%c7, %c0_52, %c0_53] : memref<9x8x8xf32, #tpu.memory_space<vmem>>, vector<1x8x8xf32>
    %52 = vector.shape_cast %51 : vector<1x8x8xf32> to vector<8x8xf32>
    %cst_54 = arith.constant dense<0.000000e+00> : vector<256x8xf32>
    %53 = tpu.matmul %50, %52, %cst_54 {dimension_numbers = #tpu.dot_dimension_numbers<[1], [0], [0], [1], [0, 0, 1, 1], [], []>} : vector<256x8xf32>, vector<8x8xf32>, vector<256x8xf32> -> vector<256x8xf32>
    %54 = arith.addf %47, %53 : vector<256x8xf32>
    %c0_55 = arith.constant 0 : index
    %c2_56 = arith.constant 2 : index
    %c2_57 = arith.constant 2 : index
    %c0_58 = arith.constant 0 : index
    %55 = vector.load %arg1[%c0_55, %c2_56, %c2_57, %c0_58] : memref<1x18x18x8xf32, #tpu.memory_space<vmem>>, vector<1x16x16x8xf32>
    %56 = vector.shape_cast %55 : vector<1x16x16x8xf32> to vector<16x16x8xf32>
    %57 = vector.shape_cast %56 : vector<16x16x8xf32> to vector<256x8xf32>
    %c8 = arith.constant 8 : index
    %c0_59 = arith.constant 0 : index
    %c0_60 = arith.constant 0 : index
    %58 = vector.load %arg2[%c8, %c0_59, %c0_60] : memref<9x8x8xf32, #tpu.memory_space<vmem>>, vector<1x8x8xf32>
    %59 = vector.shape_cast %58 : vector<1x8x8xf32> to vector<8x8xf32>
    %cst_61 = arith.constant dense<0.000000e+00> : vector<256x8xf32>
    %60 = tpu.matmul %57, %59, %cst_61 {dimension_numbers = #tpu.dot_dimension_numbers<[1], [0], [0], [1], [0, 0, 1, 1], [], []>} : vector<256x8xf32>, vector<8x8xf32>, vector<256x8xf32> -> vector<256x8xf32>
    %61 = arith.addf %54, %60 : vector<256x8xf32>
    %c0_62 = arith.constant 0 : index
    %c0_63 = arith.constant 0 : index
    %62 = vector.load %arg3[%c0_62, %c0_63] : memref<1x8xf32, #tpu.memory_space<vmem>>, vector<1x8xf32>
    %63 = vector.broadcast %62 : vector<1x8xf32> to vector<256x8xf32>
    %64 = arith.addf %61, %63 : vector<256x8xf32>
    %cst_64 = arith.constant 0.000000e+00 : f32
    %65 = vector.broadcast %cst_64 : f32 to vector<256x8xf32>
    %66 = arith.maximumf %64, %65 : vector<256x8xf32>
    %cst_65 = arith.constant 0.000000e+00 : f32
    %67 = vector.broadcast %cst_65 : f32 to vector<1x18x8xf32>
    %c0_66 = arith.constant 0 : index
    %c0_67 = arith.constant 0 : index
    %c0_68 = arith.constant 0 : index
    %68 = vector.load %arg7[%c0_66, %c0_67, %c0_68] : memref<18x18x8xf32, #tpu.memory_space<vmem>>, vector<1x18x8xf32>
    tpu.vector_store %arg7[%c0_66, %c0_67, %c0_68], %67 {strides = array<i32>} : memref<18x18x8xf32, #tpu.memory_space<vmem>>, vector<1x18x8xf32>,
    %c17 = arith.constant 17 : index
    %c0_69 = arith.constant 0 : index
    %c0_70 = arith.constant 0 : index
    %69 = vector.load %arg7[%c17, %c0_69, %c0_70] : memref<18x18x8xf32, #tpu.memory_space<vmem>>, vector<1x18x8xf32>
    tpu.vector_store %arg7[%c17, %c0_69, %c0_70], %67 {strides = array<i32>} : memref<18x18x8xf32, #tpu.memory_space<vmem>>, vector<1x18x8xf32>,
    %cst_71 = arith.constant 0.000000e+00 : f32
    %70 = vector.broadcast %cst_71 : f32 to vector<18x1x8xf32>
    %c0_72 = arith.constant 0 : index
    %c0_73 = arith.constant 0 : index
    %c0_74 = arith.constant 0 : index
    %71 = vector.load %arg7[%c0_72, %c0_73, %c0_74] : memref<18x18x8xf32, #tpu.memory_space<vmem>>, vector<18x1x8xf32>
    tpu.vector_store %arg7[%c0_72, %c0_73, %c0_74], %70 {strides = array<i32>} : memref<18x18x8xf32, #tpu.memory_space<vmem>>, vector<18x1x8xf32>,
    %c0_75 = arith.constant 0 : index
    %c17_76 = arith.constant 17 : index
    %c0_77 = arith.constant 0 : index
    %72 = vector.load %arg7[%c0_75, %c17_76, %c0_77] : memref<18x18x8xf32, #tpu.memory_space<vmem>>, vector<18x1x8xf32>
    tpu.vector_store %arg7[%c0_75, %c17_76, %c0_77], %70 {strides = array<i32>} : memref<18x18x8xf32, #tpu.memory_space<vmem>>, vector<18x1x8xf32>,
    %73 = vector.shape_cast %66 : vector<256x8xf32> to vector<16x16x8xf32>
    %c1_78 = arith.constant 1 : index
    %c1_79 = arith.constant 1 : index
    %c0_80 = arith.constant 0 : index
    %74 = vector.load %arg7[%c1_78, %c1_79, %c0_80] : memref<18x18x8xf32, #tpu.memory_space<vmem>>, vector<16x16x8xf32>
    tpu.vector_store %arg7[%c1_78, %c1_79, %c0_80], %73 {strides = array<i32>} : memref<18x18x8xf32, #tpu.memory_space<vmem>>, vector<16x16x8xf32>,
    %c0_81 = arith.constant 0 : index
    %c0_82 = arith.constant 0 : index
    %c0_83 = arith.constant 0 : index
    %75 = vector.load %arg7[%c0_81, %c0_82, %c0_83] : memref<18x18x8xf32, #tpu.memory_space<vmem>>, vector<16x16x8xf32>
    %76 = vector.shape_cast %75 : vector<16x16x8xf32> to vector<256x8xf32>
    %c0_84 = arith.constant 0 : index
    %c0_85 = arith.constant 0 : index
    %c0_86 = arith.constant 0 : index
    %77 = vector.load %arg4[%c0_84, %c0_85, %c0_86] : memref<9x8x8xf32, #tpu.memory_space<vmem>>, vector<1x8x8xf32>
    %78 = vector.shape_cast %77 : vector<1x8x8xf32> to vector<8x8xf32>
    %cst_87 = arith.constant dense<0.000000e+00> : vector<256x8xf32>
    %79 = tpu.matmul %76, %78, %cst_87 {dimension_numbers = #tpu.dot_dimension_numbers<[1], [0], [0], [1], [0, 0, 1, 1], [], []>} : vector<256x8xf32>, vector<8x8xf32>, vector<256x8xf32> -> vector<256x8xf32>
    %c0_88 = arith.constant 0 : index
    %c1_89 = arith.constant 1 : index
    %c0_90 = arith.constant 0 : index
    %80 = vector.load %arg7[%c0_88, %c1_89, %c0_90] : memref<18x18x8xf32, #tpu.memory_space<vmem>>, vector<16x16x8xf32>
    %81 = vector.shape_cast %80 : vector<16x16x8xf32> to vector<256x8xf32>
    %c1_91 = arith.constant 1 : index
    %c0_92 = arith.constant 0 : index
    %c0_93 = arith.constant 0 : index
    %82 = vector.load %arg4[%c1_91, %c0_92, %c0_93] : memref<9x8x8xf32, #tpu.memory_space<vmem>>, vector<1x8x8xf32>
    %83 = vector.shape_cast %82 : vector<1x8x8xf32> to vector<8x8xf32>
    %cst_94 = arith.constant dense<0.000000e+00> : vector<256x8xf32>
    %84 = tpu.matmul %81, %83, %cst_94 {dimension_numbers = #tpu.dot_dimension_numbers<[1], [0], [0], [1], [0, 0, 1, 1], [], []>} : vector<256x8xf32>, vector<8x8xf32>, vector<256x8xf32> -> vector<256x8xf32>
    %85 = arith.addf %79, %84 : vector<256x8xf32>
    %c0_95 = arith.constant 0 : index
    %c2_96 = arith.constant 2 : index
    %c0_97 = arith.constant 0 : index
    %86 = vector.load %arg7[%c0_95, %c2_96, %c0_97] : memref<18x18x8xf32, #tpu.memory_space<vmem>>, vector<16x16x8xf32>
    %87 = vector.shape_cast %86 : vector<16x16x8xf32> to vector<256x8xf32>
    %c2_98 = arith.constant 2 : index
    %c0_99 = arith.constant 0 : index
    %c0_100 = arith.constant 0 : index
    %88 = vector.load %arg4[%c2_98, %c0_99, %c0_100] : memref<9x8x8xf32, #tpu.memory_space<vmem>>, vector<1x8x8xf32>
    %89 = vector.shape_cast %88 : vector<1x8x8xf32> to vector<8x8xf32>
    %cst_101 = arith.constant dense<0.000000e+00> : vector<256x8xf32>
    %90 = tpu.matmul %87, %89, %cst_101 {dimension_numbers = #tpu.dot_dimension_numbers<[1], [0], [0], [1], [0, 0, 1, 1], [], []>} : vector<256x8xf32>, vector<8x8xf32>, vector<256x8xf32> -> vector<256x8xf32>
    %91 = arith.addf %85, %90 : vector<256x8xf32>
    %c1_102 = arith.constant 1 : index
    %c0_103 = arith.constant 0 : index
    %c0_104 = arith.constant 0 : index
    %92 = vector.load %arg7[%c1_102, %c0_103, %c0_104] : memref<18x18x8xf32, #tpu.memory_space<vmem>>, vector<16x16x8xf32>
    %93 = vector.shape_cast %92 : vector<16x16x8xf32> to vector<256x8xf32>
    %c3_105 = arith.constant 3 : index
    %c0_106 = arith.constant 0 : index
    %c0_107 = arith.constant 0 : index
    %94 = vector.load %arg4[%c3_105, %c0_106, %c0_107] : memref<9x8x8xf32, #tpu.memory_space<vmem>>, vector<1x8x8xf32>
    %95 = vector.shape_cast %94 : vector<1x8x8xf32> to vector<8x8xf32>
    %cst_108 = arith.constant dense<0.000000e+00> : vector<256x8xf32>
    %96 = tpu.matmul %93, %95, %cst_108 {dimension_numbers = #tpu.dot_dimension_numbers<[1], [0], [0], [1], [0, 0, 1, 1], [], []>} : vector<256x8xf32>, vector<8x8xf32>, vector<256x8xf32> -> vector<256x8xf32>
    %97 = arith.addf %91, %96 : vector<256x8xf32>
    %c1_109 = arith.constant 1 : index
    %c1_110 = arith.constant 1 : index
    %c0_111 = arith.constant 0 : index
    %98 = vector.load %arg7[%c1_109, %c1_110, %c0_111] : memref<18x18x8xf32, #tpu.memory_space<vmem>>, vector<16x16x8xf32>
    %99 = vector.shape_cast %98 : vector<16x16x8xf32> to vector<256x8xf32>
    %c4_112 = arith.constant 4 : index
    %c0_113 = arith.constant 0 : index
    %c0_114 = arith.constant 0 : index
    %100 = vector.load %arg4[%c4_112, %c0_113, %c0_114] : memref<9x8x8xf32, #tpu.memory_space<vmem>>, vector<1x8x8xf32>
    %101 = vector.shape_cast %100 : vector<1x8x8xf32> to vector<8x8xf32>
    %cst_115 = arith.constant dense<0.000000e+00> : vector<256x8xf32>
    %102 = tpu.matmul %99, %101, %cst_115 {dimension_numbers = #tpu.dot_dimension_numbers<[1], [0], [0], [1], [0, 0, 1, 1], [], []>} : vector<256x8xf32>, vector<8x8xf32>, vector<256x8xf32> -> vector<256x8xf32>
    %103 = arith.addf %97, %102 : vector<256x8xf32>
    %c1_116 = arith.constant 1 : index
    %c2_117 = arith.constant 2 : index
    %c0_118 = arith.constant 0 : index
    %104 = vector.load %arg7[%c1_116, %c2_117, %c0_118] : memref<18x18x8xf32, #tpu.memory_space<vmem>>, vector<16x16x8xf32>
    %105 = vector.shape_cast %104 : vector<16x16x8xf32> to vector<256x8xf32>
    %c5_119 = arith.constant 5 : index
    %c0_120 = arith.constant 0 : index
    %c0_121 = arith.constant 0 : index
    %106 = vector.load %arg4[%c5_119, %c0_120, %c0_121] : memref<9x8x8xf32, #tpu.memory_space<vmem>>, vector<1x8x8xf32>
    %107 = vector.shape_cast %106 : vector<1x8x8xf32> to vector<8x8xf32>
    %cst_122 = arith.constant dense<0.000000e+00> : vector<256x8xf32>
    %108 = tpu.matmul %105, %107, %cst_122 {dimension_numbers = #tpu.dot_dimension_numbers<[1], [0], [0], [1], [0, 0, 1, 1], [], []>} : vector<256x8xf32>, vector<8x8xf32>, vector<256x8xf32> -> vector<256x8xf32>
    %109 = arith.addf %103, %108 : vector<256x8xf32>
    %c2_123 = arith.constant 2 : index
    %c0_124 = arith.constant 0 : index
    %c0_125 = arith.constant 0 : index
    %110 = vector.load %arg7[%c2_123, %c0_124, %c0_125] : memref<18x18x8xf32, #tpu.memory_space<vmem>>, vector<16x16x8xf32>
    %111 = vector.shape_cast %110 : vector<16x16x8xf32> to vector<256x8xf32>
    %c6_126 = arith.constant 6 : index
    %c0_127 = arith.constant 0 : index
    %c0_128 = arith.constant 0 : index
    %112 = vector.load %arg4[%c6_126, %c0_127, %c0_128] : memref<9x8x8xf32, #tpu.memory_space<vmem>>, vector<1x8x8xf32>
    %113 = vector.shape_cast %112 : vector<1x8x8xf32> to vector<8x8xf32>
    %cst_129 = arith.constant dense<0.000000e+00> : vector<256x8xf32>
    %114 = tpu.matmul %111, %113, %cst_129 {dimension_numbers = #tpu.dot_dimension_numbers<[1], [0], [0], [1], [0, 0, 1, 1], [], []>} : vector<256x8xf32>, vector<8x8xf32>, vector<256x8xf32> -> vector<256x8xf32>
    %115 = arith.addf %109, %114 : vector<256x8xf32>
    %c2_130 = arith.constant 2 : index
    %c1_131 = arith.constant 1 : index
    %c0_132 = arith.constant 0 : index
    %116 = vector.load %arg7[%c2_130, %c1_131, %c0_132] : memref<18x18x8xf32, #tpu.memory_space<vmem>>, vector<16x16x8xf32>
    %117 = vector.shape_cast %116 : vector<16x16x8xf32> to vector<256x8xf32>
    %c7_133 = arith.constant 7 : index
    %c0_134 = arith.constant 0 : index
    %c0_135 = arith.constant 0 : index
    %118 = vector.load %arg4[%c7_133, %c0_134, %c0_135] : memref<9x8x8xf32, #tpu.memory_space<vmem>>, vector<1x8x8xf32>
    %119 = vector.shape_cast %118 : vector<1x8x8xf32> to vector<8x8xf32>
    %cst_136 = arith.constant dense<0.000000e+00> : vector<256x8xf32>
    %120 = tpu.matmul %117, %119, %cst_136 {dimension_numbers = #tpu.dot_dimension_numbers<[1], [0], [0], [1], [0, 0, 1, 1], [], []>} : vector<256x8xf32>, vector<8x8xf32>, vector<256x8xf32> -> vector<256x8xf32>
    %121 = arith.addf %115, %120 : vector<256x8xf32>
    %c2_137 = arith.constant 2 : index
    %c2_138 = arith.constant 2 : index
    %c0_139 = arith.constant 0 : index
    %122 = vector.load %arg7[%c2_137, %c2_138, %c0_139] : memref<18x18x8xf32, #tpu.memory_space<vmem>>, vector<16x16x8xf32>
    %123 = vector.shape_cast %122 : vector<16x16x8xf32> to vector<256x8xf32>
    %c8_140 = arith.constant 8 : index
    %c0_141 = arith.constant 0 : index
    %c0_142 = arith.constant 0 : index
    %124 = vector.load %arg4[%c8_140, %c0_141, %c0_142] : memref<9x8x8xf32, #tpu.memory_space<vmem>>, vector<1x8x8xf32>
    %125 = vector.shape_cast %124 : vector<1x8x8xf32> to vector<8x8xf32>
    %cst_143 = arith.constant dense<0.000000e+00> : vector<256x8xf32>
    %126 = tpu.matmul %123, %125, %cst_143 {dimension_numbers = #tpu.dot_dimension_numbers<[1], [0], [0], [1], [0, 0, 1, 1], [], []>} : vector<256x8xf32>, vector<8x8xf32>, vector<256x8xf32> -> vector<256x8xf32>
    %127 = arith.addf %121, %126 : vector<256x8xf32>
    %c0_144 = arith.constant 0 : index
    %c0_145 = arith.constant 0 : index
    %128 = vector.load %arg5[%c0_144, %c0_145] : memref<1x8xf32, #tpu.memory_space<vmem>>, vector<1x8xf32>
    %129 = vector.broadcast %128 : vector<1x8xf32> to vector<256x8xf32>
    %130 = arith.addf %127, %129 : vector<256x8xf32>
    %c0_146 = arith.constant 0 : index
    %c1_147 = arith.constant 1 : index
    %c1_148 = arith.constant 1 : index
    %c0_149 = arith.constant 0 : index
    %131 = vector.load %arg1[%c0_146, %c1_147, %c1_148, %c0_149] : memref<1x18x18x8xf32, #tpu.memory_space<vmem>>, vector<1x16x16x8xf32>
    %132 = vector.shape_cast %131 : vector<1x16x16x8xf32> to vector<16x16x8xf32>
    %133 = vector.shape_cast %132 : vector<16x16x8xf32> to vector<256x8xf32>
    %134 = arith.addf %130, %133 : vector<256x8xf32>
    %cst_150 = arith.constant 0.000000e+00 : f32
    %135 = vector.broadcast %cst_150 : f32 to vector<256x8xf32>
    %136 = arith.maximumf %134, %135 : vector<256x8xf32>
    %137 = vector.shape_cast %136 : vector<256x8xf32> to vector<1x16x16x8xf32>
    %c0_151 = arith.constant 0 : index
    %c0_152 = arith.constant 0 : index
    %c0_153 = arith.constant 0 : index
    %c0_154 = arith.constant 0 : index
    %138 = vector.load %arg6[%c0_151, %c0_152, %c0_153, %c0_154] : memref<1x16x16x8xf32, #tpu.memory_space<vmem>>, vector<1x16x16x8xf32>
    tpu.vector_store %arg6[%c0_151, %c0_152, %c0_153, %c0_154], %137 {strides = array<i32>} : memref<1x16x16x8xf32, #tpu.memory_space<vmem>>, vector<1x16x16x8xf32>,
    return
  }
  func.func @transform_0(%arg0: i32) -> (i32, i32, i32, i32) {
    %c0_i32 = arith.constant 0 : i32
    %c0_i32_0 = arith.constant 0 : i32
    %c0_i32_1 = arith.constant 0 : i32
    %c0_i32_2 = arith.constant 0 : i32
    return %arg0, %c0_i32, %c0_i32_0, %c0_i32_1 : i32, i32, i32, i32
  }
  func.func @transform_1(%arg0: i32) -> (i32, i32, i32) {
    %c0_i32 = arith.constant 0 : i32
    %c0_i32_0 = arith.constant 0 : i32
    %c0_i32_1 = arith.constant 0 : i32
    %c0_i32_2 = arith.constant 0 : i32
    return %c0_i32, %c0_i32_0, %c0_i32_1 : i32, i32, i32
  }
  func.func @transform_2(%arg0: i32) -> (i32, i32) {
    %c0_i32 = arith.constant 0 : i32
    %c0_i32_0 = arith.constant 0 : i32
    %c0_i32_1 = arith.constant 0 : i32
    return %c0_i32, %c0_i32_0 : i32, i32
  }
  func.func @transform_3(%arg0: i32) -> (i32, i32, i32) {
    %c0_i32 = arith.constant 0 : i32
    %c0_i32_0 = arith.constant 0 : i32
    %c0_i32_1 = arith.constant 0 : i32
    %c0_i32_2 = arith.constant 0 : i32
    return %c0_i32, %c0_i32_0, %c0_i32_1 : i32, i32, i32
  }
  func.func @transform_4(%arg0: i32) -> (i32, i32) {
    %c0_i32 = arith.constant 0 : i32
    %c0_i32_0 = arith.constant 0 : i32
    %c0_i32_1 = arith.constant 0 : i32
    return %c0_i32, %c0_i32_0 : i32, i32
  }
  func.func @transform_5(%arg0: i32) -> (i32, i32, i32, i32) {
    %c0_i32 = arith.constant 0 : i32
    %c0_i32_0 = arith.constant 0 : i32
    %c0_i32_1 = arith.constant 0 : i32
    %c0_i32_2 = arith.constant 0 : i32
    return %arg0, %c0_i32, %c0_i32_0, %c0_i32_1 : i32, i32, i32, i32
  }
}

</mosaic_0001>

<bundles_post_ra>
// kernel: tpu_custom_call.1
= control target key start
LH: loop header
LB: loop body
LE: loop exit
PB: predicated region body
PF: predicated region fallthrough
CT: control target
= control target key end

     0   :  { %s10320_s18 = smov 0   ;;  %s12275_s0 = inlined_call_operand.vmem [shape: f32[2,18,18,8], index: 0, kind: input, shape index: {}]   ;;  %s12276_s1 = inlined_call_operand.vmem [shape: f32[9,8,8], index: 1, kind: input, shape index: {}]   ;;  %s12277_s2 = inlined_call_operand.vmem [shape: f32[1,8], index: 2, kind: input, shape index: {}]   ;;  %s12278_s3 = inlined_call_operand.vmem [shape: f32[9,8,8], index: 3, kind: input, shape index: {}]   ;;  %s12279_s4 = inlined_call_operand.vmem [shape: f32[1,8], index: 4, kind: input, shape index: {}]   ;;  %s12280_s5 = inlined_call_operand.vmem [shape: f32[2,16,16,8], index: 5, kind: output, shape index: {}]  }
   0x1 LB: > { %s7436_s19 = sadd.s32 4294967295, %s10287_s18   ;;  %p7440_p0 = scmp.ge.s32.totalorder %s10287_s18, 1  ;;  %s10287_s18 = sphi %s10320_s18, %s15_s18  }
   0x2   : > { %p187_p1 = scmp.lt.s32.totalorder %s10287_s18, 3 }
   0x4   : > { %p188_p2 = pnand %p7440_p0, %p187_p1 }
   0x6   : > { %191 = sbr.rel (%p188_p2) target bundleno = 1547 (0x60b), region = 40 }
   0xd   : > { %v7444_v0 = vld [vmem:[%s12276_s1 + $0x8] sm:$0xff]  ;;  %p215_p3 = scmp.lt.s32.totalorder %s7436_s19, 1  ;;  %v257_v1 = vld [vmem:[%s12276_s1] sm:$0xff]  ;;  %vm292_vm0 = vcmask 64512   ;;  %v10351_v5 = vld [vmem:[%s12276_s1 + $0x10] sm:$0xff]  ;;  %vm3719_vm1 = vcmask 58368  }
   0xe   : > { %8859 = vmatprep.subr.mxu0 %v7444_v0  ;;  %v10511_v38 = vld [vmem:[%s12276_s1 + $0x18] sm:$0xff]  ;;  %vm3725_vm2 = vcmask 57344  }
   0xf   : > { %8860 = vmatpush3.msra.mxu0 %v7444_v0  ;;  %s12566_s19 = smov (!%p215_p3, %s7436_s19), 1 }
  0x10   : > { %8909 = vmatprep.subr.mxu0 %v257_v1  ;;  %s10271_s24 = smul.u32 432, %s12566_s19  ;;  %s8264_s17 = sshll.u32 %s12566_s19, 8 }
  0x11   : > { %s12146_s22 = scalar_lea.vmem %s12280_s5, %s8264_s17 }
  0x12   : > { %s10340_s27 = scalar_lea.vmem %s12275_s0, %s10271_s24 }
  0x13   : > { %v258_v2 = vld [vmem:[%s10340_s27 + $0x1] sm:$0xff]  ;;  %v259_v3 = vld [vmem:[%s10340_s27 + $0x9] sm:$0xff]  ;;  %v10345_v4 = vld [vmem:[%s10340_s27 + $0x19] sm:$0xff] }
  0x14   : > { %8861 = vmatprep.mubr.msk.f32.mxu0 %vm292_vm0, %v258_v2  ;;  %v10357_v6 = vld [vmem:[%s10340_s27 + $0x21] sm:$0xff]  ;;  %v10360_v7 = vld [vmem:[%s10340_s27 + $0x31] sm:$0xff]  ;;  %v10368_v8 = vld [vmem:[%s10340_s27 + $0x39] sm:$0xff] }
  0x15   : > { %8862 = vmatmul.mubr.msk.f32.vlgmr.msra.gmra.mrb[0].mxu0 %vm292_vm0, %v259_v3  ;;  %v10371_v9 = vld [vmem:[%s10340_s27 + $0x49] sm:$0xff]  ;;  %v10378_v10 = vld [vmem:[%s10340_s27 + $0x51] sm:$0xff]  ;;  %v10381_v11 = vld [vmem:[%s10340_s27 + $0x61] sm:$0xff] }
  0x16   : > { %8910 = vmatpush3.msra.mxu0 %v257_v1  ;;  %8864 = vmatprep.mubr.msk.f32.mxu0 %vm292_vm0, %v10345_v4  ;;  %v10388_v12 = vld [vmem:[%s10340_s27 + $0x69] sm:$0xff]  ;;  %v10391_v13 = vld [vmem:[%s10340_s27 + $0x79] sm:$0xff]  ;;  %v10398_v14 = vld [vmem:[%s10340_s27 + $0x81] sm:$0xff] }
  0x17   : > { %8959 = vmatprep.subr.mxu0 %v10351_v5  ;;  %v10401_v15 = vld [vmem:[%s10340_s27 + $0x91] sm:$0xff]  ;;  %v10408_v16 = vld [vmem:[%s10340_s27 + $0x99] sm:$0xff]  ;;  %v10411_v17 = vld [vmem:[%s10340_s27 + $0xa9] sm:$0xff] }
  0x18   : > { %v10418_v18 = vld [vmem:[%s10340_s27 + $0xb1] sm:$0xff]  ;;  %v10421_v19 = vld [vmem:[%s10340_s27 + $0xc1] sm:$0xff]  ;;  %v10428_v20 = vld [vmem:[%s10340_s27 + $0xc9] sm:$0xff] }
  0x19   : > { %8865 = vmatmul.mubr.msk.f32.gmra.mrb[2].mxu0 %vm292_vm0, %v10357_v6  ;;  %v10431_v21 = vld [vmem:[%s10340_s27 + $0xd9] sm:$0xff]  ;;  %v10438_v22 = vld [vmem:[%s10340_s27 + $0xe1] sm:$0xff]  ;;  %v10441_v23 = vld [vmem:[%s10340_s27 + $0xf1] sm:$0xff] }
  0x1a   : > { %8867 = vmatprep.mubr.msk.f32.mxu0 %vm292_vm0, %v10360_v7  ;;  %v10448_v24 = vld [vmem:[%s10340_s27 + $0xf9] sm:$0xff]  ;;  %v10451_v25 = vld [vmem:[%s10340_s27 + $0x109] sm:$0xff]  ;;  %v10458_v26 = vld [vmem:[%s10340_s27 + $0x111] sm:$0xff] }
  0x1b   : > { %v10461_v27 = vld [vmem:[%s10340_s27 + $0x121] sm:$0xff]  ;;  %v10468_v28 = vld [vmem:[%s10340_s27 + $0x129] sm:$0xff]  ;;  %v10471_v29 = vld [vmem:[%s10340_s27 + $0x139] sm:$0xff] }
  0x1c   : > { %12398 = vst [vmem:[#allocation3_spill] sm:$0xff] %v10461_v27  ;;  %12399 = vst [vmem:[#allocation4_spill] sm:$0xff] %v10468_v28  ;;  %v10478_v30 = vld [vmem:[%s10340_s27 + $0x141] sm:$0xff]  ;;  %v10481_v31 = vld [vmem:[%s10340_s27 + $0x151] sm:$0xff] }
  0x1d   : > { %8868 = vmatmul.mubr.msk.f32.gmra.mrb[4].mxu0 %vm292_vm0, %v10368_v8  ;;  %12400 = vst [vmem:[#allocation5_spill] sm:$0xff] %v10471_v29  ;;  %12401 = vst [vmem:[#allocation6_spill] sm:$0xff] %v10478_v30  ;;  %v10488_v32 = vld [vmem:[%s10340_s27 + $0x159] sm:$0xff]  ;;  %v10491_v33 = vld [vmem:[%s10340_s27 + $0x169] sm:$0xff] }
  0x1e   : > { %8870 = vmatprep.mubr.msk.f32.mxu0 %vm292_vm0, %v10371_v9  ;;  %12402 = vst [vmem:[#allocation7_spill] sm:$0xff] %v10481_v31  ;;  %12403 = vst [vmem:[#allocation8_spill] sm:$0xff] %v10488_v32  ;;  %v10498_v34 = vld [vmem:[%s10340_s27 + $0x171] sm:$0xff]  ;;  %v225_v35 = vld [vmem:[%s10340_s27] sm:$0xff] }
  0x1f   : > { %12404 = vst [vmem:[#allocation9_spill] sm:$0xff] %v10491_v33  ;;  %12405 = vst [vmem:[#allocation10_spill] sm:$0xff] %v10498_v34  ;;  %v226_v36 = vld [vmem:[%s10340_s27 + $0x8] sm:$0xff]  ;;  %v10506_v37 = vld [vmem:[%s10340_s27 + $0x18] sm:$0xff] }
  0x20   : > { %v10518_v39 = vld [vmem:[%s10340_s27 + $0x20] sm:$0xff]  ;;  %v10521_v40 = vld [vmem:[%s10340_s27 + $0x30] sm:$0xff]  ;;  %v10529_v41 = vld [vmem:[%s10340_s27 + $0x38] sm:$0xff] }
  0x21   : > { %8871 = vmatmul.mubr.msk.f32.gmra.mrb[6].mxu0 %vm292_vm0, %v10378_v10  ;;  %v10532_v42 = vld [vmem:[%s10340_s27 + $0x48] sm:$0xff]  ;;  %v10539_v43 = vld [vmem:[%s10340_s27 + $0x50] sm:$0xff]  ;;  %v10542_v44 = vld [vmem:[%s10340_s27 + $0x60] sm:$0xff] }
  0x22   : > { %8873 = vmatprep.mubr.msk.f32.mxu0 %vm292_vm0, %v10381_v11  ;;  %v10549_v45 = vld [vmem:[%s10340_s27 + $0x68] sm:$0xff]  ;;  %v10552_v46 = vld [vmem:[%s10340_s27 + $0x78] sm:$0xff]  ;;  %v10559_v47 = vld [vmem:[%s10340_s27 + $0x80] sm:$0xff] }
  0x23   : > { %v10562_v48 = vld [vmem:[%s10340_s27 + $0x90] sm:$0xff]  ;;  %v10569_v49 = vld [vmem:[%s10340_s27 + $0x98] sm:$0xff]  ;;  %v10572_v50 = vld [vmem:[%s10340_s27 + $0xa8] sm:$0xff] }
  0x24   : > { %v10579_v51 = vld [vmem:[%s10340_s27 + $0xb0] sm:$0xff]  ;;  %v10582_v52 = vld [vmem:[%s10340_s27 + $0xc0] sm:$0xff]  ;;  %v10589_v53 = vld [vmem:[%s10340_s27 + $0xc8] sm:$0xff] }
  0x25   : > { %8874 = vmatmul.mubr.msk.f32.gmra.mrb[8].mxu0 %vm292_vm0, %v10388_v12  ;;  %v10592_v54 = vld [vmem:[%s10340_s27 + $0xd8] sm:$0xff]  ;;  %v10599_v55 = vld [vmem:[%s10340_s27 + $0xe0] sm:$0xff]  ;;  %v10602_v56 = vld [vmem:[%s10340_s27 + $0xf0] sm:$0xff] }
  0x26   : > { %8876 = vmatprep.mubr.msk.f32.mxu0 %vm292_vm0, %v10391_v13  ;;  %v10609_v57 = vld [vmem:[%s10340_s27 + $0xf8] sm:$0xff]  ;;  %v10612_v58 = vld [vmem:[%s10340_s27 + $0x108] sm:$0xff]  ;;  %v10619_v59 = vld [vmem:[%s10340_s27 + $0x110] sm:$0xff] }
  0x27   : > { %v10622_v60 = vld [vmem:[%s10340_s27 + $0x120] sm:$0xff]  ;;  %v10629_v61 = vld [vmem:[%s10340_s27 + $0x128] sm:$0xff]  ;;  %v10632_v62 = vld [vmem:[%s10340_s27 + $0x138] sm:$0xff] }
  0x28   : > { %v10639_v63 = vld [vmem:[%s10340_s27 + $0x140] sm:$0xff]  ;;  %v10642_v0 = vld [vmem:[%s10340_s27 + $0x150] sm:$0xff]  ;;  %v10649_v1 = vld [vmem:[%s10340_s27 + $0x158] sm:$0xff] }
  0x29   : > { %8877 = vmatmul.mubr.msk.f32.gmra.mrb[10].mxu0 %vm292_vm0, %v10398_v14  ;;  %v10652_v2 = vld [vmem:[%s10340_s27 + $0x168] sm:$0xff]  ;;  %v10659_v3 = vld [vmem:[%s10340_s27 + $0x170] sm:$0xff] }
  0x2a   : > { %8879 = vmatprep.mubr.msk.f32.mxu0 %vm292_vm0, %v10401_v15 }
  0x2d   : > { %8880 = vmatmul.mubr.msk.f32.gmra.mrb[12].mxu0 %vm292_vm0, %v10408_v16 }
  0x2e   : > { %8882 = vmatprep.mubr.msk.f32.mxu0 %vm292_vm0, %v10411_v17 }
  0x31   : > { %8883 = vmatmul.mubr.msk.f32.gmra.mrb[14].mxu0 %vm292_vm0, %v10418_v18 }
  0x32   : > { %8885 = vmatprep.mubr.msk.f32.mxu0 %vm292_vm0, %v10421_v19 }
  0x35   : > { %8886 = vmatmul.mubr.msk.f32.gmra.mrb[16].mxu0 %vm292_vm0, %v10428_v20 }
  0x36   : > { %8888 = vmatprep.mubr.msk.f32.mxu0 %vm292_vm0, %v10431_v21 }
  0x39   : > { %8889 = vmatmul.mubr.msk.f32.gmra.mrb[18].mxu0 %vm292_vm0, %v10438_v22 }
  0x3a   : > { %8891 = vmatprep.mubr.msk.f32.mxu0 %vm292_vm0, %v10441_v23 }
  0x3d   : > { %8892 = vmatmul.mubr.msk.f32.gmra.mrb[20].mxu0 %vm292_vm0, %v10448_v24 }
  0x3e   : > { %8894 = vmatprep.mubr.msk.f32.mxu0 %vm292_vm0, %v10451_v25 }
  0x41   : > { %8895 = vmatmul.mubr.msk.f32.gmra.mrb[22].mxu0 %vm292_vm0, %v10458_v26 }
  0x42   : > { %8897 = vmatprep.mubr.msk.f32.mxu0 %vm292_vm0, %v10461_v27 }
  0x45   : > { %8898 = vmatmul.mubr.msk.f32.gmra.mrb[24].mxu0 %vm292_vm0, %v10468_v28 }
  0x46   : > { %8900 = vmatprep.mubr.msk.f32.mxu0 %vm292_vm0, %v10471_v29 }
  0x49   : > { %8901 = vmatmul.mubr.msk.f32.gmra.mrb[26].mxu0 %vm292_vm0, %v10478_v30 }
  0x4a   : > { %8903 = vmatprep.mubr.msk.f32.mxu0 %vm292_vm0, %v10481_v31 }
  0x4d   : > { %8904 = vmatmul.mubr.msk.f32.gmra.mrb[28].mxu0 %vm292_vm0, %v10488_v32  ;;  %v10703_v32 = vld [vmem:[%s10340_s27 + $0x62] sm:$0xff] }
  0x4e   : > { %8906 = vmatprep.mubr.msk.f32.mxu0 %vm292_vm0, %v10491_v33  ;;  %v10682_v33 = vld [vmem:[%s10340_s27 + $0x32] sm:$0xff]  ;;  %12412 = vst [vmem:[#allocation17_spill] sm:$0xff] %v10703_v32 }
  0x4f   : > { %12408 = vst [vmem:[#allocation13_spill] sm:$0xff] %v10682_v33 }
  0x51   : > { %8907 = vmatmul.mubr.msk.f32.gmra.mrb[30].mxu0 %vm292_vm0, %v10498_v34  ;;  %v10672_v34 = vld [vmem:[%s12276_s1 + $0x20] sm:$0xff] }
  0x52   : > { %8911 = vmatprep.mubr.msk.f32.mxu0 %vm292_vm0, %v225_v35  ;;  %v936_v35 = vld [vmem:[%s10340_s27 + $0xa] sm:$0xff] }
  0x55   : > { %8912 = vmatmul.mubr.msk.f32.vlgmr.msra.gmra.mrb[0].mxu0 %vm292_vm0, %v226_v36  ;;  %v10667_v36 = vld [vmem:[%s10340_s27 + $0x1a] sm:$0xff] }
  0x56   : > { %8960 = vmatpush3.msra.mxu0 %v10351_v5  ;;  %8914 = vmatprep.mubr.msk.f32.mxu0 %vm292_vm0, %v10506_v37  ;;  %v935_v5 = vld [vmem:[%s10340_s27 + $0x2] sm:$0xff]  ;;  %12406 = vst [vmem:[#allocation11_spill] sm:$0xff] %v10667_v36 }
  0x57   : > { %9009 = vmatprep.subr.mxu0 %v10511_v38 }
  0x59   : > { %8915 = vmatmul.mubr.msk.f32.gmra.mrb[2].mxu0 %vm292_vm0, %v10518_v39 }
  0x5a   : > { %8917 = vmatprep.mubr.msk.f32.mxu0 %vm292_vm0, %v10521_v40 }
  0x5d   : > { %8918 = vmatmul.mubr.msk.f32.gmra.mrb[4].mxu0 %vm292_vm0, %v10529_v41 }
  0x5e   : > { %8920 = vmatprep.mubr.msk.f32.mxu0 %vm292_vm0, %v10532_v42 }
  0x61   : > { %8921 = vmatmul.mubr.msk.f32.gmra.mrb[6].mxu0 %vm292_vm0, %v10539_v43 }
  0x62   : > { %8923 = vmatprep.mubr.msk.f32.mxu0 %vm292_vm0, %v10542_v44 }
  0x65   : > { %8924 = vmatmul.mubr.msk.f32.gmra.mrb[8].mxu0 %vm292_vm0, %v10549_v45 }
  0x66   : > { %8926 = vmatprep.mubr.msk.f32.mxu0 %vm292_vm0, %v10552_v46 }
  0x69   : > { %8927 = vmatmul.mubr.msk.f32.gmra.mrb[10].mxu0 %vm292_vm0, %v10559_v47 }
  0x6a   : > { %8929 = vmatprep.mubr.msk.f32.mxu0 %vm292_vm0, %v10562_v48 }
  0x6d   : > { %8930 = vmatmul.mubr.msk.f32.gmra.mrb[12].mxu0 %vm292_vm0, %v10569_v49 }
  0x6e   : > { %8932 = vmatprep.mubr.msk.f32.mxu0 %vm292_vm0, %v10572_v50 }
  0x71   : > { %8933 = vmatmul.mubr.msk.f32.gmra.mrb[14].mxu0 %vm292_vm0, %v10579_v51 }
  0x72   : > { %8935 = vmatprep.mubr.msk.f32.mxu0 %vm292_vm0, %v10582_v52 }
  0x75   : > { %8936 = vmatmul.mubr.msk.f32.gmra.mrb[16].mxu0 %vm292_vm0, %v10589_v53 }
  0x76   : > { %8938 = vmatprep.mubr.msk.f32.mxu0 %vm292_vm0, %v10592_v54 }
  0x79   : > { %8939 = vmatmul.mubr.msk.f32.gmra.mrb[18].mxu0 %vm292_vm0, %v10599_v55 }
  0x7a   : > { %8941 = vmatprep.mubr.msk.f32.mxu0 %vm292_vm0, %v10602_v56 }
  0x7d   : > { %8942 = vmatmul.mubr.msk.f32.gmra.mrb[20].mxu0 %vm292_vm0, %v10609_v57 }
  0x7e   : > { %8944 = vmatprep.mubr.msk.f32.mxu0 %vm292_vm0, %v10612_v58 }
  0x81   : > { %8945 = vmatmul.mubr.msk.f32.gmra.mrb[22].mxu0 %vm292_vm0, %v10619_v59 }
  0x82   : > { %8947 = vmatprep.mubr.msk.f32.mxu0 %vm292_vm0, %v10622_v60 }
  0x85   : > { %8948 = vmatmul.mubr.msk.f32.gmra.mrb[24].mxu0 %vm292_vm0, %v10629_v61 }
  0x86   : > { %8950 = vmatprep.mubr.msk.f32.mxu0 %vm292_vm0, %v10632_v62 }
  0x89   : > { %8951 = vmatmul.mubr.msk.f32.gmra.mrb[26].mxu0 %vm292_vm0, %v10639_v63 }
  0x8a   : > { %8953 = vmatprep.mubr.msk.f32.mxu0 %vm292_vm0, %v10642_v0 }
  0x8d   : > { %8954 = vmatmul.mubr.msk.f32.gmra.mrb[28].mxu0 %vm292_vm0, %v10649_v1 }
  0x8e   : > { %8956 = vmatprep.mubr.msk.f32.mxu0 %vm292_vm0, %v10652_v2 }
  0x91   : > { %8957 = vmatmul.mubr.msk.f32.gmra.mrb[30].mxu0 %vm292_vm0, %v10659_v3 }
  0x92   : > { %8961 = vmatprep.mubr.msk.f32.mxu0 %vm292_vm0, %v935_v5  ;;  %v10679_v5 = vld [vmem:[%s10340_s27 + $0x22] sm:$0xff] }
  0x93   : > { %12407 = vst [vmem:[#allocation12_spill] sm:$0xff] %v10679_v5 }
  0x95   : > { %8962 = vmatmul.mubr.msk.f32.vlgmr.msra.gmra.mrb[0].mxu0 %vm292_vm0, %v936_v35  ;;  %v10690_v35 = vld [vmem:[%s10340_s27 + $0x3a] sm:$0xff] }
  0x96   : > { %9010 = vmatpush3.msra.mxu0 %v10511_v38  ;;  %8964 = vmatprep.mubr.msk.f32.mxu0 %vm292_vm0, %v10667_v36  ;;  %12409 = vst [vmem:[#allocation14_spill] sm:$0xff] %v10690_v35  ;;  %v10693_v38 = vld [vmem:[%s10340_s27 + $0x4a] sm:$0xff]  ;;  %v10700_v36 = vld [vmem:[%s10340_s27 + $0x52] sm:$0xff] }
  0x97   : > { %9059 = vmatprep.subr.mxu0 %v10672_v34  ;;  %12410 = vst [vmem:[#allocation15_spill] sm:$0xff] %v10693_v38  ;;  %12411 = vst [vmem:[#allocation16_spill] sm:$0xff] %v10700_v36 }
  0x99   : > { %8965 = vmatmul.mubr.msk.f32.gmra.mrb[2].mxu0 %vm292_vm0, %v10679_v5  ;;  %v10713_v5 = vld [vmem:[%s10340_s27 + $0x7a] sm:$0xff] }
  0x9a   : > { %8967 = vmatprep.mubr.msk.f32.mxu0 %vm292_vm0, %v10682_v33  ;;  %v10710_v33 = vld [vmem:[%s10340_s27 + $0x6a] sm:$0xff]  ;;  %12414 = vst [vmem:[#allocation19_spill] sm:$0xff] %v10713_v5 }
  0x9b   : > { %12413 = vst [vmem:[#allocation18_spill] sm:$0xff] %v10710_v33 }
  0x9d   : > { %8968 = vmatmul.mubr.msk.f32.gmra.mrb[4].mxu0 %vm292_vm0, %v10690_v35  ;;  %v10723_v35 = vld [vmem:[%s10340_s27 + $0x92] sm:$0xff] }
  0x9e   : > { %8970 = vmatprep.mubr.msk.f32.mxu0 %vm292_vm0, %v10693_v38  ;;  %v10720_v38 = vld [vmem:[%s10340_s27 + $0x82] sm:$0xff]  ;;  %12416 = vst [vmem:[#allocation21_spill] sm:$0xff] %v10723_v35 }
  0x9f   : > { %12415 = vst [vmem:[#allocation20_spill] sm:$0xff] %v10720_v38 }
  0xa1   : > { %8971 = vmatmul.mubr.msk.f32.gmra.mrb[6].mxu0 %vm292_vm0, %v10700_v36  ;;  %v10733_v36 = vld [vmem:[%s10340_s27 + $0xaa] sm:$0xff] }
  0xa2   : > { %8973 = vmatprep.mubr.msk.f32.mxu0 %vm292_vm0, %v10703_v32  ;;  %v10730_v32 = vld [vmem:[%s10340_s27 + $0x9a] sm:$0xff]  ;;  %12418 = vst [vmem:[#allocation23_spill] sm:$0xff] %v10733_v36 }
  0xa3   : > { %12417 = vst [vmem:[#allocation22_spill] sm:$0xff] %v10730_v32 }
  0xa5   : > { %8974 = vmatmul.mubr.msk.f32.gmra.mrb[8].mxu0 %vm292_vm0, %v10710_v33  ;;  %v10743_v33 = vld [vmem:[%s10340_s27 + $0xc2] sm:$0xff] }
  0xa6   : > { %8976 = vmatprep.mubr.msk.f32.mxu0 %vm292_vm0, %v10713_v5  ;;  %v10740_v5 = vld [vmem:[%s10340_s27 + $0xb2] sm:$0xff]  ;;  %12420 = vst [vmem:[#allocation25_spill] sm:$0xff] %v10743_v33 }
  0xa7   : > { %12419 = vst [vmem:[#allocation24_spill] sm:$0xff] %v10740_v5 }
  0xa9   : > { %8977 = vmatmul.mubr.msk.f32.gmra.mrb[10].mxu0 %vm292_vm0, %v10720_v38  ;;  %v10753_v38 = vld [vmem:[%s10340_s27 + $0xda] sm:$0xff] }
  0xaa   : > { %8979 = vmatprep.mubr.msk.f32.mxu0 %vm292_vm0, %v10723_v35  ;;  %v10750_v35 = vld [vmem:[%s10340_s27 + $0xca] sm:$0xff]  ;;  %12422 = vst [vmem:[#allocation27_spill] sm:$0xff] %v10753_v38 }
  0xab   : > { %12421 = vst [vmem:[#allocation26_spill] sm:$0xff] %v10750_v35 }
  0xad   : > { %8980 = vmatmul.mubr.msk.f32.gmra.mrb[12].mxu0 %vm292_vm0, %v10730_v32  ;;  %v10763_v32 = vld [vmem:[%s10340_s27 + $0xf2] sm:$0xff] }
  0xae   : > { %8982 = vmatprep.mubr.msk.f32.mxu0 %vm292_vm0, %v10733_v36  ;;  %v10760_v36 = vld [vmem:[%s10340_s27 + $0xe2] sm:$0xff]  ;;  %12424 = vst [vmem:[#allocation29_spill] sm:$0xff] %v10763_v32 }
  0xaf   : > { %12423 = vst [vmem:[#allocation28_spill] sm:$0xff] %v10760_v36 }
  0xb1   : > { %8983 = vmatmul.mubr.msk.f32.gmra.mrb[14].mxu0 %vm292_vm0, %v10740_v5  ;;  %v10773_v5 = vld [vmem:[%s10340_s27 + $0x10a] sm:$0xff] }
  0xb2   : > { %8985 = vmatprep.mubr.msk.f32.mxu0 %vm292_vm0, %v10743_v33  ;;  %v10770_v33 = vld [vmem:[%s10340_s27 + $0xfa] sm:$0xff]  ;;  %12426 = vst [vmem:[#allocation31_spill] sm:$0xff] %v10773_v5 }
  0xb3   : > { %12425 = vst [vmem:[#allocation30_spill] sm:$0xff] %v10770_v33 }
  0xb5   : > { %8986 = vmatmul.mubr.msk.f32.gmra.mrb[16].mxu0 %vm292_vm0, %v10750_v35  ;;  %v10783_v35 = vld [vmem:[%s10340_s27 + $0x122] sm:$0xff] }
  0xb6   : > { %8988 = vmatprep.mubr.msk.f32.mxu0 %vm292_vm0, %v10753_v38  ;;  %v10780_v38 = vld [vmem:[%s10340_s27 + $0x112] sm:$0xff]  ;;  %12428 = vst [vmem:[#allocation33_spill] sm:$0xff] %v10783_v35 }
  0xb7   : > { %12427 = vst [vmem:[#allocation32_spill] sm:$0xff] %v10780_v38 }
  0xb9   : > { %8989 = vmatmul.mubr.msk.f32.gmra.mrb[18].mxu0 %vm292_vm0, %v10760_v36  ;;  %v10793_v36 = vld [vmem:[%s10340_s27 + $0x13a] sm:$0xff] }
  0xba   : > { %8991 = vmatprep.mubr.msk.f32.mxu0 %vm292_vm0, %v10763_v32  ;;  %v10790_v32 = vld [vmem:[%s10340_s27 + $0x12a] sm:$0xff]  ;;  %12429 = vst [vmem:[#allocation34_spill] sm:$0xff] %v10793_v36 }
  0xbd   : > { %8992 = vmatmul.mubr.msk.f32.gmra.mrb[20].mxu0 %vm292_vm0, %v10770_v33  ;;  %v10803_v33 = vld [vmem:[%s10340_s27 + $0x152] sm:$0xff] }
  0xbe   : > { %8994 = vmatprep.mubr.msk.f32.mxu0 %vm292_vm0, %v10773_v5  ;;  %v10800_v5 = vld [vmem:[%s10340_s27 + $0x142] sm:$0xff]  ;;  %12430 = vst [vmem:[#allocation35_spill] sm:$0xff] %v10803_v33 }
  0xc1   : > { %8995 = vmatmul.mubr.msk.f32.gmra.mrb[22].mxu0 %vm292_vm0, %v10780_v38  ;;  %v10813_v38 = vld [vmem:[%s10340_s27 + $0x16a] sm:$0xff] }
  0xc2   : > { %8997 = vmatprep.mubr.msk.f32.mxu0 %vm292_vm0, %v10783_v35  ;;  %v10810_v35 = vld [vmem:[%s10340_s27 + $0x15a] sm:$0xff]  ;;  %12431 = vst [vmem:[#allocation36_spill] sm:$0xff] %v10813_v38 }
  0xc5   : > { %8998 = vmatmul.mubr.msk.f32.gmra.mrb[24].mxu0 %vm292_vm0, %v10790_v32 }
  0xc6   : > { %9000 = vmatprep.mubr.msk.f32.mxu0 %vm292_vm0, %v10793_v36  ;;  %v10820_v36 = vld [vmem:[%s10340_s27 + $0x172] sm:$0xff] }
  0xc9   : > { %9001 = vmatmul.mubr.msk.f32.gmra.mrb[26].mxu0 %vm292_vm0, %v10800_v5 }
  0xca   : > { %9003 = vmatprep.mubr.msk.f32.mxu0 %vm292_vm0, %v10803_v33  ;;  %v7704_v33 = vld [vmem:[%s12276_s1 + $0x28] sm:$0xff] }
  0xcd   : > { %9004 = vmatmul.mubr.msk.f32.gmra.mrb[28].mxu0 %vm292_vm0, %v10810_v35 }
  0xce   : > { %9006 = vmatprep.mubr.msk.f32.mxu0 %vm292_vm0, %v10813_v38 }
  0xd1   : > { %9007 = vmatmul.mubr.msk.f32.gmra.mrb[30].mxu0 %vm292_vm0, %v10820_v36 }
  0xd2   : > { %9011 = vmatprep.mubr.msk.f32.mxu0 %vm292_vm0, %v10506_v37  ;;  %v10894_v37 = vld [vmem:[%s10340_s27 + $0x188] sm:$0xff] }
  0xd5   : > { %9012 = vmatmul.mubr.msk.f32.vlgmr.msra.gmra.mrb[0].mxu0 %vm292_vm0, %v10518_v39  ;;  %v7769_v39 = vld [vmem:[%s12276_s1 + $0x30] sm:$0xff] }
  0xd6   : > { %9060 = vmatpush3.msra.mxu0 %v10672_v34  ;;  %9014 = vmatprep.mubr.msk.f32.mxu0 %vm292_vm0, %v10521_v40  ;;  %v10887_v34 = vld [vmem:[%s10340_s27 + $0x180] sm:$0xff] }
  0xd7   : > { %9109 = vmatprep.subr.mxu0 %v7704_v33 }
  0xd9   : > { %9015 = vmatmul.mubr.msk.f32.gmra.mrb[2].mxu0 %vm292_vm0, %v10529_v41 }
  0xda   : > { %9017 = vmatprep.mubr.msk.f32.mxu0 %vm292_vm0, %v10532_v42 }
  0xdd   : > { %9018 = vmatmul.mubr.msk.f32.gmra.mrb[4].mxu0 %vm292_vm0, %v10539_v43 }
  0xde   : > { %9020 = vmatprep.mubr.msk.f32.mxu0 %vm292_vm0, %v10542_v44 }
  0xe1   : > { %9021 = vmatmul.mubr.msk.f32.gmra.mrb[6].mxu0 %vm292_vm0, %v10549_v45 }
  0xe2   : > { %9023 = vmatprep.mubr.msk.f32.mxu0 %vm292_vm0, %v10552_v46 }
  0xe5   : > { %9024 = vmatmul.mubr.msk.f32.gmra.mrb[8].mxu0 %vm292_vm0, %v10559_v47 }
  0xe6   : > { %9026 = vmatprep.mubr.msk.f32.mxu0 %vm292_vm0, %v10562_v48 }
  0xe9   : > { %9027 = vmatmul.mubr.msk.f32.gmra.mrb[10].mxu0 %vm292_vm0, %v10569_v49 }
  0xea   : > { %9029 = vmatprep.mubr.msk.f32.mxu0 %vm292_vm0, %v10572_v50 }
  0xed   : > { %9030 = vmatmul.mubr.msk.f32.gmra.mrb[12].mxu0 %vm292_vm0, %v10579_v51 }
  0xee   : > { %9032 = vmatprep.mubr.msk.f32.mxu0 %vm292_vm0, %v10582_v52 }
  0xf1   : > { %9033 = vmatmul.mubr.msk.f32.gmra.mrb[14].mxu0 %vm292_vm0, %v10589_v53 }
  0xf2   : > { %9035 = vmatprep.mubr.msk.f32.mxu0 %vm292_vm0, %v10592_v54 }
  0xf5   : > { %9036 = vmatmul.mubr.msk.f32.gmra.mrb[16].mxu0 %vm292_vm0, %v10599_v55 }
  0xf6   : > { %9038 = vmatprep.mubr.msk.f32.mxu0 %vm292_vm0, %v10602_v56 }
  0xf9   : > { %9039 = vmatmul.mubr.msk.f32.gmra.mrb[18].mxu0 %vm292_vm0, %v10609_v57 }
  0xfa   : > { %9041 = vmatprep.mubr.msk.f32.mxu0 %vm292_vm0, %v10612_v58 }
  0xfd   : > { %9042 = vmatmul.mubr.msk.f32.gmra.mrb[20].mxu0 %vm292_vm0, %v10619_v59 }
  0xfe   : > { %9044 = vmatprep.mubr.msk.f32.mxu0 %vm292_vm0, %v10622_v60 }
 0x101   : > { %9045 = vmatmul.mubr.msk.f32.gmra.mrb[22].mxu0 %vm292_vm0, %v10629_v61 }
 0x102   : > { %9047 = vmatprep.mubr.msk.f32.mxu0 %vm292_vm0, %v10632_v62 }
 0x105   : > { %9048 = vmatmul.mubr.msk.f32.gmra.mrb[24].mxu0 %vm292_vm0, %v10639_v63 }
 0x106   : > { %9050 = vmatprep.mubr.msk.f32.mxu0 %vm292_vm0, %v10642_v0 }
 0x109   : > { %9051 = vmatmul.mubr.msk.f32.gmra.mrb[26].mxu0 %vm292_vm0, %v10649_v1 }
 0x10a   : > { %9053 = vmatprep.mubr.msk.f32.mxu0 %vm292_vm0, %v10652_v2 }
 0x10d   : > { %9054 = vmatmul.mubr.msk.f32.gmra.mrb[28].mxu0 %vm292_vm0, %v10659_v3 }
 0x10e   : > { %9056 = vmatprep.mubr.msk.f32.mxu0 %vm292_vm0, %v10887_v34 }
 0x111   : > { %9057 = vmatmul.mubr.msk.f32.gmra.mrb[30].mxu0 %vm292_vm0, %v10894_v37 }
 0x112   : > { %9061 = vmatprep.mubr.msk.f32.mxu0 %vm292_vm0, %v10345_v4  ;;  %v12432_v4 = vld [vmem:[#allocation8_spill] sm:$0xff] }
 0x115   : > { %9062 = vmatmul.mubr.msk.f32.vlgmr.msra.gmra.mrb[0].mxu0 %vm292_vm0, %v10357_v6  ;;  %v12433_v6 = vld [vmem:[#allocation9_spill] sm:$0xff] }
 0x116   : > { %9110 = vmatpush3.msra.mxu0 %v7704_v33  ;;  %9064 = vmatprep.mubr.msk.f32.mxu0 %vm292_vm0, %v10360_v7  ;;  %v10960_v33 = vld [vmem:[%s10340_s27 + $0x181] sm:$0xff] }
 0x117   : > { %9159 = vmatprep.subr.mxu0 %v7769_v39  ;;  %12434 = vst [vmem:[#allocation37_spill] sm:$0xff] %v10960_v33 }
 0x119   : > { %9065 = vmatmul.mubr.msk.f32.gmra.mrb[2].mxu0 %vm292_vm0, %v10368_v8 }
 0x11a   : > { %9067 = vmatprep.mubr.msk.f32.mxu0 %vm292_vm0, %v10371_v9 }
 0x11d   : > { %9068 = vmatmul.mubr.msk.f32.gmra.mrb[4].mxu0 %vm292_vm0, %v10378_v10 }
 0x11e   : > { %9070 = vmatprep.mubr.msk.f32.mxu0 %vm292_vm0, %v10381_v11 }
 0x121   : > { %9071 = vmatmul.mubr.msk.f32.gmra.mrb[6].mxu0 %vm292_vm0, %v10388_v12 }
 0x122   : > { %9073 = vmatprep.mubr.msk.f32.mxu0 %vm292_vm0, %v10391_v13 }
 0x125   : > { %9074 = vmatmul.mubr.msk.f32.gmra.mrb[8].mxu0 %vm292_vm0, %v10398_v14 }
 0x126   : > { %9076 = vmatprep.mubr.msk.f32.mxu0 %vm292_vm0, %v10401_v15 }
 0x129   : > { %9077 = vmatmul.mubr.msk.f32.gmra.mrb[10].mxu0 %vm292_vm0, %v10408_v16 }
 0x12a   : > { %9079 = vmatprep.mubr.msk.f32.mxu0 %vm292_vm0, %v10411_v17 }
 0x12d   : > { %9080 = vmatmul.mubr.msk.f32.gmra.mrb[12].mxu0 %vm292_vm0, %v10418_v18 }
 0x12e   : > { %9082 = vmatprep.mubr.msk.f32.mxu0 %vm292_vm0, %v10421_v19 }
 0x131   : > { %9083 = vmatmul.mubr.msk.f32.gmra.mrb[14].mxu0 %vm292_vm0, %v10428_v20 }
 0x132   : > { %9085 = vmatprep.mubr.msk.f32.mxu0 %vm292_vm0, %v10431_v21 }
 0x135   : > { %9086 = vmatmul.mubr.msk.f32.gmra.mrb[16].mxu0 %vm292_vm0, %v10438_v22 }
 0x136   : > { %9088 = vmatprep.mubr.msk.f32.mxu0 %vm292_vm0, %v10441_v23 }
 0x139   : > { %9089 = vmatmul.mubr.msk.f32.gmra.mrb[18].mxu0 %vm292_vm0, %v10448_v24 }
 0x13a   : > { %9091 = vmatprep.mubr.msk.f32.mxu0 %vm292_vm0, %v10451_v25 }
 0x13d   : > { %9092 = vmatmul.mubr.msk.f32.gmra.mrb[20].mxu0 %vm292_vm0, %v10458_v26 }
 0x13e   : > { %9094 = vmatprep.mubr.msk.f32.mxu0 %vm292_vm0, %v10461_v27  ;;  %v12435_v27 = vld [vmem:[#allocation10_spill] sm:$0xff] }
 0x141   : > { %9095 = vmatmul.mubr.msk.f32.gmra.mrb[22].mxu0 %vm292_vm0, %v10468_v28  ;;  %v12444_v28 = vld [vmem:[#allocation18_spill] sm:$0xff] }
 0x142   : > { %9097 = vmatprep.mubr.msk.f32.mxu0 %vm292_vm0, %v10471_v29  ;;  %v10967_v29 = vld [vmem:[%s10340_s27 + $0x189] sm:$0xff] }
 0x143   : > { %12436 = vst [vmem:[#allocation38_spill] sm:$0xff] %v10967_v29 }
 0x145   : > { %9098 = vmatmul.mubr.msk.f32.gmra.mrb[24].mxu0 %vm292_vm0, %v10478_v30  ;;  %v12441_v30 = vld [vmem:[#allocation15_spill] sm:$0xff] }
 0x146   : > { %9100 = vmatprep.mubr.msk.f32.mxu0 %vm292_vm0, %v10481_v31  ;;  %v12437_v31 = vld [vmem:[#allocation11_spill] sm:$0xff] }
 0x149   : > { %9101 = vmatmul.mubr.msk.f32.gmra.mrb[26].mxu0 %vm292_vm0, %v12432_v4  ;;  %v12438_v4 = vld [vmem:[#allocation12_spill] sm:$0xff] }
 0x14a   : > { %9103 = vmatprep.mubr.msk.f32.mxu0 %vm292_vm0, %v12433_v6  ;;  %v7834_v6 = vld [vmem:[%s12276_s1 + $0x38] sm:$0xff] }
 0x14d   : > { %9104 = vmatmul.mubr.msk.f32.gmra.mrb[28].mxu0 %vm292_vm0, %v12435_v27  ;;  %v12439_v27 = vld [vmem:[#allocation13_spill] sm:$0xff] }
 0x14e   : > { %9106 = vmatprep.mubr.msk.f32.mxu0 %vm292_vm0, %v10960_v33  ;;  %v12440_v33 = vld [vmem:[#allocation14_spill] sm:$0xff] }
 0x151   : > { %9107 = vmatmul.mubr.msk.f32.gmra.mrb[30].mxu0 %vm292_vm0, %v10967_v29  ;;  %v12442_v29 = vld [vmem:[#allocation16_spill] sm:$0xff] }
 0x152   : > { %9111 = vmatprep.mubr.msk.f32.mxu0 %vm292_vm0, %v12437_v31  ;;  %v12443_v31 = vld [vmem:[#allocation17_spill] sm:$0xff] }
 0x155   : > { %9112 = vmatmul.mubr.msk.f32.vlgmr.msra.gmra.mrb[0].mxu0 %vm292_vm0, %v12438_v4  ;;  %v12446_v4 = vld [vmem:[#allocation20_spill] sm:$0xff] }
 0x156   : > { %9160 = vmatpush3.msra.mxu0 %v7769_v39  ;;  %9114 = vmatprep.mubr.msk.f32.mxu0 %vm292_vm0, %v12439_v27  ;;  %v12445_v39 = vld [vmem:[#allocation19_spill] sm:$0xff]  ;;  %v12447_v27 = vld [vmem:[#allocation21_spill] sm:$0xff] }
 0x157   : > { %9209 = vmatprep.subr.mxu0 %v7834_v6 }
 0x159   : > { %9115 = vmatmul.mubr.msk.f32.gmra.mrb[2].mxu0 %vm292_vm0, %v12440_v33  ;;  %v12448_v33 = vld [vmem:[#allocation22_spill] sm:$0xff] }
 0x15a   : > { %9117 = vmatprep.mubr.msk.f32.mxu0 %vm292_vm0, %v12441_v30  ;;  %v12449_v30 = vld [vmem:[#allocation23_spill] sm:$0xff] }
 0x15d   : > { %9118 = vmatmul.mubr.msk.f32.gmra.mrb[4].mxu0 %vm292_vm0, %v12442_v29  ;;  %v12450_v29 = vld [vmem:[#allocation24_spill] sm:$0xff] }
 0x15e   : > { %9120 = vmatprep.mubr.msk.f32.mxu0 %vm292_vm0, %v12443_v31  ;;  %v12451_v31 = vld [vmem:[#allocation25_spill] sm:$0xff] }
 0x161   : > { %9121 = vmatmul.mubr.msk.f32.gmra.mrb[6].mxu0 %vm292_vm0, %v12444_v28 }
 0x162   : > { %9123 = vmatprep.mubr.msk.f32.mxu0 %vm292_vm0, %v12445_v39  ;;  %v12452_v39 = vld [vmem:[#allocation26_spill] sm:$0xff] }
 0x165   : > { %9124 = vmatmul.mubr.msk.f32.gmra.mrb[8].mxu0 %vm292_vm0, %v12446_v4  ;;  %v12453_v4 = vld [vmem:[#allocation27_spill] sm:$0xff] }
 0x166   : > { %9126 = vmatprep.mubr.msk.f32.mxu0 %vm292_vm0, %v12447_v27  ;;  %v12454_v27 = vld [vmem:[#allocation28_spill] sm:$0xff] }
 0x169   : > { %9127 = vmatmul.mubr.msk.f32.gmra.mrb[10].mxu0 %vm292_vm0, %v12448_v33  ;;  %v12455_v33 = vld [vmem:[#allocation29_spill] sm:$0xff] }
 0x16a   : > { %9129 = vmatprep.mubr.msk.f32.mxu0 %vm292_vm0, %v12449_v30  ;;  %v12456_v30 = vld [vmem:[#allocation30_spill] sm:$0xff] }
 0x16d   : > { %9130 = vmatmul.mubr.msk.f32.gmra.mrb[12].mxu0 %vm292_vm0, %v12450_v29  ;;  %v12457_v29 = vld [vmem:[#allocation31_spill] sm:$0xff] }
 0x16e   : > { %9132 = vmatprep.mubr.msk.f32.mxu0 %vm292_vm0, %v12451_v31  ;;  %v12458_v31 = vld [vmem:[#allocation32_spill] sm:$0xff] }
 0x171   : > { %9133 = vmatmul.mubr.msk.f32.gmra.mrb[14].mxu0 %vm292_vm0, %v12452_v39  ;;  %v12459_v39 = vld [vmem:[#allocation33_spill] sm:$0xff] }
 0x172   : > { %9135 = vmatprep.mubr.msk.f32.mxu0 %vm292_vm0, %v12453_v4  ;;  %v12460_v4 = vld [vmem:[#allocation34_spill] sm:$0xff] }
 0x175   : > { %9136 = vmatmul.mubr.msk.f32.gmra.mrb[16].mxu0 %vm292_vm0, %v12454_v27 }
 0x176   : > { %9138 = vmatprep.mubr.msk.f32.mxu0 %vm292_vm0, %v12455_v33  ;;  %v12461_v33 = vld [vmem:[#allocation35_spill] sm:$0xff] }
 0x179   : > { %9139 = vmatmul.mubr.msk.f32.gmra.mrb[18].mxu0 %vm292_vm0, %v12456_v30 }
 0x17a   : > { %9141 = vmatprep.mubr.msk.f32.mxu0 %vm292_vm0, %v12457_v29 }
 0x17d   : > { %9142 = vmatmul.mubr.msk.f32.gmra.mrb[20].mxu0 %vm292_vm0, %v12458_v31  ;;  %v11033_v31 = vld [vmem:[%s10340_s27 + $0x182] sm:$0xff] }
 0x17e   : > { %9144 = vmatprep.mubr.msk.f32.mxu0 %vm292_vm0, %v12459_v39 }
 0x181   : > { %9145 = vmatmul.mubr.msk.f32.gmra.mrb[22].mxu0 %vm292_vm0, %v10790_v32 }
 0x182   : > { %9147 = vmatprep.mubr.msk.f32.mxu0 %vm292_vm0, %v12460_v4  ;;  %v11040_v4 = vld [vmem:[%s10340_s27 + $0x18a] sm:$0xff] }
 0x185   : > { %9148 = vmatmul.mubr.msk.f32.gmra.mrb[24].mxu0 %vm292_vm0, %v10800_v5 }
 0x186   : > { %9150 = vmatprep.mubr.msk.f32.mxu0 %vm292_vm0, %v12461_v33 }
 0x189   : > { %9151 = vmatmul.mubr.msk.f32.gmra.mrb[26].mxu0 %vm292_vm0, %v10810_v35 }
 0x18a   : > { %9153 = vmatprep.mubr.msk.f32.mxu0 %vm292_vm0, %v10813_v38  ;;  %v7899_v38 = vld [vmem:[%s12276_s1 + $0x40] sm:$0xff] }
 0x18d   : > { %9154 = vmatmul.mubr.msk.f32.gmra.mrb[28].mxu0 %vm292_vm0, %v10820_v36 }
 0x18e   : > { %9156 = vmatprep.mubr.msk.f32.mxu0 %vm292_vm0, %v11033_v31 }
 0x191   : > { %9157 = vmatmul.mubr.msk.f32.gmra.mrb[30].mxu0 %vm292_vm0, %v11040_v4 }
 0x192   : > { %9161 = vmatprep.mubr.msk.f32.mxu0 %vm292_vm0, %v10521_v40  ;;  %v7767_v40 = vld [vmem:[%s10340_s27 + $0x198] sm:$0xff] }
 0x195   : > { %9162 = vmatmul.mubr.msk.f32.vlgmr.msra.gmra.mrb[0].mxu0 %vm292_vm0, %v10529_v41  ;;  %v7768_v41 = vld [vmem:[%s10340_s27 + $0x1a0] sm:$0xff] }
 0x196   : > { %9210 = vmatpush3.msra.mxu0 %v7834_v6  ;;  %9164 = vmatprep.mubr.msk.f32.mxu0 %vm292_vm0, %v10532_v42  ;;  %v12480_v42 = vld [vmem:[#allocation22_spill] sm:$0xff] }
 0x197   : > { %9259 = vmatprep.subr.mxu0 %v7899_v38 }
 0x199   : > { %9165 = vmatmul.mubr.msk.f32.gmra.mrb[2].mxu0 %vm292_vm0, %v10539_v43  ;;  %v12481_v43 = vld [vmem:[#allocation23_spill] sm:$0xff] }
 0x19a   : > { %9167 = vmatprep.mubr.msk.f32.mxu0 %vm292_vm0, %v10542_v44  ;;  %v12482_v44 = vld [vmem:[#allocation24_spill] sm:$0xff] }
 0x19d   : > { %9168 = vmatmul.mubr.msk.f32.gmra.mrb[4].mxu0 %vm292_vm0, %v10549_v45  ;;  %v12483_v45 = vld [vmem:[#allocation25_spill] sm:$0xff] }
 0x19e   : > { %9170 = vmatprep.mubr.msk.f32.mxu0 %vm292_vm0, %v10552_v46  ;;  %v12485_v46 = vld [vmem:[#allocation27_spill] sm:$0xff] }
 0x1a1   : > { %9171 = vmatmul.mubr.msk.f32.gmra.mrb[6].mxu0 %vm292_vm0, %v10559_v47  ;;  %v12486_v47 = vld [vmem:[#allocation29_spill] sm:$0xff] }
 0x1a2   : > { %9173 = vmatprep.mubr.msk.f32.mxu0 %vm292_vm0, %v10562_v48  ;;  %v12487_v48 = vld [vmem:[#allocation32_spill] sm:$0xff] }
 0x1a5   : > { %9174 = vmatmul.mubr.msk.f32.gmra.mrb[8].mxu0 %vm292_vm0, %v10569_v49  ;;  %v10289_v49 = vmov 0.0  }
 0x1a6   : > { %9176 = vmatprep.mubr.msk.f32.mxu0 %vm292_vm0, %v10572_v50  ;;  %3717 = vst.msk [vmem:[#allocation2] sm:$0xff] %vm292_vm0, %v10289_v49  ;;  %3718 = vst.msk [vmem:[#allocation2 + $0x8] sm:$0xff] %vm292_vm0, %v10289_v49  ;;  %v7933_v50 = vld [vmem:[%s12278_s3 + $0x8] sm:$0xff] }
 0x1a7   : > { %3722 = vst.msk [vmem:[#allocation2 + $0x198] sm:$0xff] %vm292_vm0, %v10289_v49  ;;  %3723 = vst.msk [vmem:[#allocation2 + $0x1a0] sm:$0xff] %vm292_vm0, %v10289_v49  ;;  %9309 = vmatprep.subr.mxu1 %v7933_v50 }
 0x1a8   : > { %3720 = vst.msk [vmem:[#allocation2 + $0x10] sm:$0x3] %vm3719_vm1, %v10289_v49  ;;  %3724 = vst.msk [vmem:[#allocation2 + $0x1a8] sm:$0x3] %vm3719_vm1, %v10289_v49  ;;  %9310 = vmatpush3.msra.mxu1 %v7933_v50 }
 0x1a9   : > { %9177 = vmatmul.mubr.msk.f32.gmra.mrb[10].mxu0 %vm292_vm0, %v10579_v51  ;;  %3744 = vst.msk [vmem:[#allocation2 + $0x11] sm:$0x1] %vm3725_vm2, %v10289_v49  ;;  %3726 = vst.msk [vmem:[#allocation2] sm:$0x1] %vm3725_vm2, %v10289_v49 }
 0x1aa   : > { %9179 = vmatprep.mubr.msk.f32.mxu0 %vm292_vm0, %v10582_v52  ;;  %3727 = vst.msk [vmem:[#allocation2 + $0x18] sm:$0x1] %vm3725_vm2, %v10289_v49  ;;  %3728 = vst.msk [vmem:[#allocation2 + $0x30] sm:$0x1] %vm3725_vm2, %v10289_v49 }
 0x1ab   : > { %3729 = vst.msk [vmem:[#allocation2 + $0x48] sm:$0x1] %vm3725_vm2, %v10289_v49  ;;  %3730 = vst.msk [vmem:[#allocation2 + $0x60] sm:$0x1] %vm3725_vm2, %v10289_v49 }
 0x1ac   : > { %3731 = vst.msk [vmem:[#allocation2 + $0x78] sm:$0x1] %vm3725_vm2, %v10289_v49  ;;  %3732 = vst.msk [vmem:[#allocation2 + $0x90] sm:$0x1] %vm3725_vm2, %v10289_v49 }
 0x1ad   : > { %9180 = vmatmul.mubr.msk.f32.gmra.mrb[12].mxu0 %vm292_vm0, %v10589_v53  ;;  %3733 = vst.msk [vmem:[#allocation2 + $0xa8] sm:$0x1] %vm3725_vm2, %v10289_v49  ;;  %3734 = vst.msk [vmem:[#allocation2 + $0xc0] sm:$0x1] %vm3725_vm2, %v10289_v49  ;;  %v3828_v51 = vld [vmem:[#allocation2 + $0x1] sm:$0xff] }
 0x1ae   : > { %9182 = vmatprep.mubr.msk.f32.mxu0 %vm292_vm0, %v10592_v54  ;;  %3735 = vst.msk [vmem:[#allocation2 + $0xd8] sm:$0x1] %vm3725_vm2, %v10289_v49  ;;  %3736 = vst.msk [vmem:[#allocation2 + $0xf0] sm:$0x1] %vm3725_vm2, %v10289_v49  ;;  %9311 = vmatprep.mubr.msk.f32.mxu1 %vm292_vm0, %v3828_v51  ;;  %v3827_v53 = vld [vmem:[%s12278_s3] sm:$0xff]  ;;  %v11290_v54 = vld [vmem:[%s12278_s3 + $0x10] sm:$0xff] }
 0x1af   : > { %3737 = vst.msk [vmem:[#allocation2 + $0x108] sm:$0x1] %vm3725_vm2, %v10289_v49  ;;  %3738 = vst.msk [vmem:[#allocation2 + $0x120] sm:$0x1] %vm3725_vm2, %v10289_v49  ;;  %v3829_v52 = vld [vmem:[#allocation2 + $0x9] sm:$0xff]  ;;  %9359 = vmatprep.subr.mxu1 %v3827_v53 }
 0x1b0   : > { %3739 = vst.msk [vmem:[#allocation2 + $0x138] sm:$0x1] %vm3725_vm2, %v10289_v49  ;;  %3740 = vst.msk [vmem:[#allocation2 + $0x150] sm:$0x1] %vm3725_vm2, %v10289_v49  ;;  %9312 = vmatmul.mubr.msk.f32.vlgmr.msra.gmra.mrb[0].mxu1 %vm292_vm0, %v3829_v52 }
 0x1b1   : > { %9183 = vmatmul.mubr.msk.f32.gmra.mrb[14].mxu0 %vm292_vm0, %v10599_v55  ;;  %3741 = vst.msk [vmem:[#allocation2 + $0x168] sm:$0x1] %vm3725_vm2, %v10289_v49  ;;  %3742 = vst.msk [vmem:[#allocation2 + $0x180] sm:$0x1] %vm3725_vm2, %v10289_v49  ;;  %9360 = vmatpush3.msra.mxu1 %v3827_v53  ;;  %v11296_v55 = vld [vmem:[%s12277_s2] ss:$0 sm:$0xff] }
 0x1b2   : > { %9185 = vmatprep.mubr.msk.f32.mxu0 %vm292_vm0, %v10602_v56  ;;  %3743 = vst.msk [vmem:[#allocation2 + $0x198] sm:$0x1] %vm3725_vm2, %v10289_v49  ;;  %3745 = vst.msk [vmem:[#allocation2 + $0x29] sm:$0x1] %vm3725_vm2, %v10289_v49  ;;  %9409 = vmatprep.subr.mxu1 %v11290_v54 }
 0x1b3   : > { %3746 = vst.msk [vmem:[#allocation2 + $0x41] sm:$0x1] %vm3725_vm2, %v10289_v49  ;;  %3747 = vst.msk [vmem:[#allocation2 + $0x59] sm:$0x1] %vm3725_vm2, %v10289_v49 }
 0x1b4   : > { %3748 = vst.msk [vmem:[#allocation2 + $0x71] sm:$0x1] %vm3725_vm2, %v10289_v49  ;;  %3749 = vst.msk [vmem:[#allocation2 + $0x89] sm:$0x1] %vm3725_vm2, %v10289_v49 }
 0x1b5   : > { %9186 = vmatmul.mubr.msk.f32.gmra.mrb[16].mxu0 %vm292_vm0, %v10609_v57  ;;  %3750 = vst.msk [vmem:[#allocation2 + $0xa1] sm:$0x1] %vm3725_vm2, %v10289_v49  ;;  %3751 = vst.msk [vmem:[#allocation2 + $0xb9] sm:$0x1] %vm3725_vm2, %v10289_v49 }
 0x1b6   : > { %9188 = vmatprep.mubr.msk.f32.mxu0 %vm292_vm0, %v10612_v58  ;;  %3752 = vst.msk [vmem:[#allocation2 + $0xd1] sm:$0x1] %vm3725_vm2, %v10289_v49  ;;  %3753 = vst.msk [vmem:[#allocation2 + $0xe9] sm:$0x1] %vm3725_vm2, %v10289_v49 }
 0x1b7   : > { %3754 = vst.msk [vmem:[#allocation2 + $0x101] sm:$0x1] %vm3725_vm2, %v10289_v49  ;;  %3755 = vst.msk [vmem:[#allocation2 + $0x119] sm:$0x1] %vm3725_vm2, %v10289_v49 }
 0x1b8   : > { %3756 = vst.msk [vmem:[#allocation2 + $0x131] sm:$0x1] %vm3725_vm2, %v10289_v49  ;;  %3757 = vst.msk [vmem:[#allocation2 + $0x149] sm:$0x1] %vm3725_vm2, %v10289_v49 }
 0x1b9   : > { %9189 = vmatmul.mubr.msk.f32.gmra.mrb[18].mxu0 %vm292_vm0, %v10619_v59  ;;  %3758 = vst.msk [vmem:[#allocation2 + $0x161] sm:$0x1] %vm3725_vm2, %v10289_v49  ;;  %3759 = vst.msk [vmem:[#allocation2 + $0x179] sm:$0x1] %vm3725_vm2, %v10289_v49 }
 0x1ba   : > { %9191 = vmatprep.mubr.msk.f32.mxu0 %vm292_vm0, %v10622_v60  ;;  %3760 = vst.msk [vmem:[#allocation2 + $0x191] sm:$0x1] %vm3725_vm2, %v10289_v49  ;;  %3761 = vst.msk [vmem:[#allocation2 + $0x1a9] sm:$0x1] %vm3725_vm2, %v10289_v49 }
 0x1bd   : > { %9192 = vmatmul.mubr.msk.f32.gmra.mrb[20].mxu0 %vm292_vm0, %v10629_v61 }
 0x1be   : > { %9194 = vmatprep.mubr.msk.f32.mxu0 %vm292_vm0, %v10632_v62 }
 0x1c1   : > { %9195 = vmatmul.mubr.msk.f32.gmra.mrb[22].mxu0 %vm292_vm0, %v10639_v63 }
 0x1c2   : > { %9197 = vmatprep.mubr.msk.f32.mxu0 %vm292_vm0, %v10642_v0 }
 0x1c5   : > { %9198 = vmatmul.mubr.msk.f32.gmra.mrb[24].mxu0 %vm292_vm0, %v10649_v1 }
 0x1c6   : > { %9200 = vmatprep.mubr.msk.f32.mxu0 %vm292_vm0, %v10652_v2 }
 0x1c9   : > { %9201 = vmatmul.mubr.msk.f32.gmra.mrb[26].mxu0 %vm292_vm0, %v10659_v3 }
 0x1ca   : > { %9203 = vmatprep.mubr.msk.f32.mxu0 %vm292_vm0, %v10887_v34 }
 0x1cd   : > { %9204 = vmatmul.mubr.msk.f32.gmra.mrb[28].mxu0 %vm292_vm0, %v10894_v37 }
 0x1ce   : > { %9206 = vmatprep.mubr.msk.f32.mxu0 %vm292_vm0, %v7767_v40 }
 0x1d1   : > { %9207 = vmatmul.mubr.msk.f32.gmra.mrb[30].mxu0 %vm292_vm0, %v7768_v41 }
 0x1d2   : > { %9211 = vmatprep.mubr.msk.f32.mxu0 %vm292_vm0, %v10360_v7  ;;  %v12462_v7 = vld [vmem:[#allocation3_spill] sm:$0xff] }
 0x1d5   : > { %9212 = vmatmul.mubr.msk.f32.vlgmr.msra.gmra.mrb[0].mxu0 %vm292_vm0, %v10368_v8  ;;  %v12463_v8 = vld [vmem:[#allocation4_spill] sm:$0xff] }
 0x1d6   : > { %9260 = vmatpush3.msra.mxu0 %v7899_v38  ;;  %9214 = vmatprep.mubr.msk.f32.mxu0 %vm292_vm0, %v10371_v9  ;;  %v12464_v9 = vld [vmem:[#allocation5_spill] sm:$0xff] }
 0x1d9   : > { %9215 = vmatmul.mubr.msk.f32.gmra.mrb[2].mxu0 %vm292_vm0, %v10378_v10  ;;  %v12465_v10 = vld [vmem:[#allocation6_spill] sm:$0xff] }
 0x1da   : > { %9217 = vmatprep.mubr.msk.f32.mxu0 %vm292_vm0, %v10381_v11  ;;  %v12466_v11 = vld [vmem:[#allocation7_spill] sm:$0xff] }
 0x1dd   : > { %9218 = vmatmul.mubr.msk.f32.gmra.mrb[4].mxu0 %vm292_vm0, %v10388_v12  ;;  %v12467_v12 = vld [vmem:[#allocation8_spill] sm:$0xff] }
 0x1de   : > { %9220 = vmatprep.mubr.msk.f32.mxu0 %vm292_vm0, %v10391_v13  ;;  %v12468_v13 = vld [vmem:[#allocation9_spill] sm:$0xff] }
 0x1e1   : > { %9221 = vmatmul.mubr.msk.f32.gmra.mrb[6].mxu0 %vm292_vm0, %v10398_v14  ;;  %v12469_v14 = vld [vmem:[#allocation10_spill] sm:$0xff] }
 0x1e2   : > { %9223 = vmatprep.mubr.msk.f32.mxu0 %vm292_vm0, %v10401_v15  ;;  %v12470_v15 = vld [vmem:[#allocation37_spill] sm:$0xff] }
 0x1e5   : > { %9224 = vmatmul.mubr.msk.f32.gmra.mrb[8].mxu0 %vm292_vm0, %v10408_v16  ;;  %v7832_v16 = vld [vmem:[%s10340_s27 + $0x199] sm:$0xff] }
 0x1e6   : > { %9226 = vmatprep.mubr.msk.f32.mxu0 %vm292_vm0, %v10411_v17  ;;  %v12471_v17 = vld [vmem:[#allocation38_spill] sm:$0xff] }
 0x1e9   : > { %9227 = vmatmul.mubr.msk.f32.gmra.mrb[10].mxu0 %vm292_vm0, %v10418_v18  ;;  %v7833_v18 = vld [vmem:[%s10340_s27 + $0x1a1] sm:$0xff] }
 0x1ea   : > { %9229 = vmatprep.mubr.msk.f32.mxu0 %vm292_vm0, %v10421_v19  ;;  %v12472_v19 = vld [vmem:[#allocation13_spill] sm:$0xff] }
 0x1ed   : > { %9230 = vmatmul.mubr.msk.f32.gmra.mrb[12].mxu0 %vm292_vm0, %v10428_v20  ;;  %v12473_v20 = vld [vmem:[#allocation14_spill] sm:$0xff] }
 0x1ee   : > { %9232 = vmatprep.mubr.msk.f32.mxu0 %vm292_vm0, %v10431_v21  ;;  %v12474_v21 = vld [vmem:[#allocation15_spill] sm:$0xff] }
 0x1f1   : > { %9233 = vmatmul.mubr.msk.f32.gmra.mrb[14].mxu0 %vm292_vm0, %v10438_v22  ;;  %v12475_v22 = vld [vmem:[#allocation16_spill] sm:$0xff] }
 0x1f2   : > { %9235 = vmatprep.mubr.msk.f32.mxu0 %vm292_vm0, %v10441_v23  ;;  %v12476_v23 = vld [vmem:[#allocation17_spill] sm:$0xff] }
 0x1f5   : > { %9236 = vmatmul.mubr.msk.f32.gmra.mrb[16].mxu0 %vm292_vm0, %v10448_v24  ;;  %v12477_v24 = vld [vmem:[#allocation19_spill] sm:$0xff] }
 0x1f6   : > { %9238 = vmatprep.mubr.msk.f32.mxu0 %vm292_vm0, %v10451_v25  ;;  %v12478_v25 = vld [vmem:[#allocation20_spill] sm:$0xff] }
 0x1f9   : > { %9239 = vmatmul.mubr.msk.f32.gmra.mrb[18].mxu0 %vm292_vm0, %v10458_v26  ;;  %v12479_v26 = vld [vmem:[#allocation21_spill] sm:$0xff] }
 0x1fa   : > { %9241 = vmatprep.mubr.msk.f32.mxu0 %vm292_vm0, %v12462_v7 }
 0x1fd   : > { %9242 = vmatmul.mubr.msk.f32.gmra.mrb[20].mxu0 %vm292_vm0, %v12463_v8 }
 0x1fe   : > { %9244 = vmatprep.mubr.msk.f32.mxu0 %vm292_vm0, %v12464_v9 }
 0x201   : > { %9245 = vmatmul.mubr.msk.f32.gmra.mrb[22].mxu0 %vm292_vm0, %v12465_v10 }
 0x202   : > { %9247 = vmatprep.mubr.msk.f32.mxu0 %vm292_vm0, %v12466_v11 }
 0x205   : > { %9248 = vmatmul.mubr.msk.f32.gmra.mrb[24].mxu0 %vm292_vm0, %v12467_v12 }
 0x206   : > { %9250 = vmatprep.mubr.msk.f32.mxu0 %vm292_vm0, %v12468_v13 }
 0x209   : > { %9251 = vmatmul.mubr.msk.f32.gmra.mrb[26].mxu0 %vm292_vm0, %v12469_v14 }
 0x20a   : > { %9253 = vmatprep.mubr.msk.f32.mxu0 %vm292_vm0, %v12470_v15 }
 0x20d   : > { %9254 = vmatmul.mubr.msk.f32.gmra.mrb[28].mxu0 %vm292_vm0, %v12471_v17 }
 0x20e   : > { %9256 = vmatprep.mubr.msk.f32.mxu0 %vm292_vm0, %v7832_v16 }
 0x211   : > { %9257 = vmatmul.mubr.msk.f32.gmra.mrb[30].mxu0 %vm292_vm0, %v7833_v18 }
 0x212   : > { %9261 = vmatprep.mubr.msk.f32.mxu0 %vm292_vm0, %v12472_v19 }
 0x215   : > { %9262 = vmatmul.mubr.msk.f32.vlgmr.msra.gmra.mrb[0].mxu0 %vm292_vm0, %v12473_v20 }
 0x216   : > { %9264 = vmatprep.mubr.msk.f32.mxu0 %vm292_vm0, %v12474_v21 }
 0x219   : > { %9265 = vmatmul.mubr.msk.f32.gmra.mrb[2].mxu0 %vm292_vm0, %v12475_v22 }
 0x21a   : > { %9267 = vmatprep.mubr.msk.f32.mxu0 %vm292_vm0, %v12476_v23 }
 0x21d   : > { %9268 = vmatmul.mubr.msk.f32.gmra.mrb[4].mxu0 %vm292_vm0, %v12444_v28  ;;  %v12484_v28 = vld [vmem:[#allocation26_spill] sm:$0xff] }
 0x21e   : > { %9270 = vmatprep.mubr.msk.f32.mxu0 %vm292_vm0, %v12477_v24 }
 0x221   : > { %9271 = vmatmul.mubr.msk.f32.gmra.mrb[6].mxu0 %vm292_vm0, %v12478_v25 }
 0x222   : > { %9273 = vmatprep.mubr.msk.f32.mxu0 %vm292_vm0, %v12479_v26 }
 0x225   : > { %9274 = vmatmul.mubr.msk.f32.gmra.mrb[8].mxu0 %vm292_vm0, %v12480_v42 }
 0x226   : > { %9276 = vmatprep.mubr.msk.f32.mxu0 %vm292_vm0, %v12481_v43 }
 0x229   : > { %9277 = vmatmul.mubr.msk.f32.gmra.mrb[10].mxu0 %vm292_vm0, %v12482_v44 }
 0x22a   : > { %9279 = vmatprep.mubr.msk.f32.mxu0 %vm292_vm0, %v12483_v45 }
 0x22d   : > { %9280 = vmatmul.mubr.msk.f32.gmra.mrb[12].mxu0 %vm292_vm0, %v12484_v28 }
 0x22e   : > { %9282 = vmatprep.mubr.msk.f32.mxu0 %vm292_vm0, %v12485_v46 }
 0x231   : > { %9283 = vmatmul.mubr.msk.f32.gmra.mrb[14].mxu0 %vm292_vm0, %v12454_v27  ;;  %v12488_v27 = vld [vmem:[#allocation34_spill] sm:$0xff] }
 0x232   : > { %9285 = vmatprep.mubr.msk.f32.mxu0 %vm292_vm0, %v12486_v47 }
 0x235   : > { %9286 = vmatmul.mubr.msk.f32.gmra.mrb[16].mxu0 %vm292_vm0, %v12456_v30  ;;  %v7897_v30 = vld [vmem:[%s10340_s27 + $0x19a] sm:$0xff] }
 0x236   : > { %9288 = vmatprep.mubr.msk.f32.mxu0 %vm292_vm0, %v12457_v29  ;;  %v12489_v29 = vld [vmem:[#allocation36_spill] sm:$0xff] }
 0x239   : > { %9289 = vmatmul.mubr.msk.f32.gmra.mrb[18].mxu0 %vm292_vm0, %v12487_v48 }
 0x23a   : > { %9291 = vmatprep.mubr.msk.f32.mxu0 %vm292_vm0, %v12459_v39 }
 0x23d   : > { %9292 = vmatmul.mubr.msk.f32.gmra.mrb[20].mxu0 %vm292_vm0, %v10790_v32  ;;  %v7898_v32 = vld [vmem:[%s10340_s27 + $0x1a2] sm:$0xff] }
 0x23e   : > { %9294 = vmatprep.mubr.msk.f32.mxu0 %vm292_vm0, %v12488_v27 }
 0x241   : > { %9295 = vmatmul.mubr.msk.f32.gmra.mrb[22].mxu0 %vm292_vm0, %v10800_v5 }
 0x242   : > { %9297 = vmatprep.mubr.msk.f32.mxu0 %vm292_vm0, %v12461_v33 }
 0x245   : > { %9298 = vmatmul.mubr.msk.f32.gmra.mrb[24].mxu0 %vm292_vm0, %v10810_v35 }
 0x246   : > { %9300 = vmatprep.mubr.msk.f32.mxu0 %vm292_vm0, %v12489_v29 }
 0x249   : > { %9301 = vmatmul.mubr.msk.f32.gmra.mrb[26].mxu0 %vm292_vm0, %v10820_v36 }
 0x24a   : > { %9303 = vmatprep.mubr.msk.f32.mxu0 %vm292_vm0, %v11033_v31 }
 0x24d   : > { %9304 = vmatmul.mubr.msk.f32.gmra.mrb[28].mxu0 %vm292_vm0, %v11040_v4 }
 0x24e   : > { %9306 = vmatprep.mubr.msk.f32.mxu0 %vm292_vm0, %v7897_v30 }
 0x251   : > { %9307 = vmatmul.mubr.msk.f32.gmra.mrb[30].mxu0 %vm292_vm0, %v7898_v32 }
 0x2e8   : > { %v9263_v56 = vpop.f32.mrb[0].mxu0 }
 0x2e9   : > { %v3654_v57 = vadd.f32 %v9263_v56, %v11296_v55  ;;  %v3455_v58 = vpop.f32.mrb[1].mxu0 }
 0x2ea   : > { %v3653_v59 = vadd.f32 %v11296_v55, %v3455_v58 }
 0x2eb   : > { %v3686_v60 = vmax.f32 %v3654_v57, 0.0 }
 0x2ec   : > { %v3685_v61 = vmax.f32 %v3653_v59, 0.0  ;;  %v9266_v62 = vpop.f32.mrb[2].mxu0 }
 0x2ed   : > { %3764 = vst.msk [vmem:[#allocation2 + $0x21] sm:$0xff] %vm292_vm0, %v3686_v60  ;;  %v3656_v63 = vadd.f32 %v9266_v62, %v11296_v55  ;;  %v3465_v0 = vpop.f32.mrb[3].mxu0 }
 0x2ee   : > { %3763 = vst.msk [vmem:[#allocation2 + $0x19] sm:$0xff] %vm292_vm0, %v3685_v61  ;;  %v3655_v1 = vadd.f32 %v11296_v55, %v3465_v0 }
 0x2ef   : > { %v3688_v2 = vmax.f32 %v3656_v63, 0.0 }
 0x2f0   : > { %v3687_v3 = vmax.f32 %v3655_v1, 0.0  ;;  %v9269_v36 = vpop.f32.mrb[4].mxu0 }
 0x2f1   : > { %3766 = vst.msk [vmem:[#allocation2 + $0x39] sm:$0xff] %vm292_vm0, %v3688_v2  ;;  %v3658_v5 = vadd.f32 %v9269_v36, %v11296_v55  ;;  %v3475_v35 = vpop.f32.mrb[5].mxu0 }
 0x2f2   : > { %3765 = vst.msk [vmem:[#allocation2 + $0x31] sm:$0xff] %vm292_vm0, %v3687_v3  ;;  %v3657_v38 = vadd.f32 %v11296_v55, %v3475_v35 }
 0x2f3   : > { %v3690_v34 = vmax.f32 %v3658_v5, 0.0 }
 0x2f4   : > { %v3689_v37 = vmax.f32 %v3657_v38, 0.0  ;;  %v9272_v6 = vpop.f32.mrb[6].mxu0  ;;  %v11316_v40 = vld [vmem:[#allocation2 + $0x21] sm:$0xff] }
 0x2f5   : > { %3768 = vst.msk [vmem:[#allocation2 + $0x51] sm:$0xff] %vm292_vm0, %v3690_v34  ;;  %v3660_v33 = vadd.f32 %v9272_v6, %v11296_v55  ;;  %v3485_v31 = vpop.f32.mrb[7].mxu0  ;;  %v11310_v39 = vld [vmem:[#allocation2 + $0x19] sm:$0xff] }
 0x2f6   : > { %3767 = vst.msk [vmem:[#allocation2 + $0x49] sm:$0xff] %vm292_vm0, %v3689_v37  ;;  %v3659_v4 = vadd.f32 %v11296_v55, %v3485_v31  ;;  %9314 = vmatprep.mubr.msk.f32.mxu1 %vm292_vm0, %v11310_v39 }
 0x2f7   : > { %v3692_v41 = vmax.f32 %v3660_v33, 0.0  ;;  %9315 = vmatmul.mubr.msk.f32.gmra.mrb[2].mxu1 %vm292_vm0, %v11316_v40 }
 0x2f8   : > { %v3691_v7 = vmax.f32 %v3659_v4, 0.0  ;;  %v9275_v8 = vpop.f32.mrb[8].mxu0  ;;  %v11328_v13 = vld [vmem:[#allocation2 + $0x39] sm:$0xff] }
 0x2f9   : > { %3770 = vst.msk [vmem:[#allocation2 + $0x69] sm:$0xff] %vm292_vm0, %v3692_v41  ;;  %v3662_v9 = vadd.f32 %v9275_v8, %v11296_v55  ;;  %v3495_v10 = vpop.f32.mrb[9].mxu0  ;;  %v11322_v11 = vld [vmem:[#allocation2 + $0x31] sm:$0xff] }
 0x2fa   : > { %3769 = vst.msk [vmem:[#allocation2 + $0x61] sm:$0xff] %vm292_vm0, %v3691_v7  ;;  %v3661_v12 = vadd.f32 %v11296_v55, %v3495_v10  ;;  %9317 = vmatprep.mubr.msk.f32.mxu1 %vm292_vm0, %v11322_v11 }
 0x2fb   : > { %v3694_v14 = vmax.f32 %v3662_v9, 0.0  ;;  %9318 = vmatmul.mubr.msk.f32.gmra.mrb[4].mxu1 %vm292_vm0, %v11328_v13 }
 0x2fc   : > { %v3693_v15 = vmax.f32 %v3661_v12, 0.0  ;;  %v9278_v16 = vpop.f32.mrb[10].mxu0  ;;  %v11340_v21 = vld [vmem:[#allocation2 + $0x51] sm:$0xff] }
 0x2fd   : > { %3772 = vst.msk [vmem:[#allocation2 + $0x81] sm:$0xff] %vm292_vm0, %v3694_v14  ;;  %v3664_v17 = vadd.f32 %v9278_v16, %v11296_v55  ;;  %v3505_v18 = vpop.f32.mrb[11].mxu0  ;;  %v11334_v19 = vld [vmem:[#allocation2 + $0x49] sm:$0xff] }
 0x2fe   : > { %3771 = vst.msk [vmem:[#allocation2 + $0x79] sm:$0xff] %vm292_vm0, %v3693_v15  ;;  %v3663_v20 = vadd.f32 %v11296_v55, %v3505_v18  ;;  %9320 = vmatprep.mubr.msk.f32.mxu1 %vm292_vm0, %v11334_v19 }
 0x2ff   : > { %v3696_v22 = vmax.f32 %v3664_v17, 0.0  ;;  %9321 = vmatmul.mubr.msk.f32.gmra.mrb[6].mxu1 %vm292_vm0, %v11340_v21 }
 0x300   : > { %v3695_v23 = vmax.f32 %v3663_v20, 0.0  ;;  %v9281_v24 = vpop.f32.mrb[12].mxu0  ;;  %v11352_v44 = vld [vmem:[#allocation2 + $0x69] sm:$0xff] }
 0x301   : > { %3774 = vst.msk [vmem:[#allocation2 + $0x99] sm:$0xff] %vm292_vm0, %v3696_v22  ;;  %v3666_v25 = vadd.f32 %v9281_v24, %v11296_v55  ;;  %v3515_v26 = vpop.f32.mrb[13].mxu0  ;;  %v11346_v42 = vld [vmem:[#allocation2 + $0x61] sm:$0xff] }
 0x302   : > { %3773 = vst.msk [vmem:[#allocation2 + $0x91] sm:$0xff] %vm292_vm0, %v3695_v23  ;;  %v3665_v43 = vadd.f32 %v11296_v55, %v3515_v26  ;;  %9323 = vmatprep.mubr.msk.f32.mxu1 %vm292_vm0, %v11346_v42 }
 0x303   : > { %v3698_v45 = vmax.f32 %v3666_v25, 0.0  ;;  %9324 = vmatmul.mubr.msk.f32.gmra.mrb[8].mxu1 %vm292_vm0, %v11352_v44 }
 0x304   : > { %v3697_v28 = vmax.f32 %v3665_v43, 0.0  ;;  %v9284_v46 = vpop.f32.mrb[14].mxu0  ;;  %v11364_v30 = vld [vmem:[#allocation2 + $0x81] sm:$0xff] }
 0x305   : > { %3776 = vst.msk [vmem:[#allocation2 + $0xb1] sm:$0xff] %vm292_vm0, %v3698_v45  ;;  %v3668_v47 = vadd.f32 %v9284_v46, %v11296_v55  ;;  %v3525_v48 = vpop.f32.mrb[15].mxu0  ;;  %v11358_v27 = vld [vmem:[#allocation2 + $0x79] sm:$0xff] }
 0x306   : > { %3775 = vst.msk [vmem:[#allocation2 + $0xa9] sm:$0xff] %vm292_vm0, %v3697_v28  ;;  %v3667_v29 = vadd.f32 %v11296_v55, %v3525_v48  ;;  %9326 = vmatprep.mubr.msk.f32.mxu1 %vm292_vm0, %v11358_v27 }
 0x307   : > { %v3700_v32 = vmax.f32 %v3668_v47, 0.0  ;;  %9327 = vmatmul.mubr.msk.f32.gmra.mrb[10].mxu1 %vm292_vm0, %v11364_v30 }
 0x308   : > { %v3699_v49 = vmax.f32 %v3667_v29, 0.0  ;;  %v9287_v50 = vpop.f32.mrb[16].mxu0  ;;  %v11376_v57 = vld [vmem:[#allocation2 + $0x99] sm:$0xff] }
 0x309   : > { %3778 = vst.msk [vmem:[#allocation2 + $0xc9] sm:$0xff] %vm292_vm0, %v3700_v32  ;;  %v3670_v51 = vadd.f32 %v9287_v50, %v11296_v55  ;;  %v3535_v52 = vpop.f32.mrb[17].mxu0  ;;  %v11370_v53 = vld [vmem:[#allocation2 + $0x91] sm:$0xff] }
 0x30a   : > { %3777 = vst.msk [vmem:[#allocation2 + $0xc1] sm:$0xff] %vm292_vm0, %v3699_v49  ;;  %v3669_v56 = vadd.f32 %v11296_v55, %v3535_v52  ;;  %9329 = vmatprep.mubr.msk.f32.mxu1 %vm292_vm0, %v11370_v53 }
 0x30b   : > { %v3702_v58 = vmax.f32 %v3670_v51, 0.0  ;;  %9330 = vmatmul.mubr.msk.f32.gmra.mrb[12].mxu1 %vm292_vm0, %v11376_v57 }
 0x30c   : > { %v3701_v59 = vmax.f32 %v3669_v56, 0.0  ;;  %v9290_v60 = vpop.f32.mrb[18].mxu0  ;;  %v11388_v1 = vld [vmem:[#allocation2 + $0xb1] sm:$0xff] }
 0x30d   : > { %3780 = vst.msk [vmem:[#allocation2 + $0xe1] sm:$0xff] %vm292_vm0, %v3702_v58  ;;  %v3672_v61 = vadd.f32 %v9290_v60, %v11296_v55  ;;  %v3545_v62 = vpop.f32.mrb[19].mxu0  ;;  %v11382_v63 = vld [vmem:[#allocation2 + $0xa9] sm:$0xff] }
 0x30e   : > { %3779 = vst.msk [vmem:[#allocation2 + $0xd9] sm:$0xff] %vm292_vm0, %v3701_v59  ;;  %v3671_v0 = vadd.f32 %v11296_v55, %v3545_v62  ;;  %9332 = vmatprep.mubr.msk.f32.mxu1 %vm292_vm0, %v11382_v63 }
 0x30f   : > { %v3704_v2 = vmax.f32 %v3672_v61, 0.0  ;;  %9333 = vmatmul.mubr.msk.f32.gmra.mrb[14].mxu1 %vm292_vm0, %v11388_v1 }
 0x310   : > { %v3703_v3 = vmax.f32 %v3671_v0, 0.0  ;;  %v9293_v36 = vpop.f32.mrb[20].mxu0  ;;  %v11400_v37 = vld [vmem:[#allocation2 + $0xc9] sm:$0xff] }
 0x311   : > { %3782 = vst.msk [vmem:[#allocation2 + $0xf9] sm:$0xff] %vm292_vm0, %v3704_v2  ;;  %v3674_v5 = vadd.f32 %v9293_v36, %v11296_v55  ;;  %v3555_v35 = vpop.f32.mrb[21].mxu0  ;;  %v11394_v38 = vld [vmem:[#allocation2 + $0xc1] sm:$0xff] }
 0x312   : > { %3781 = vst.msk [vmem:[#allocation2 + $0xf1] sm:$0xff] %vm292_vm0, %v3703_v3  ;;  %v3673_v34 = vadd.f32 %v11296_v55, %v3555_v35  ;;  %9335 = vmatprep.mubr.msk.f32.mxu1 %vm292_vm0, %v11394_v38  ;;  %v3795_v35 = vld [vmem:[#allocation2] sm:$0xff] }
 0x313   : > { %v3706_v6 = vmax.f32 %v3674_v5, 0.0  ;;  %9336 = vmatmul.mubr.msk.f32.gmra.mrb[16].mxu1 %vm292_vm0, %v11400_v37 }
 0x314   : > { %v3705_v33 = vmax.f32 %v3673_v34, 0.0  ;;  %v9296_v31 = vpop.f32.mrb[22].mxu0  ;;  %v11412_v9 = vld [vmem:[#allocation2 + $0xe1] sm:$0xff] }
 0x315   : > { %3784 = vst.msk [vmem:[#allocation2 + $0x111] sm:$0xff] %vm292_vm0, %v3706_v6  ;;  %v3676_v4 = vadd.f32 %v9296_v31, %v11296_v55  ;;  %v3565_v41 = vpop.f32.mrb[23].mxu0  ;;  %v11406_v7 = vld [vmem:[#allocation2 + $0xd9] sm:$0xff]  ;;  %v3796_v6 = vld [vmem:[#allocation2 + $0x8] sm:$0xff] }
 0x316   : > { %3783 = vst.msk [vmem:[#allocation2 + $0x109] sm:$0xff] %vm292_vm0, %v3705_v33  ;;  %v3675_v8 = vadd.f32 %v11296_v55, %v3565_v41  ;;  %9338 = vmatprep.mubr.msk.f32.mxu1 %vm292_vm0, %v11406_v7  ;;  %v11486_v33 = vld [vmem:[%s12278_s3 + $0x18] sm:$0xff]  ;;  %v11499_v41 = vld [vmem:[#allocation2 + $0x30] sm:$0xff] }
 0x317   : > { %v3708_v10 = vmax.f32 %v3676_v4, 0.0  ;;  %9339 = vmatmul.mubr.msk.f32.gmra.mrb[18].mxu1 %vm292_vm0, %v11412_v9  ;;  %v11489_v31 = vld [vmem:[#allocation2 + $0x18] sm:$0xff]  ;;  %v11495_v4 = vld [vmem:[#allocation2 + $0x20] sm:$0xff] }
 0x318   : > { %v3707_v12 = vmax.f32 %v3675_v8, 0.0  ;;  %v9299_v14 = vpop.f32.mrb[24].mxu0  ;;  %v11424_v20 = vld [vmem:[#allocation2 + $0xf9] sm:$0xff] }
 0x319   : > { %3786 = vst.msk [vmem:[#allocation2 + $0x129] sm:$0xff] %vm292_vm0, %v3708_v10  ;;  %v3678_v15 = vadd.f32 %v9299_v14, %v11296_v55  ;;  %v3575_v16 = vpop.f32.mrb[25].mxu0  ;;  %v11418_v17 = vld [vmem:[#allocation2 + $0xf1] sm:$0xff]  ;;  %v11519_v14 = vld [vmem:[#allocation2 + $0x68] sm:$0xff] }
 0x31a   : > { %3785 = vst.msk [vmem:[#allocation2 + $0x121] sm:$0xff] %vm292_vm0, %v3707_v12  ;;  %v3677_v18 = vadd.f32 %v11296_v55, %v3575_v16  ;;  %9341 = vmatprep.mubr.msk.f32.mxu1 %vm292_vm0, %v11418_v17  ;;  %v11503_v8 = vld [vmem:[#allocation2 + $0x38] sm:$0xff]  ;;  %v11511_v10 = vld [vmem:[#allocation2 + $0x50] sm:$0xff]  ;;  %v11515_v12 = vld [vmem:[#allocation2 + $0x60] sm:$0xff] }
 0x31b   : > { %v3710_v22 = vmax.f32 %v3678_v15, 0.0  ;;  %9342 = vmatmul.mubr.msk.f32.gmra.mrb[20].mxu1 %vm292_vm0, %v11424_v20  ;;  %v11523_v15 = vld [vmem:[#allocation2 + $0x78] sm:$0xff]  ;;  %v11527_v16 = vld [vmem:[#allocation2 + $0x80] sm:$0xff] }
 0x31c   : > { %v3709_v23 = vmax.f32 %v3677_v18, 0.0  ;;  %v9302_v24 = vpop.f32.mrb[26].mxu0  ;;  %v11436_v28 = vld [vmem:[#allocation2 + $0x111] sm:$0xff] }
 0x31d   : > { %3788 = vst.msk [vmem:[#allocation2 + $0x141] sm:$0xff] %vm292_vm0, %v3710_v22  ;;  %v3680_v25 = vadd.f32 %v9302_v24, %v11296_v55  ;;  %v3585_v26 = vpop.f32.mrb[27].mxu0  ;;  %v11430_v43 = vld [vmem:[#allocation2 + $0x109] sm:$0xff]  ;;  %v11535_v22 = vld [vmem:[#allocation2 + $0x98] sm:$0xff] }
 0x31e   : > { %3787 = vst.msk [vmem:[#allocation2 + $0x139] sm:$0xff] %vm292_vm0, %v3709_v23  ;;  %v3679_v45 = vadd.f32 %v11296_v55, %v3585_v26  ;;  %9344 = vmatprep.mubr.msk.f32.mxu1 %vm292_vm0, %v11430_v43  ;;  %v11531_v18 = vld [vmem:[#allocation2 + $0x90] sm:$0xff]  ;;  %v11539_v23 = vld [vmem:[#allocation2 + $0xa8] sm:$0xff] }
 0x31f   : > { %v3712_v46 = vmax.f32 %v3680_v25, 0.0  ;;  %9345 = vmatmul.mubr.msk.f32.gmra.mrb[22].mxu1 %vm292_vm0, %v11436_v28  ;;  %v11543_v24 = vld [vmem:[#allocation2 + $0xb0] sm:$0xff]  ;;  %v11547_v25 = vld [vmem:[#allocation2 + $0xc0] sm:$0xff]  ;;  %v11551_v26 = vld [vmem:[#allocation2 + $0xc8] sm:$0xff] }
 0x320   : > { %v3711_v47 = vmax.f32 %v3679_v45, 0.0  ;;  %v9305_v48 = vpop.f32.mrb[28].mxu0  ;;  %v11448_v51 = vld [vmem:[#allocation2 + $0x129] sm:$0xff]  ;;  %v11555_v45 = vld [vmem:[#allocation2 + $0xd8] sm:$0xff] }
 0x321   : > { %3790 = vst.msk [vmem:[#allocation2 + $0x159] sm:$0xff] %vm292_vm0, %v3712_v46  ;;  %v3682_v29 = vadd.f32 %v9305_v48, %v11296_v55  ;;  %v3595_v32 = vpop.f32.mrb[29].mxu0  ;;  %v11442_v49 = vld [vmem:[#allocation2 + $0x121] sm:$0xff]  ;;  %v11567_v48 = vld [vmem:[#allocation2 + $0xf8] sm:$0xff] }
 0x322   : > { %3789 = vst.msk [vmem:[#allocation2 + $0x151] sm:$0xff] %vm292_vm0, %v3711_v47  ;;  %v3681_v50 = vadd.f32 %v11296_v55, %v3595_v32  ;;  %9347 = vmatprep.mubr.msk.f32.mxu1 %vm292_vm0, %v11442_v49  ;;  %v11559_v46 = vld [vmem:[#allocation2 + $0xe0] sm:$0xff]  ;;  %v11563_v47 = vld [vmem:[#allocation2 + $0xf0] sm:$0xff] }
 0x323   : > { %v3714_v52 = vmax.f32 %v3682_v29, 0.0  ;;  %9348 = vmatmul.mubr.msk.f32.gmra.mrb[24].mxu1 %vm292_vm0, %v11448_v51  ;;  %v11571_v29 = vld [vmem:[#allocation2 + $0x108] sm:$0xff]  ;;  %v11575_v32 = vld [vmem:[#allocation2 + $0x110] sm:$0xff] }
 0x324   : > { %v3713_v56 = vmax.f32 %v3681_v50, 0.0  ;;  %v9308_v58 = vpop.f32.mrb[30].mxu0  ;;  %v11460_v0 = vld [vmem:[#allocation2 + $0x141] sm:$0xff] }
 0x325   : > { %3792 = vst.msk [vmem:[#allocation2 + $0x171] sm:$0xff] %vm292_vm0, %v3714_v52  ;;  %v3684_v59 = vadd.f32 %v9308_v58, %v11296_v55  ;;  %v3605_v60 = vpop.f32.mrb[31].mxu0  ;;  %v11454_v61 = vld [vmem:[#allocation2 + $0x139] sm:$0xff]  ;;  %v11583_v52 = vld [vmem:[#allocation2 + $0x128] sm:$0xff] }
 0x326   : > { %3791 = vst.msk [vmem:[#allocation2 + $0x169] sm:$0xff] %vm292_vm0, %v3713_v56  ;;  %v3683_v62 = vadd.f32 %v11296_v55, %v3605_v60  ;;  %9350 = vmatprep.mubr.msk.f32.mxu1 %vm292_vm0, %v11454_v61  ;;  %v11579_v50 = vld [vmem:[#allocation2 + $0x120] sm:$0xff]  ;;  %v11587_v56 = vld [vmem:[#allocation2 + $0x138] sm:$0xff] }
 0x327   : > { %v3716_v2 = vmax.f32 %v3684_v59, 0.0  ;;  %9351 = vmatmul.mubr.msk.f32.gmra.mrb[26].mxu1 %vm292_vm0, %v11460_v0  ;;  %v11591_v58 = vld [vmem:[#allocation2 + $0x140] sm:$0xff] }
 0x328   : > { %v3715_v3 = vmax.f32 %v3683_v62, 0.0  ;;  %v11470_v55 = vld [vmem:[#allocation2 + $0x159] sm:$0xff] }
 0x329   : > { %3794 = vst.msk [vmem:[#allocation2 + $0x189] sm:$0xff] %vm292_vm0, %v3716_v2  ;;  %v11465_v36 = vld [vmem:[#allocation2 + $0x151] sm:$0xff]  ;;  %v4504_v2 = vld [vmem:[#allocation2 + $0x2] sm:$0xff] }
 0x32a   : > { %3793 = vst.msk [vmem:[#allocation2 + $0x181] sm:$0xff] %vm292_vm0, %v3715_v3  ;;  %9353 = vmatprep.mubr.msk.f32.mxu1 %vm292_vm0, %v11465_v36  ;;  %v11595_v59 = vld [vmem:[#allocation2 + $0x150] sm:$0xff]  ;;  %v11599_v60 = vld [vmem:[#allocation2 + $0x158] sm:$0xff] }
 0x32b   : > { %9354 = vmatmul.mubr.msk.f32.gmra.mrb[28].mxu1 %vm292_vm0, %v11470_v55 }
 0x32c   : > { %v11478_v34 = vld [vmem:[#allocation2 + $0x171] sm:$0xff] }
 0x32d   : > { %v11474_v5 = vld [vmem:[#allocation2 + $0x169] sm:$0xff]  ;;  %12491 = vst [vmem:[#allocation12_spill] sm:$0xff] %v11478_v34 }
 0x32e   : > { %12490 = vst [vmem:[#allocation11_spill] sm:$0xff] %v11474_v5  ;;  %9356 = vmatprep.mubr.msk.f32.mxu1 %vm292_vm0, %v11474_v5  ;;  %v11603_v62 = vld [vmem:[#allocation2 + $0x168] sm:$0xff]  ;;  %v11607_v3 = vld [vmem:[#allocation2 + $0x170] sm:$0xff] }
 0x32f   : > { %9357 = vmatmul.mubr.msk.f32.gmra.mrb[30].mxu1 %vm292_vm0, %v11478_v34  ;;  %v11618_v34 = vld [vmem:[#allocation2 + $0x1a] sm:$0xff]  ;;  %v11624_v5 = vld [vmem:[#allocation2 + $0x22] sm:$0xff] }
 0x330   : > { %9361 = vmatprep.mubr.msk.f32.mxu1 %vm292_vm0, %v3795_v35  ;;  %v4505_v35 = vld [vmem:[#allocation2 + $0xa] sm:$0xff]  ;;  %12492 = vst [vmem:[#allocation18_spill] sm:$0xff] %v11618_v34  ;;  %12493 = vst [vmem:[#allocation28_spill] sm:$0xff] %v11624_v5 }
 0x333   : > { %9362 = vmatmul.mubr.msk.f32.vlgmr.msra.gmra.mrb[0].mxu1 %vm292_vm0, %v3796_v6  ;;  %v11615_v6 = vld [vmem:[%s12278_s3 + $0x20] sm:$0xff] }
 0x334   : > { %9410 = vmatpush3.msra.mxu1 %v11290_v54  ;;  %9364 = vmatprep.mubr.msk.f32.mxu1 %vm292_vm0, %v11489_v31  ;;  %v11507_v54 = vld [vmem:[#allocation2 + $0x48] sm:$0xff] }
 0x335   : > { %9459 = vmatprep.subr.mxu1 %v11486_v33 }
 0x337   : > { %9365 = vmatmul.mubr.msk.f32.gmra.mrb[2].mxu1 %vm292_vm0, %v11495_v4 }
 0x338   : > { %9367 = vmatprep.mubr.msk.f32.mxu1 %vm292_vm0, %v11499_v41 }
 0x33b   : > { %9368 = vmatmul.mubr.msk.f32.gmra.mrb[4].mxu1 %vm292_vm0, %v11503_v8 }
 0x33c   : > { %9370 = vmatprep.mubr.msk.f32.mxu1 %vm292_vm0, %v11507_v54 }
 0x33f   : > { %9371 = vmatmul.mubr.msk.f32.gmra.mrb[6].mxu1 %vm292_vm0, %v11511_v10 }
 0x340   : > { %9373 = vmatprep.mubr.msk.f32.mxu1 %vm292_vm0, %v11515_v12 }
 0x343   : > { %9374 = vmatmul.mubr.msk.f32.gmra.mrb[8].mxu1 %vm292_vm0, %v11519_v14 }
 0x344   : > { %9376 = vmatprep.mubr.msk.f32.mxu1 %vm292_vm0, %v11523_v15 }
 0x347   : > { %9377 = vmatmul.mubr.msk.f32.gmra.mrb[10].mxu1 %vm292_vm0, %v11527_v16 }
 0x348   : > { %9379 = vmatprep.mubr.msk.f32.mxu1 %vm292_vm0, %v11531_v18 }
 0x34b   : > { %9380 = vmatmul.mubr.msk.f32.gmra.mrb[12].mxu1 %vm292_vm0, %v11535_v22 }
 0x34c   : > { %9382 = vmatprep.mubr.msk.f32.mxu1 %vm292_vm0, %v11539_v23 }
 0x34f   : > { %9383 = vmatmul.mubr.msk.f32.gmra.mrb[14].mxu1 %vm292_vm0, %v11543_v24 }
 0x350   : > { %9385 = vmatprep.mubr.msk.f32.mxu1 %vm292_vm0, %v11547_v25 }
 0x353   : > { %9386 = vmatmul.mubr.msk.f32.gmra.mrb[16].mxu1 %vm292_vm0, %v11551_v26 }
 0x354   : > { %9388 = vmatprep.mubr.msk.f32.mxu1 %vm292_vm0, %v11555_v45 }
 0x357   : > { %9389 = vmatmul.mubr.msk.f32.gmra.mrb[18].mxu1 %vm292_vm0, %v11559_v46 }
 0x358   : > { %9391 = vmatprep.mubr.msk.f32.mxu1 %vm292_vm0, %v11563_v47 }
 0x35b   : > { %9392 = vmatmul.mubr.msk.f32.gmra.mrb[20].mxu1 %vm292_vm0, %v11567_v48 }
 0x35c   : > { %9394 = vmatprep.mubr.msk.f32.mxu1 %vm292_vm0, %v11571_v29 }
 0x35f   : > { %9395 = vmatmul.mubr.msk.f32.gmra.mrb[22].mxu1 %vm292_vm0, %v11575_v32 }
 0x360   : > { %9397 = vmatprep.mubr.msk.f32.mxu1 %vm292_vm0, %v11579_v50 }
 0x363   : > { %9398 = vmatmul.mubr.msk.f32.gmra.mrb[24].mxu1 %vm292_vm0, %v11583_v52 }
 0x364   : > { %9400 = vmatprep.mubr.msk.f32.mxu1 %vm292_vm0, %v11587_v56 }
 0x367   : > { %9401 = vmatmul.mubr.msk.f32.gmra.mrb[26].mxu1 %vm292_vm0, %v11591_v58 }
 0x368   : > { %9403 = vmatprep.mubr.msk.f32.mxu1 %vm292_vm0, %v11595_v59 }
 0x36b   : > { %9404 = vmatmul.mubr.msk.f32.gmra.mrb[28].mxu1 %vm292_vm0, %v11599_v60 }
 0x36c   : > { %9406 = vmatprep.mubr.msk.f32.mxu1 %vm292_vm0, %v11603_v62 }
 0x36f   : > { %9407 = vmatmul.mubr.msk.f32.gmra.mrb[30].mxu1 %vm292_vm0, %v11607_v3 }
 0x370   : > { %9411 = vmatprep.mubr.msk.f32.mxu1 %vm292_vm0, %v4504_v2  ;;  %v11628_v2 = vld [vmem:[#allocation2 + $0x32] sm:$0xff] }
 0x371   : > { %12494 = vst [vmem:[#allocation30_spill] sm:$0xff] %v11628_v2 }
 0x373   : > { %9412 = vmatmul.mubr.msk.f32.vlgmr.msra.gmra.mrb[0].mxu1 %vm292_vm0, %v4505_v35  ;;  %v11632_v35 = vld [vmem:[#allocation2 + $0x3a] sm:$0xff] }
 0x374   : > { %9460 = vmatpush3.msra.mxu1 %v11486_v33  ;;  %9414 = vmatprep.mubr.msk.f32.mxu1 %vm292_vm0, %v11618_v34  ;;  %12495 = vst [vmem:[#allocation31_spill] sm:$0xff] %v11632_v35  ;;  %v11636_v33 = vld [vmem:[#allocation2 + $0x4a] sm:$0xff]  ;;  %v11640_v34 = vld [vmem:[#allocation2 + $0x52] sm:$0xff] }
 0x375   : > { %9509 = vmatprep.subr.mxu1 %v11615_v6  ;;  %12496 = vst [vmem:[#allocation33_spill] sm:$0xff] %v11636_v33  ;;  %12497 = vst [vmem:[#allocation35_spill] sm:$0xff] %v11640_v34 }
 0x377   : > { %9415 = vmatmul.mubr.msk.f32.gmra.mrb[2].mxu1 %vm292_vm0, %v11624_v5  ;;  %v11644_v5 = vld [vmem:[#allocation2 + $0x62] sm:$0xff] }
 0x378   : > { %9417 = vmatprep.mubr.msk.f32.mxu1 %vm292_vm0, %v11628_v2  ;;  %12498 = vst [vmem:[#allocation3_spill] sm:$0xff] %v11644_v5  ;;  %v11648_v2 = vld [vmem:[#allocation2 + $0x6a] sm:$0xff] }
 0x379   : > { %12499 = vst [vmem:[#allocation4_spill] sm:$0xff] %v11648_v2 }
 0x37b   : > { %9418 = vmatmul.mubr.msk.f32.gmra.mrb[4].mxu1 %vm292_vm0, %v11632_v35  ;;  %v11652_v35 = vld [vmem:[#allocation2 + $0x7a] sm:$0xff] }
 0x37c   : > { %9420 = vmatprep.mubr.msk.f32.mxu1 %vm292_vm0, %v11636_v33  ;;  %12500 = vst [vmem:[#allocation5_spill] sm:$0xff] %v11652_v35  ;;  %v11656_v33 = vld [vmem:[#allocation2 + $0x82] sm:$0xff] }
 0x37d   : > { %12501 = vst [vmem:[#allocation6_spill] sm:$0xff] %v11656_v33 }
 0x37f   : > { %9421 = vmatmul.mubr.msk.f32.gmra.mrb[6].mxu1 %vm292_vm0, %v11640_v34  ;;  %v11660_v34 = vld [vmem:[#allocation2 + $0x92] sm:$0xff] }
 0x380   : > { %9423 = vmatprep.mubr.msk.f32.mxu1 %vm292_vm0, %v11644_v5  ;;  %12502 = vst [vmem:[#allocation7_spill] sm:$0xff] %v11660_v34  ;;  %v11664_v5 = vld [vmem:[#allocation2 + $0x9a] sm:$0xff] }
 0x381   : > { %12503 = vst [vmem:[#allocation8_spill] sm:$0xff] %v11664_v5 }
 0x383   : > { %9424 = vmatmul.mubr.msk.f32.gmra.mrb[8].mxu1 %vm292_vm0, %v11648_v2  ;;  %v11668_v2 = vld [vmem:[#allocation2 + $0xaa] sm:$0xff] }
 0x384   : > { %9426 = vmatprep.mubr.msk.f32.mxu1 %vm292_vm0, %v11652_v35  ;;  %12504 = vst [vmem:[#allocation9_spill] sm:$0xff] %v11668_v2  ;;  %v11672_v35 = vld [vmem:[#allocation2 + $0xb2] sm:$0xff] }
 0x385   : > { %12505 = vst [vmem:[#allocation10_spill] sm:$0xff] %v11672_v35 }
 0x387   : > { %9427 = vmatmul.mubr.msk.f32.gmra.mrb[10].mxu1 %vm292_vm0, %v11656_v33  ;;  %v11676_v33 = vld [vmem:[#allocation2 + $0xc2] sm:$0xff] }
 0x388   : > { %9429 = vmatprep.mubr.msk.f32.mxu1 %vm292_vm0, %v11660_v34  ;;  %12506 = vst [vmem:[#allocation37_spill] sm:$0xff] %v11676_v33  ;;  %v11680_v34 = vld [vmem:[#allocation2 + $0xca] sm:$0xff] }
 0x389   : > { %12507 = vst [vmem:[#allocation38_spill] sm:$0xff] %v11680_v34 }
 0x38b   : > { %9430 = vmatmul.mubr.msk.f32.gmra.mrb[12].mxu1 %vm292_vm0, %v11664_v5  ;;  %v11684_v5 = vld [vmem:[#allocation2 + $0xda] sm:$0xff] }
 0x38c   : > { %9432 = vmatprep.mubr.msk.f32.mxu1 %vm292_vm0, %v11668_v2  ;;  %12508 = vst [vmem:[#allocation13_spill] sm:$0xff] %v11684_v5  ;;  %v11688_v2 = vld [vmem:[#allocation2 + $0xe2] sm:$0xff] }
 0x38d   : > { %12509 = vst [vmem:[#allocation14_spill] sm:$0xff] %v11688_v2 }
 0x38f   : > { %9433 = vmatmul.mubr.msk.f32.gmra.mrb[14].mxu1 %vm292_vm0, %v11672_v35  ;;  %v11692_v35 = vld [vmem:[#allocation2 + $0xf2] sm:$0xff] }
 0x390   : > { %9435 = vmatprep.mubr.msk.f32.mxu1 %vm292_vm0, %v11676_v33  ;;  %12510 = vst [vmem:[#allocation15_spill] sm:$0xff] %v11692_v35  ;;  %v11696_v33 = vld [vmem:[#allocation2 + $0xfa] sm:$0xff] }
 0x391   : > { %12511 = vst [vmem:[#allocation16_spill] sm:$0xff] %v11696_v33 }
 0x393   : > { %9436 = vmatmul.mubr.msk.f32.gmra.mrb[16].mxu1 %vm292_vm0, %v11680_v34  ;;  %v11700_v34 = vld [vmem:[#allocation2 + $0x10a] sm:$0xff] }
 0x394   : > { %9438 = vmatprep.mubr.msk.f32.mxu1 %vm292_vm0, %v11684_v5  ;;  %12512 = vst [vmem:[#allocation17_spill] sm:$0xff] %v11700_v34  ;;  %v11704_v5 = vld [vmem:[#allocation2 + $0x112] sm:$0xff] }
 0x395   : > { %12513 = vst [vmem:[#allocation19_spill] sm:$0xff] %v11704_v5 }
 0x397   : > { %9439 = vmatmul.mubr.msk.f32.gmra.mrb[18].mxu1 %vm292_vm0, %v11688_v2  ;;  %v11708_v2 = vld [vmem:[#allocation2 + $0x122] sm:$0xff] }
 0x398   : > { %9441 = vmatprep.mubr.msk.f32.mxu1 %vm292_vm0, %v11692_v35  ;;  %12514 = vst [vmem:[#allocation20_spill] sm:$0xff] %v11708_v2  ;;  %v11712_v35 = vld [vmem:[#allocation2 + $0x12a] sm:$0xff] }
 0x399   : > { %12515 = vst [vmem:[#allocation21_spill] sm:$0xff] %v11712_v35 }
 0x39b   : > { %9442 = vmatmul.mubr.msk.f32.gmra.mrb[20].mxu1 %vm292_vm0, %v11696_v33  ;;  %v11716_v33 = vld [vmem:[#allocation2 + $0x13a] sm:$0xff] }
 0x39c   : > { %9444 = vmatprep.mubr.msk.f32.mxu1 %vm292_vm0, %v11700_v34  ;;  %12516 = vst [vmem:[#allocation22_spill] sm:$0xff] %v11716_v33  ;;  %v11720_v34 = vld [vmem:[#allocation2 + $0x142] sm:$0xff] }
 0x39f   : > { %9445 = vmatmul.mubr.msk.f32.gmra.mrb[22].mxu1 %vm292_vm0, %v11704_v5  ;;  %v11724_v5 = vld [vmem:[#allocation2 + $0x152] sm:$0xff] }
 0x3a0   : > { %9447 = vmatprep.mubr.msk.f32.mxu1 %vm292_vm0, %v11708_v2  ;;  %12517 = vst [vmem:[#allocation23_spill] sm:$0xff] %v11724_v5  ;;  %v11728_v2 = vld [vmem:[#allocation2 + $0x15a] sm:$0xff] }
 0x3a3   : > { %9448 = vmatmul.mubr.msk.f32.gmra.mrb[24].mxu1 %vm292_vm0, %v11712_v35  ;;  %v11732_v35 = vld [vmem:[#allocation2 + $0x16a] sm:$0xff] }
 0x3a4   : > { %9450 = vmatprep.mubr.msk.f32.mxu1 %vm292_vm0, %v11716_v33  ;;  %12518 = vst [vmem:[#allocation24_spill] sm:$0xff] %v11732_v35  ;;  %v11736_v33 = vld [vmem:[#allocation2 + $0x172] sm:$0xff] }
 0x3a7   : > { %9451 = vmatmul.mubr.msk.f32.gmra.mrb[26].mxu1 %vm292_vm0, %v11720_v34 }
 0x3a8   : > { %9453 = vmatprep.mubr.msk.f32.mxu1 %vm292_vm0, %v11724_v5  ;;  %v8097_v5 = vld [vmem:[%s12278_s3 + $0x28] sm:$0xff] }
 0x3ab   : > { %9454 = vmatmul.mubr.msk.f32.gmra.mrb[28].mxu1 %vm292_vm0, %v11728_v2 }
 0x3ac   : > { %9456 = vmatprep.mubr.msk.f32.mxu1 %vm292_vm0, %v11732_v35 }
 0x3af   : > { %9457 = vmatmul.mubr.msk.f32.gmra.mrb[30].mxu1 %vm292_vm0, %v11736_v33 }
 0x3b0   : > { %9461 = vmatprep.mubr.msk.f32.mxu1 %vm292_vm0, %v11489_v31  ;;  %v11804_v31 = vld [vmem:[#allocation2 + $0x180] sm:$0xff] }
 0x3b3   : > { %9462 = vmatmul.mubr.msk.f32.vlgmr.msra.gmra.mrb[0].mxu1 %vm292_vm0, %v11495_v4  ;;  %v11808_v4 = vld [vmem:[#allocation2 + $0x188] sm:$0xff] }
 0x3b4   : > { %9510 = vmatpush3.msra.mxu1 %v11615_v6  ;;  %9464 = vmatprep.mubr.msk.f32.mxu1 %vm292_vm0, %v11499_v41  ;;  %v8130_v6 = vld [vmem:[%s12278_s3 + $0x30] sm:$0xff] }
 0x3b5   : > { %9559 = vmatprep.subr.mxu1 %v8097_v5 }
 0x3b7   : > { %9465 = vmatmul.mubr.msk.f32.gmra.mrb[2].mxu1 %vm292_vm0, %v11503_v8 }
 0x3b8   : > { %9467 = vmatprep.mubr.msk.f32.mxu1 %vm292_vm0, %v11507_v54 }
 0x3bb   : > { %9468 = vmatmul.mubr.msk.f32.gmra.mrb[4].mxu1 %vm292_vm0, %v11511_v10 }
 0x3bc   : > { %9470 = vmatprep.mubr.msk.f32.mxu1 %vm292_vm0, %v11515_v12 }
 0x3bf   : > { %9471 = vmatmul.mubr.msk.f32.gmra.mrb[6].mxu1 %vm292_vm0, %v11519_v14 }
 0x3c0   : > { %9473 = vmatprep.mubr.msk.f32.mxu1 %vm292_vm0, %v11523_v15 }
 0x3c3   : > { %9474 = vmatmul.mubr.msk.f32.gmra.mrb[8].mxu1 %vm292_vm0, %v11527_v16 }
 0x3c4   : > { %9476 = vmatprep.mubr.msk.f32.mxu1 %vm292_vm0, %v11531_v18 }
 0x3c7   : > { %9477 = vmatmul.mubr.msk.f32.gmra.mrb[10].mxu1 %vm292_vm0, %v11535_v22 }
 0x3c8   : > { %9479 = vmatprep.mubr.msk.f32.mxu1 %vm292_vm0, %v11539_v23 }
 0x3cb   : > { %9480 = vmatmul.mubr.msk.f32.gmra.mrb[12].mxu1 %vm292_vm0, %v11543_v24 }
 0x3cc   : > { %9482 = vmatprep.mubr.msk.f32.mxu1 %vm292_vm0, %v11547_v25 }
 0x3cf   : > { %9483 = vmatmul.mubr.msk.f32.gmra.mrb[14].mxu1 %vm292_vm0, %v11551_v26 }
 0x3d0   : > { %9485 = vmatprep.mubr.msk.f32.mxu1 %vm292_vm0, %v11555_v45 }
 0x3d3   : > { %9486 = vmatmul.mubr.msk.f32.gmra.mrb[16].mxu1 %vm292_vm0, %v11559_v46 }
 0x3d4   : > { %9488 = vmatprep.mubr.msk.f32.mxu1 %vm292_vm0, %v11563_v47 }
 0x3d7   : > { %9489 = vmatmul.mubr.msk.f32.gmra.mrb[18].mxu1 %vm292_vm0, %v11567_v48 }
 0x3d8   : > { %9491 = vmatprep.mubr.msk.f32.mxu1 %vm292_vm0, %v11571_v29 }
 0x3db   : > { %9492 = vmatmul.mubr.msk.f32.gmra.mrb[20].mxu1 %vm292_vm0, %v11575_v32 }
 0x3dc   : > { %9494 = vmatprep.mubr.msk.f32.mxu1 %vm292_vm0, %v11579_v50 }
 0x3df   : > { %9495 = vmatmul.mubr.msk.f32.gmra.mrb[22].mxu1 %vm292_vm0, %v11583_v52 }
 0x3e0   : > { %9497 = vmatprep.mubr.msk.f32.mxu1 %vm292_vm0, %v11587_v56 }
 0x3e3   : > { %9498 = vmatmul.mubr.msk.f32.gmra.mrb[24].mxu1 %vm292_vm0, %v11591_v58 }
 0x3e4   : > { %9500 = vmatprep.mubr.msk.f32.mxu1 %vm292_vm0, %v11595_v59 }
 0x3e7   : > { %9501 = vmatmul.mubr.msk.f32.gmra.mrb[26].mxu1 %vm292_vm0, %v11599_v60 }
 0x3e8   : > { %9503 = vmatprep.mubr.msk.f32.mxu1 %vm292_vm0, %v11603_v62 }
 0x3eb   : > { %9504 = vmatmul.mubr.msk.f32.gmra.mrb[28].mxu1 %vm292_vm0, %v11607_v3 }
 0x3ec   : > { %9506 = vmatprep.mubr.msk.f32.mxu1 %vm292_vm0, %v11804_v31 }
 0x3ef   : > { %9507 = vmatmul.mubr.msk.f32.gmra.mrb[30].mxu1 %vm292_vm0, %v11808_v4 }
 0x3f0   : > { %9511 = vmatprep.mubr.msk.f32.mxu1 %vm292_vm0, %v11310_v39  ;;  %v12519_v39 = vld [vmem:[#allocation11_spill] sm:$0xff] }
 0x3f3   : > { %9512 = vmatmul.mubr.msk.f32.vlgmr.msra.gmra.mrb[0].mxu1 %vm292_vm0, %v11316_v40  ;;  %v12520_v40 = vld [vmem:[#allocation12_spill] sm:$0xff] }
 0x3f4   : > { %9560 = vmatpush3.msra.mxu1 %v8097_v5  ;;  %9514 = vmatprep.mubr.msk.f32.mxu1 %vm292_vm0, %v11322_v11  ;;  %v11875_v11 = vld [vmem:[#allocation2 + $0x181] sm:$0xff]  ;;  %v12528_v5 = vld [vmem:[#allocation4_spill] sm:$0xff] }
 0x3f5   : > { %9609 = vmatprep.subr.mxu1 %v8130_v6 }
 0x3f7   : > { %9515 = vmatmul.mubr.msk.f32.gmra.mrb[2].mxu1 %vm292_vm0, %v11328_v13  ;;  %v11879_v13 = vld [vmem:[#allocation2 + $0x189] sm:$0xff] }
 0x3f8   : > { %9517 = vmatprep.mubr.msk.f32.mxu1 %vm292_vm0, %v11334_v19  ;;  %v12521_v19 = vld [vmem:[#allocation18_spill] sm:$0xff] }
 0x3fb   : > { %9518 = vmatmul.mubr.msk.f32.gmra.mrb[4].mxu1 %vm292_vm0, %v11340_v21  ;;  %v8163_v21 = vld [vmem:[%s12278_s3 + $0x38] sm:$0xff] }
 0x3fc   : > { %9520 = vmatprep.mubr.msk.f32.mxu1 %vm292_vm0, %v11346_v42  ;;  %v12522_v42 = vld [vmem:[#allocation28_spill] sm:$0xff] }
 0x3ff   : > { %9521 = vmatmul.mubr.msk.f32.gmra.mrb[6].mxu1 %vm292_vm0, %v11352_v44  ;;  %v12523_v44 = vld [vmem:[#allocation30_spill] sm:$0xff] }
 0x400   : > { %9523 = vmatprep.mubr.msk.f32.mxu1 %vm292_vm0, %v11358_v27  ;;  %v12524_v27 = vld [vmem:[#allocation31_spill] sm:$0xff] }
 0x403   : > { %9524 = vmatmul.mubr.msk.f32.gmra.mrb[8].mxu1 %vm292_vm0, %v11364_v30  ;;  %v12525_v30 = vld [vmem:[#allocation33_spill] sm:$0xff] }
 0x404   : > { %9526 = vmatprep.mubr.msk.f32.mxu1 %vm292_vm0, %v11370_v53  ;;  %v12526_v53 = vld [vmem:[#allocation35_spill] sm:$0xff] }
 0x407   : > { %9527 = vmatmul.mubr.msk.f32.gmra.mrb[10].mxu1 %vm292_vm0, %v11376_v57  ;;  %v12527_v57 = vld [vmem:[#allocation3_spill] sm:$0xff] }
 0x408   : > { %9529 = vmatprep.mubr.msk.f32.mxu1 %vm292_vm0, %v11382_v63 }
 0x40b   : > { %9530 = vmatmul.mubr.msk.f32.gmra.mrb[12].mxu1 %vm292_vm0, %v11388_v1 }
 0x40c   : > { %9532 = vmatprep.mubr.msk.f32.mxu1 %vm292_vm0, %v11394_v38 }
 0x40f   : > { %9533 = vmatmul.mubr.msk.f32.gmra.mrb[14].mxu1 %vm292_vm0, %v11400_v37 }
 0x410   : > { %9535 = vmatprep.mubr.msk.f32.mxu1 %vm292_vm0, %v11406_v7 }
 0x413   : > { %9536 = vmatmul.mubr.msk.f32.gmra.mrb[16].mxu1 %vm292_vm0, %v11412_v9 }
 0x414   : > { %9538 = vmatprep.mubr.msk.f32.mxu1 %vm292_vm0, %v11418_v17 }
 0x417   : > { %9539 = vmatmul.mubr.msk.f32.gmra.mrb[18].mxu1 %vm292_vm0, %v11424_v20 }
 0x418   : > { %9541 = vmatprep.mubr.msk.f32.mxu1 %vm292_vm0, %v11430_v43 }
 0x41b   : > { %9542 = vmatmul.mubr.msk.f32.gmra.mrb[20].mxu1 %vm292_vm0, %v11436_v28 }
 0x41c   : > { %9544 = vmatprep.mubr.msk.f32.mxu1 %vm292_vm0, %v11442_v49 }
 0x41f   : > { %9545 = vmatmul.mubr.msk.f32.gmra.mrb[22].mxu1 %vm292_vm0, %v11448_v51 }
 0x420   : > { %9547 = vmatprep.mubr.msk.f32.mxu1 %vm292_vm0, %v11454_v61 }
 0x423   : > { %9548 = vmatmul.mubr.msk.f32.gmra.mrb[24].mxu1 %vm292_vm0, %v11460_v0 }
 0x424   : > { %9550 = vmatprep.mubr.msk.f32.mxu1 %vm292_vm0, %v11465_v36 }
 0x427   : > { %9551 = vmatmul.mubr.msk.f32.gmra.mrb[26].mxu1 %vm292_vm0, %v11470_v55 }
 0x428   : > { %9553 = vmatprep.mubr.msk.f32.mxu1 %vm292_vm0, %v12519_v39 }
 0x42b   : > { %9554 = vmatmul.mubr.msk.f32.gmra.mrb[28].mxu1 %vm292_vm0, %v12520_v40 }
 0x42c   : > { %9556 = vmatprep.mubr.msk.f32.mxu1 %vm292_vm0, %v11875_v11 }
 0x42f   : > { %9557 = vmatmul.mubr.msk.f32.gmra.mrb[30].mxu1 %vm292_vm0, %v11879_v13 }
 0x430   : > { %9561 = vmatprep.mubr.msk.f32.mxu1 %vm292_vm0, %v12521_v19  ;;  %v12530_v19 = vld [vmem:[#allocation6_spill] sm:$0xff] }
 0x433   : > { %9562 = vmatmul.mubr.msk.f32.vlgmr.msra.gmra.mrb[0].mxu1 %vm292_vm0, %v12522_v42  ;;  %v12531_v42 = vld [vmem:[#allocation7_spill] sm:$0xff] }
 0x434   : > { %9610 = vmatpush3.msra.mxu1 %v8130_v6  ;;  %9564 = vmatprep.mubr.msk.f32.mxu1 %vm292_vm0, %v12523_v44  ;;  %v12529_v6 = vld [vmem:[#allocation5_spill] sm:$0xff] }
 0x435   : > { %9659 = vmatprep.subr.mxu1 %v8163_v21 }
 0x437   : > { %9565 = vmatmul.mubr.msk.f32.gmra.mrb[2].mxu1 %vm292_vm0, %v12524_v27  ;;  %v12532_v27 = vld [vmem:[#allocation8_spill] sm:$0xff] }
 0x438   : > { %9567 = vmatprep.mubr.msk.f32.mxu1 %vm292_vm0, %v12525_v30  ;;  %v12533_v30 = vld [vmem:[#allocation9_spill] sm:$0xff] }
 0x43b   : > { %9568 = vmatmul.mubr.msk.f32.gmra.mrb[4].mxu1 %vm292_vm0, %v12526_v53  ;;  %v12534_v53 = vld [vmem:[#allocation10_spill] sm:$0xff] }
 0x43c   : > { %9570 = vmatprep.mubr.msk.f32.mxu1 %vm292_vm0, %v12527_v57  ;;  %v12535_v57 = vld [vmem:[#allocation37_spill] sm:$0xff] }
 0x43f   : > { %9571 = vmatmul.mubr.msk.f32.gmra.mrb[6].mxu1 %vm292_vm0, %v12528_v5  ;;  %v12536_v5 = vld [vmem:[#allocation38_spill] sm:$0xff] }
 0x440   : > { %9573 = vmatprep.mubr.msk.f32.mxu1 %vm292_vm0, %v12529_v6  ;;  %v12537_v6 = vld [vmem:[#allocation13_spill] sm:$0xff] }
 0x443   : > { %9574 = vmatmul.mubr.msk.f32.gmra.mrb[8].mxu1 %vm292_vm0, %v12530_v19  ;;  %v12538_v19 = vld [vmem:[#allocation14_spill] sm:$0xff] }
 0x444   : > { %9576 = vmatprep.mubr.msk.f32.mxu1 %vm292_vm0, %v12531_v42  ;;  %v12539_v42 = vld [vmem:[#allocation15_spill] sm:$0xff] }
 0x447   : > { %9577 = vmatmul.mubr.msk.f32.gmra.mrb[10].mxu1 %vm292_vm0, %v12532_v27  ;;  %v12540_v27 = vld [vmem:[#allocation16_spill] sm:$0xff] }
 0x448   : > { %9579 = vmatprep.mubr.msk.f32.mxu1 %vm292_vm0, %v12533_v30  ;;  %v12541_v30 = vld [vmem:[#allocation17_spill] sm:$0xff] }
 0x44b   : > { %9580 = vmatmul.mubr.msk.f32.gmra.mrb[12].mxu1 %vm292_vm0, %v12534_v53  ;;  %v12542_v53 = vld [vmem:[#allocation19_spill] sm:$0xff] }
 0x44c   : > { %9582 = vmatprep.mubr.msk.f32.mxu1 %vm292_vm0, %v12535_v57  ;;  %v12543_v57 = vld [vmem:[#allocation20_spill] sm:$0xff] }
 0x44f   : > { %9583 = vmatmul.mubr.msk.f32.gmra.mrb[14].mxu1 %vm292_vm0, %v12536_v5  ;;  %v12544_v5 = vld [vmem:[#allocation21_spill] sm:$0xff] }
 0x450   : > { %9585 = vmatprep.mubr.msk.f32.mxu1 %vm292_vm0, %v12537_v6  ;;  %v12545_v6 = vld [vmem:[#allocation22_spill] sm:$0xff] }
 0x453   : > { %9586 = vmatmul.mubr.msk.f32.gmra.mrb[16].mxu1 %vm292_vm0, %v12538_v19 }
 0x454   : > { %9588 = vmatprep.mubr.msk.f32.mxu1 %vm292_vm0, %v12539_v42  ;;  %v12546_v42 = vld [vmem:[#allocation23_spill] sm:$0xff] }
 0x457   : > { %9589 = vmatmul.mubr.msk.f32.gmra.mrb[18].mxu1 %vm292_vm0, %v12540_v27 }
 0x458   : > { %9591 = vmatprep.mubr.msk.f32.mxu1 %vm292_vm0, %v12541_v30 }
 0x45b   : > { %9592 = vmatmul.mubr.msk.f32.gmra.mrb[20].mxu1 %vm292_vm0, %v12542_v53 }
 0x45c   : > { %9594 = vmatprep.mubr.msk.f32.mxu1 %vm292_vm0, %v12543_v57  ;;  %v11946_v57 = vld [vmem:[#allocation2 + $0x182] sm:$0xff] }
 0x45f   : > { %9595 = vmatmul.mubr.msk.f32.gmra.mrb[22].mxu1 %vm292_vm0, %v12544_v5 }
 0x460   : > { %9597 = vmatprep.mubr.msk.f32.mxu1 %vm292_vm0, %v12545_v6  ;;  %v11950_v6 = vld [vmem:[#allocation2 + $0x18a] sm:$0xff] }
 0x463   : > { %9598 = vmatmul.mubr.msk.f32.gmra.mrb[24].mxu1 %vm292_vm0, %v11720_v34 }
 0x464   : > { %9600 = vmatprep.mubr.msk.f32.mxu1 %vm292_vm0, %v12546_v42 }
 0x467   : > { %9601 = vmatmul.mubr.msk.f32.gmra.mrb[26].mxu1 %vm292_vm0, %v11728_v2 }
 0x468   : > { %9603 = vmatprep.mubr.msk.f32.mxu1 %vm292_vm0, %v11732_v35  ;;  %v8196_v35 = vld [vmem:[%s12278_s3 + $0x40] sm:$0xff] }
 0x46b   : > { %9604 = vmatmul.mubr.msk.f32.gmra.mrb[28].mxu1 %vm292_vm0, %v11736_v33 }
 0x46c   : > { %9606 = vmatprep.mubr.msk.f32.mxu1 %vm292_vm0, %v11946_v57 }
 0x46f   : > { %9607 = vmatmul.mubr.msk.f32.gmra.mrb[30].mxu1 %vm292_vm0, %v11950_v6 }
 0x470   : > { %9611 = vmatprep.mubr.msk.f32.mxu1 %vm292_vm0, %v11499_v41  ;;  %v6083_v41 = vld [vmem:[#allocation2 + $0x198] sm:$0xff] }
 0x473   : > { %9612 = vmatmul.mubr.msk.f32.vlgmr.msra.gmra.mrb[0].mxu1 %vm292_vm0, %v11503_v8  ;;  %v6084_v8 = vld [vmem:[#allocation2 + $0x1a0] sm:$0xff] }
 0x474   : > { %9660 = vmatpush3.msra.mxu1 %v8163_v21  ;;  %9614 = vmatprep.mubr.msk.f32.mxu1 %vm292_vm0, %v11507_v54  ;;  %v6440_v54 = vld [vmem:[#allocation2 + $0x31] sm:$0xff] }
 0x475   : > { %9709 = vmatprep.subr.mxu1 %v8196_v35  ;;  %v8235_v21 = vld [vmem:[%s10340_s27 + $0x51] sm:$0xff] }
 0x477   : > { %9615 = vmatmul.mubr.msk.f32.gmra.mrb[2].mxu1 %vm292_vm0, %v11511_v10  ;;  %v6441_v10 = vld [vmem:[#allocation2 + $0x39] sm:$0xff] }
 0x478   : > { %9617 = vmatprep.mubr.msk.f32.mxu1 %vm292_vm0, %v11515_v12  ;;  %v6442_v12 = vld [vmem:[#allocation2 + $0x49] sm:$0xff] }
 0x47b   : > { %9618 = vmatmul.mubr.msk.f32.gmra.mrb[4].mxu1 %vm292_vm0, %v11519_v14  ;;  %v6443_v14 = vld [vmem:[#allocation2 + $0x51] sm:$0xff] }
 0x47c   : > { %9620 = vmatprep.mubr.msk.f32.mxu1 %vm292_vm0, %v11523_v15  ;;  %v6444_v15 = vld [vmem:[#allocation2 + $0x61] sm:$0xff] }
 0x47f   : > { %9621 = vmatmul.mubr.msk.f32.gmra.mrb[6].mxu1 %vm292_vm0, %v11527_v16  ;;  %v6445_v16 = vld [vmem:[#allocation2 + $0x69] sm:$0xff] }
 0x480   : > { %9623 = vmatprep.mubr.msk.f32.mxu1 %vm292_vm0, %v11531_v18  ;;  %v6446_v18 = vld [vmem:[#allocation2 + $0x79] sm:$0xff] }
 0x483   : > { %9624 = vmatmul.mubr.msk.f32.gmra.mrb[8].mxu1 %vm292_vm0, %v11535_v22  ;;  %v6447_v22 = vld [vmem:[#allocation2 + $0x81] sm:$0xff] }
 0x484   : > { %9626 = vmatprep.mubr.msk.f32.mxu1 %vm292_vm0, %v11539_v23  ;;  %v6448_v23 = vld [vmem:[#allocation2 + $0x91] sm:$0xff] }
 0x487   : > { %9627 = vmatmul.mubr.msk.f32.gmra.mrb[10].mxu1 %vm292_vm0, %v11543_v24  ;;  %v6449_v24 = vld [vmem:[#allocation2 + $0x99] sm:$0xff] }
 0x488   : > { %9629 = vmatprep.mubr.msk.f32.mxu1 %vm292_vm0, %v11547_v25  ;;  %v12561_v25 = vld [vmem:[#allocation15_spill] sm:$0xff] }
 0x48b   : > { %9630 = vmatmul.mubr.msk.f32.gmra.mrb[12].mxu1 %vm292_vm0, %v11551_v26  ;;  %v12562_v26 = vld [vmem:[#allocation20_spill] sm:$0xff] }
 0x48c   : > { %9632 = vmatprep.mubr.msk.f32.mxu1 %vm292_vm0, %v11555_v45  ;;  %v12563_v45 = vld [vmem:[#allocation22_spill] sm:$0xff] }
 0x48f   : > { %9633 = vmatmul.mubr.msk.f32.gmra.mrb[14].mxu1 %vm292_vm0, %v11559_v46  ;;  %v12564_v46 = vld [vmem:[#allocation24_spill] sm:$0xff] }
 0x490   : > { %9635 = vmatprep.mubr.msk.f32.mxu1 %vm292_vm0, %v11563_v47  ;;  %v6857_v47 = vld [vmem:[#allocation2 + $0x19a] sm:$0xff] }
 0x493   : > { %9636 = vmatmul.mubr.msk.f32.gmra.mrb[16].mxu1 %vm292_vm0, %v11567_v48  ;;  %v12136_v48 = vld [vmem:[%s12279_s4] ss:$0 sm:$0xff] }
 0x494   : > { %9638 = vmatprep.mubr.msk.f32.mxu1 %vm292_vm0, %v11571_v29 }
 0x497   : > { %9639 = vmatmul.mubr.msk.f32.gmra.mrb[18].mxu1 %vm292_vm0, %v11575_v32  ;;  %v8231_v32 = vld [vmem:[%s10340_s27 + $0x21] sm:$0xff] }
 0x498   : > { %9641 = vmatprep.mubr.msk.f32.mxu1 %vm292_vm0, %v11579_v50 }
 0x49b   : > { %9642 = vmatmul.mubr.msk.f32.gmra.mrb[20].mxu1 %vm292_vm0, %v11583_v52 }
 0x49c   : > { %9644 = vmatprep.mubr.msk.f32.mxu1 %vm292_vm0, %v11587_v56  ;;  %v8230_v56 = vld [vmem:[%s10340_s27 + $0x19] sm:$0xff] }
 0x49f   : > { %9645 = vmatmul.mubr.msk.f32.gmra.mrb[22].mxu1 %vm292_vm0, %v11591_v58 }
 0x4a0   : > { %9647 = vmatprep.mubr.msk.f32.mxu1 %vm292_vm0, %v11595_v59 }
 0x4a3   : > { %9648 = vmatmul.mubr.msk.f32.gmra.mrb[24].mxu1 %vm292_vm0, %v11599_v60 }
 0x4a4   : > { %9650 = vmatprep.mubr.msk.f32.mxu1 %vm292_vm0, %v11603_v62 }
 0x4a7   : > { %9651 = vmatmul.mubr.msk.f32.gmra.mrb[26].mxu1 %vm292_vm0, %v11607_v3  ;;  %v8233_v3 = vld [vmem:[%s10340_s27 + $0x39] sm:$0xff] }
 0x4a8   : > { %9653 = vmatprep.mubr.msk.f32.mxu1 %vm292_vm0, %v11804_v31  ;;  %v8232_v31 = vld [vmem:[%s10340_s27 + $0x31] sm:$0xff] }
 0x4ab   : > { %9654 = vmatmul.mubr.msk.f32.gmra.mrb[28].mxu1 %vm292_vm0, %v11808_v4 }
 0x4ac   : > { %9656 = vmatprep.mubr.msk.f32.mxu1 %vm292_vm0, %v6083_v41  ;;  %v8237_v41 = vld [vmem:[%s10340_s27 + $0x69] sm:$0xff] }
 0x4af   : > { %9657 = vmatmul.mubr.msk.f32.gmra.mrb[30].mxu1 %vm292_vm0, %v6084_v8 }
 0x4b0   : > { %9661 = vmatprep.mubr.msk.f32.mxu1 %vm292_vm0, %v6440_v54 }
 0x4b3   : > { %9662 = vmatmul.mubr.msk.f32.vlgmr.msra.gmra.mrb[0].mxu1 %vm292_vm0, %v6441_v10 }
 0x4b4   : > { %9710 = vmatpush3.msra.mxu1 %v8196_v35  ;;  %9664 = vmatprep.mubr.msk.f32.mxu1 %vm292_vm0, %v6442_v12  ;;  %v8236_v12 = vld [vmem:[%s10340_s27 + $0x61] sm:$0xff] }
 0x4b7   : > { %9665 = vmatmul.mubr.msk.f32.gmra.mrb[2].mxu1 %vm292_vm0, %v6443_v14 }
 0x4b8   : > { %9667 = vmatprep.mubr.msk.f32.mxu1 %vm292_vm0, %v6444_v15 }
 0x4bb   : > { %9668 = vmatmul.mubr.msk.f32.gmra.mrb[4].mxu1 %vm292_vm0, %v6445_v16 }
 0x4bc   : > { %9670 = vmatprep.mubr.msk.f32.mxu1 %vm292_vm0, %v6446_v18 }
 0x4bf   : > { %9671 = vmatmul.mubr.msk.f32.gmra.mrb[6].mxu1 %vm292_vm0, %v6447_v22 }
 0x4c0   : > { %9673 = vmatprep.mubr.msk.f32.mxu1 %vm292_vm0, %v6448_v23  ;;  %v8239_v23 = vld [vmem:[%s10340_s27 + $0x81] sm:$0xff] }
 0x4c3   : > { %9674 = vmatmul.mubr.msk.f32.gmra.mrb[8].mxu1 %vm292_vm0, %v6449_v24 }
 0x4c4   : > { %9676 = vmatprep.mubr.msk.f32.mxu1 %vm292_vm0, %v11382_v63  ;;  %v6470_v63 = vld [vmem:[#allocation2 + $0x199] sm:$0xff] }
 0x4c7   : > { %9677 = vmatmul.mubr.msk.f32.gmra.mrb[10].mxu1 %vm292_vm0, %v11388_v1  ;;  %v6471_v1 = vld [vmem:[#allocation2 + $0x1a1] sm:$0xff] }
 0x4c8   : > { %9679 = vmatprep.mubr.msk.f32.mxu1 %vm292_vm0, %v11394_v38  ;;  %v12547_v38 = vld [vmem:[#allocation31_spill] sm:$0xff] }
 0x4cb   : > { %9680 = vmatmul.mubr.msk.f32.gmra.mrb[12].mxu1 %vm292_vm0, %v11400_v37  ;;  %v12548_v37 = vld [vmem:[#allocation33_spill] sm:$0xff] }
 0x4cc   : > { %9682 = vmatprep.mubr.msk.f32.mxu1 %vm292_vm0, %v11406_v7  ;;  %v12549_v7 = vld [vmem:[#allocation35_spill] sm:$0xff] }
 0x4cf   : > { %9683 = vmatmul.mubr.msk.f32.gmra.mrb[14].mxu1 %vm292_vm0, %v11412_v9  ;;  %v12550_v9 = vld [vmem:[#allocation3_spill] sm:$0xff] }
 0x4d0   : > { %9685 = vmatprep.mubr.msk.f32.mxu1 %vm292_vm0, %v11418_v17  ;;  %v12551_v17 = vld [vmem:[#allocation4_spill] sm:$0xff] }
 0x4d3   : > { %9686 = vmatmul.mubr.msk.f32.gmra.mrb[16].mxu1 %vm292_vm0, %v11424_v20  ;;  %v12552_v20 = vld [vmem:[#allocation5_spill] sm:$0xff] }
 0x4d4   : > { %9688 = vmatprep.mubr.msk.f32.mxu1 %vm292_vm0, %v11430_v43  ;;  %v12553_v43 = vld [vmem:[#allocation6_spill] sm:$0xff] }
 0x4d7   : > { %9689 = vmatmul.mubr.msk.f32.gmra.mrb[18].mxu1 %vm292_vm0, %v11436_v28  ;;  %v12554_v28 = vld [vmem:[#allocation7_spill] sm:$0xff] }
 0x4d8   : > { %9691 = vmatprep.mubr.msk.f32.mxu1 %vm292_vm0, %v11442_v49  ;;  %v12555_v49 = vld [vmem:[#allocation8_spill] sm:$0xff] }
 0x4db   : > { %9692 = vmatmul.mubr.msk.f32.gmra.mrb[20].mxu1 %vm292_vm0, %v11448_v51  ;;  %v12556_v51 = vld [vmem:[#allocation9_spill] sm:$0xff] }
 0x4dc   : > { %9694 = vmatprep.mubr.msk.f32.mxu1 %vm292_vm0, %v11454_v61  ;;  %v12557_v61 = vld [vmem:[#allocation10_spill] sm:$0xff] }
 0x4df   : > { %9695 = vmatmul.mubr.msk.f32.gmra.mrb[22].mxu1 %vm292_vm0, %v11460_v0  ;;  %v12558_v0 = vld [vmem:[#allocation37_spill] sm:$0xff] }
 0x4e0   : > { %9697 = vmatprep.mubr.msk.f32.mxu1 %vm292_vm0, %v11465_v36  ;;  %v12559_v36 = vld [vmem:[#allocation38_spill] sm:$0xff] }
 0x4e3   : > { %9698 = vmatmul.mubr.msk.f32.gmra.mrb[24].mxu1 %vm292_vm0, %v11470_v55  ;;  %v12560_v55 = vld [vmem:[#allocation13_spill] sm:$0xff] }
 0x4e4   : > { %9700 = vmatprep.mubr.msk.f32.mxu1 %vm292_vm0, %v12519_v39 }
 0x4e7   : > { %9701 = vmatmul.mubr.msk.f32.gmra.mrb[26].mxu1 %vm292_vm0, %v12520_v40 }
 0x4e8   : > { %9703 = vmatprep.mubr.msk.f32.mxu1 %vm292_vm0, %v11875_v11 }
 0x4eb   : > { %9704 = vmatmul.mubr.msk.f32.gmra.mrb[28].mxu1 %vm292_vm0, %v11879_v13 }
 0x4ec   : > { %9706 = vmatprep.mubr.msk.f32.mxu1 %vm292_vm0, %v6470_v63 }
 0x4ef   : > { %9707 = vmatmul.mubr.msk.f32.gmra.mrb[30].mxu1 %vm292_vm0, %v6471_v1 }
 0x4f0   : > { %9711 = vmatprep.mubr.msk.f32.mxu1 %vm292_vm0, %v12523_v44 }
 0x4f3   : > { %9712 = vmatmul.mubr.msk.f32.vlgmr.msra.gmra.mrb[0].mxu1 %vm292_vm0, %v12547_v38  ;;  %v8238_v38 = vld [vmem:[%s10340_s27 + $0x79] sm:$0xff] }
 0x4f4   : > { %9714 = vmatprep.mubr.msk.f32.mxu1 %vm292_vm0, %v12548_v37 }
 0x4f7   : > { %9715 = vmatmul.mubr.msk.f32.gmra.mrb[2].mxu1 %vm292_vm0, %v12549_v7 }
 0x4f8   : > { %9717 = vmatprep.mubr.msk.f32.mxu1 %vm292_vm0, %v12550_v9 }
 0x4fb   : > { %9718 = vmatmul.mubr.msk.f32.gmra.mrb[4].mxu1 %vm292_vm0, %v12551_v17 }
 0x4fc   : > { %9720 = vmatprep.mubr.msk.f32.mxu1 %vm292_vm0, %v12552_v20 }
 0x4ff   : > { %9721 = vmatmul.mubr.msk.f32.gmra.mrb[6].mxu1 %vm292_vm0, %v12553_v43  ;;  %v8241_v43 = vld [vmem:[%s10340_s27 + $0x99] sm:$0xff] }
 0x500   : > { %9723 = vmatprep.mubr.msk.f32.mxu1 %vm292_vm0, %v12554_v28 }
 0x503   : > { %9724 = vmatmul.mubr.msk.f32.gmra.mrb[8].mxu1 %vm292_vm0, %v12555_v49 }
 0x504   : > { %9726 = vmatprep.mubr.msk.f32.mxu1 %vm292_vm0, %v12556_v51 }
 0x507   : > { %9727 = vmatmul.mubr.msk.f32.gmra.mrb[10].mxu1 %vm292_vm0, %v12557_v61  ;;  %v8240_v61 = vld [vmem:[%s10340_s27 + $0x91] sm:$0xff] }
 0x508   : > { %9729 = vmatprep.mubr.msk.f32.mxu1 %vm292_vm0, %v12558_v0 }
 0x50b   : > { %9730 = vmatmul.mubr.msk.f32.gmra.mrb[12].mxu1 %vm292_vm0, %v12559_v36 }
 0x50c   : > { %9732 = vmatprep.mubr.msk.f32.mxu1 %vm292_vm0, %v12560_v55 }
 0x50f   : > { %9733 = vmatmul.mubr.msk.f32.gmra.mrb[14].mxu1 %vm292_vm0, %v12538_v19 }
 0x510   : > { %9735 = vmatprep.mubr.msk.f32.mxu1 %vm292_vm0, %v12561_v25 }
 0x513   : > { %9736 = vmatmul.mubr.msk.f32.gmra.mrb[16].mxu1 %vm292_vm0, %v12540_v27 }
 0x514   : > { %9738 = vmatprep.mubr.msk.f32.mxu1 %vm292_vm0, %v12541_v30 }
 0x517   : > { %9739 = vmatmul.mubr.msk.f32.gmra.mrb[18].mxu1 %vm292_vm0, %v12542_v53  ;;  %v8234_v53 = vld [vmem:[%s10340_s27 + $0x49] sm:$0xff] }
 0x518   : > { %9741 = vmatprep.mubr.msk.f32.mxu1 %vm292_vm0, %v12562_v26 }
 0x51b   : > { %9742 = vmatmul.mubr.msk.f32.gmra.mrb[20].mxu1 %vm292_vm0, %v12544_v5 }
 0x51c   : > { %9744 = vmatprep.mubr.msk.f32.mxu1 %vm292_vm0, %v12563_v45  ;;  %v8243_v45 = vld [vmem:[%s10340_s27 + $0xb1] sm:$0xff] }
 0x51f   : > { %9745 = vmatmul.mubr.msk.f32.gmra.mrb[22].mxu1 %vm292_vm0, %v11720_v34  ;;  %v6858_v34 = vld [vmem:[#allocation2 + $0x1a2] sm:$0xff] }
 0x520   : > { %9747 = vmatprep.mubr.msk.f32.mxu1 %vm292_vm0, %v12546_v42 }
 0x523   : > { %9748 = vmatmul.mubr.msk.f32.gmra.mrb[24].mxu1 %vm292_vm0, %v11728_v2 }
 0x524   : > { %9750 = vmatprep.mubr.msk.f32.mxu1 %vm292_vm0, %v12564_v46 }
 0x527   : > { %9751 = vmatmul.mubr.msk.f32.gmra.mrb[26].mxu1 %vm292_vm0, %v11736_v33 }
 0x528   : > { %9753 = vmatprep.mubr.msk.f32.mxu1 %vm292_vm0, %v11946_v57 }
 0x52b   : > { %9754 = vmatmul.mubr.msk.f32.gmra.mrb[28].mxu1 %vm292_vm0, %v11950_v6 }
 0x52c   : > { %9756 = vmatprep.mubr.msk.f32.mxu1 %vm292_vm0, %v6857_v47 }
 0x52f   : > { %9757 = vmatmul.mubr.msk.f32.gmra.mrb[30].mxu1 %vm292_vm0, %v6858_v34 }
 0x5c6   : > { %v9713_v29 = vpop.f32.mrb[0].mxu1 }
 0x5c7   : > { %v7222_v50 = vadd.f32 %v9713_v29, %v12136_v48  ;;  %v7023_v52 = vpop.f32.mrb[1].mxu1  ;;  %v8242_v29 = vld [vmem:[%s10340_s27 + $0xa9] sm:$0xff] }
 0x5c8   : > { %v7221_v58 = vadd.f32 %v12136_v48, %v7023_v52 }
 0x5c9   : > { %v7286_v59 = vadd.f32 %v8231_v32, %v7222_v50 }
 0x5ca   : > { %v7285_v60 = vadd.f32 %v8230_v56, %v7221_v58  ;;  %v9716_v62 = vpop.f32.mrb[2].mxu1 }
 0x5cb   : > { %v7318_v2 = vmax.f32 %v7286_v59, 0.0  ;;  %v7224_v35 = vadd.f32 %v9716_v62, %v12136_v48  ;;  %v7033_v33 = vpop.f32.mrb[3].mxu1  ;;  %v8245_v59 = vld [vmem:[%s10340_s27 + $0xc9] sm:$0xff] }
 0x5cc   : > { %v7317_v4 = vmax.f32 %v7285_v60, 0.0  ;;  %v7223_v39 = vadd.f32 %v12136_v48, %v7033_v33 }
 0x5cd   : > { %7350 = vst.msk [vmem:[%s12146_s22 + $0x8] sm:$0xff] %vm292_vm0, %v7318_v2  ;;  %v7288_v40 = vadd.f32 %v8233_v3, %v7224_v35  ;;  %v8244_v2 = vld [vmem:[%s10340_s27 + $0xc1] sm:$0xff] }
 0x5ce   : > { %7349 = vst.msk [vmem:[%s12146_s22] sm:$0xff] %vm292_vm0, %v7317_v4  ;;  %v7287_v11 = vadd.f32 %v8232_v31, %v7223_v39  ;;  %v9719_v13 = vpop.f32.mrb[4].mxu1 }
 0x5cf   : > { %v7320_v44 = vmax.f32 %v7288_v40, 0.0  ;;  %v7226_v27 = vadd.f32 %v9719_v13, %v12136_v48  ;;  %v7043_v30 = vpop.f32.mrb[5].mxu1  ;;  %v8247_v40 = vld [vmem:[%s10340_s27 + $0xe1] sm:$0xff] }
 0x5d0   : > { %v7319_v57 = vmax.f32 %v7287_v11, 0.0  ;;  %v7225_v5 = vadd.f32 %v12136_v48, %v7043_v30 }
 0x5d1   : > { %7352 = vst.msk [vmem:[%s12146_s22 + $0x18] sm:$0xff] %vm292_vm0, %v7320_v44  ;;  %v7290_v6 = vadd.f32 %v8235_v21, %v7226_v27  ;;  %v8246_v44 = vld [vmem:[%s10340_s27 + $0xd9] sm:$0xff] }
 0x5d2   : > { %7351 = vst.msk [vmem:[%s12146_s22 + $0x10] sm:$0xff] %vm292_vm0, %v7319_v57  ;;  %v7289_v19 = vadd.f32 %v8234_v53, %v7225_v5  ;;  %v9722_v42 = vpop.f32.mrb[6].mxu1 }
 0x5d3   : > { %v7322_v8 = vmax.f32 %v7290_v6, 0.0  ;;  %v7228_v54 = vadd.f32 %v9722_v42, %v12136_v48  ;;  %v7053_v10 = vpop.f32.mrb[7].mxu1  ;;  %v8249_v6 = vld [vmem:[%s10340_s27 + $0xf9] sm:$0xff] }
 0x5d4   : > { %v7321_v14 = vmax.f32 %v7289_v19, 0.0  ;;  %v7227_v15 = vadd.f32 %v12136_v48, %v7053_v10 }
 0x5d5   : > { %7354 = vst.msk [vmem:[%s12146_s22 + $0x28] sm:$0xff] %vm292_vm0, %v7322_v8  ;;  %v7292_v16 = vadd.f32 %v8237_v41, %v7228_v54  ;;  %v8248_v8 = vld [vmem:[%s10340_s27 + $0xf1] sm:$0xff] }
 0x5d6   : > { %7353 = vst.msk [vmem:[%s12146_s22 + $0x20] sm:$0xff] %vm292_vm0, %v7321_v14  ;;  %v7291_v18 = vadd.f32 %v8236_v12, %v7227_v15  ;;  %v9725_v22 = vpop.f32.mrb[8].mxu1 }
 0x5d7   : > { %v7324_v24 = vmax.f32 %v7292_v16, 0.0  ;;  %v7230_v63 = vadd.f32 %v9725_v22, %v12136_v48  ;;  %v7063_v1 = vpop.f32.mrb[9].mxu1  ;;  %v8251_v16 = vld [vmem:[%s10340_s27 + $0x111] sm:$0xff] }
 0x5d8   : > { %v7323_v37 = vmax.f32 %v7291_v18, 0.0  ;;  %v7229_v7 = vadd.f32 %v12136_v48, %v7063_v1 }
 0x5d9   : > { %7356 = vst.msk [vmem:[%s12146_s22 + $0x38] sm:$0xff] %vm292_vm0, %v7324_v24  ;;  %v7294_v9 = vadd.f32 %v8239_v23, %v7230_v63  ;;  %v8250_v24 = vld [vmem:[%s10340_s27 + $0x109] sm:$0xff] }
 0x5da   : > { %7355 = vst.msk [vmem:[%s12146_s22 + $0x30] sm:$0xff] %vm292_vm0, %v7323_v37  ;;  %v7293_v17 = vadd.f32 %v8238_v38, %v7229_v7  ;;  %v9728_v20 = vpop.f32.mrb[10].mxu1 }
 0x5db   : > { %v7326_v28 = vmax.f32 %v7294_v9, 0.0  ;;  %v7232_v49 = vadd.f32 %v9728_v20, %v12136_v48  ;;  %v7073_v51 = vpop.f32.mrb[11].mxu1  ;;  %v8253_v9 = vld [vmem:[%s10340_s27 + $0x129] sm:$0xff] }
 0x5dc   : > { %v7325_v0 = vmax.f32 %v7293_v17, 0.0  ;;  %v7231_v36 = vadd.f32 %v12136_v48, %v7073_v51 }
 0x5dd   : > { %7358 = vst.msk [vmem:[%s12146_s22 + $0x48] sm:$0xff] %vm292_vm0, %v7326_v28  ;;  %v7296_v55 = vadd.f32 %v8241_v43, %v7232_v49  ;;  %v8252_v28 = vld [vmem:[%s10340_s27 + $0x121] sm:$0xff] }
 0x5de   : > { %7357 = vst.msk [vmem:[%s12146_s22 + $0x40] sm:$0xff] %vm292_vm0, %v7325_v0  ;;  %v7295_v25 = vadd.f32 %v8240_v61, %v7231_v36  ;;  %v9731_v26 = vpop.f32.mrb[12].mxu1 }
 0x5df   : > { %v7328_v46 = vmax.f32 %v7296_v55, 0.0  ;;  %v7234_v47 = vadd.f32 %v9731_v26, %v12136_v48  ;;  %v7083_v34 = vpop.f32.mrb[13].mxu1  ;;  %v8255_v55 = vld [vmem:[%s10340_s27 + $0x141] sm:$0xff] }
 0x5e0   : > { %v7327_v32 = vmax.f32 %v7295_v25, 0.0  ;;  %v7233_v50 = vadd.f32 %v12136_v48, %v7083_v34 }
 0x5e1   : > { %7360 = vst.msk [vmem:[%s12146_s22 + $0x58] sm:$0xff] %vm292_vm0, %v7328_v46  ;;  %v7298_v52 = vadd.f32 %v8243_v45, %v7234_v47  ;;  %v8254_v46 = vld [vmem:[%s10340_s27 + $0x139] sm:$0xff] }
 0x5e2   : > { %7359 = vst.msk [vmem:[%s12146_s22 + $0x50] sm:$0xff] %vm292_vm0, %v7327_v32  ;;  %v7297_v56 = vadd.f32 %v8242_v29, %v7233_v50  ;;  %v9734_v58 = vpop.f32.mrb[14].mxu1 }
 0x5e3   : > { %v7330_v60 = vmax.f32 %v7298_v52, 0.0  ;;  %v7236_v62 = vadd.f32 %v9734_v58, %v12136_v48  ;;  %v7093_v3 = vpop.f32.mrb[15].mxu1  ;;  %v8257_v52 = vld [vmem:[%s10340_s27 + $0x159] sm:$0xff] }
 0x5e4   : > { %v7329_v35 = vmax.f32 %v7297_v56, 0.0  ;;  %v7235_v33 = vadd.f32 %v12136_v48, %v7093_v3 }
 0x5e5   : > { %7362 = vst.msk [vmem:[%s12146_s22 + $0x68] sm:$0xff] %vm292_vm0, %v7330_v60  ;;  %v7300_v31 = vadd.f32 %v8245_v59, %v7236_v62  ;;  %v8256_v60 = vld [vmem:[%s10340_s27 + $0x151] sm:$0xff] }
 0x5e6   : > { %7361 = vst.msk [vmem:[%s12146_s22 + $0x60] sm:$0xff] %vm292_vm0, %v7329_v35  ;;  %v7299_v4 = vadd.f32 %v8244_v2, %v7235_v33  ;;  %v9737_v39 = vpop.f32.mrb[16].mxu1 }
 0x5e7   : > { %v7332_v11 = vmax.f32 %v7300_v31, 0.0  ;;  %v7238_v13 = vadd.f32 %v9737_v39, %v12136_v48  ;;  %v7103_v21 = vpop.f32.mrb[17].mxu1  ;;  %v8259_v31 = vld [vmem:[%s10340_s27 + $0x171] sm:$0xff] }
 0x5e8   : > { %v7331_v27 = vmax.f32 %v7299_v4, 0.0  ;;  %v7237_v30 = vadd.f32 %v12136_v48, %v7103_v21 }
 0x5e9   : > { %7364 = vst.msk [vmem:[%s12146_s22 + $0x78] sm:$0xff] %vm292_vm0, %v7332_v11  ;;  %v7302_v53 = vadd.f32 %v8247_v40, %v7238_v13  ;;  %v8258_v11 = vld [vmem:[%s10340_s27 + $0x169] sm:$0xff] }
 0x5ea   : > { %7363 = vst.msk [vmem:[%s12146_s22 + $0x70] sm:$0xff] %vm292_vm0, %v7331_v27  ;;  %v7301_v57 = vadd.f32 %v8246_v44, %v7237_v30  ;;  %v9740_v5 = vpop.f32.mrb[18].mxu1 }
 0x5eb   : > { %v7334_v19 = vmax.f32 %v7302_v53, 0.0  ;;  %v7240_v42 = vadd.f32 %v9740_v5, %v12136_v48  ;;  %v7113_v41 = vpop.f32.mrb[19].mxu1  ;;  %v8261_v53 = vld [vmem:[%s10340_s27 + $0x189] sm:$0xff] }
 0x5ec   : > { %v7333_v54 = vmax.f32 %v7301_v57, 0.0  ;;  %v7239_v10 = vadd.f32 %v12136_v48, %v7113_v41 }
 0x5ed   : > { %7366 = vst.msk [vmem:[%s12146_s22 + $0x88] sm:$0xff] %vm292_vm0, %v7334_v19  ;;  %v7304_v12 = vadd.f32 %v8249_v6, %v7240_v42  ;;  %v8260_v19 = vld [vmem:[%s10340_s27 + $0x181] sm:$0xff] }
 0x5ee   : > { %7365 = vst.msk [vmem:[%s12146_s22 + $0x80] sm:$0xff] %vm292_vm0, %v7333_v54  ;;  %v7303_v14 = vadd.f32 %v8248_v8, %v7239_v10  ;;  %v9743_v15 = vpop.f32.mrb[20].mxu1 }
 0x5ef   : > { %v7336_v18 = vmax.f32 %v7304_v12, 0.0  ;;  %v7242_v22 = vadd.f32 %v9743_v15, %v12136_v48  ;;  %v7123_v23 = vpop.f32.mrb[21].mxu1 }
 0x5f0   : > { %v7335_v63 = vmax.f32 %v7303_v14, 0.0  ;;  %v7241_v1 = vadd.f32 %v12136_v48, %v7123_v23 }
 0x5f1   : > { %7368 = vst.msk [vmem:[%s12146_s22 + $0x98] sm:$0xff] %vm292_vm0, %v7336_v18  ;;  %v7306_v38 = vadd.f32 %v8251_v16, %v7242_v22 }
 0x5f2   : > { %7367 = vst.msk [vmem:[%s12146_s22 + $0x90] sm:$0xff] %vm292_vm0, %v7335_v63  ;;  %v7305_v37 = vadd.f32 %v8250_v24, %v7241_v1  ;;  %v9746_v7 = vpop.f32.mrb[22].mxu1 }
 0x5f3   : > { %v7338_v17 = vmax.f32 %v7306_v38, 0.0  ;;  %v7244_v20 = vadd.f32 %v9746_v7, %v12136_v48  ;;  %v7133_v43 = vpop.f32.mrb[23].mxu1 }
 0x5f4   : > { %v7337_v49 = vmax.f32 %v7305_v37, 0.0  ;;  %v7243_v51 = vadd.f32 %v12136_v48, %v7133_v43 }
 0x5f5   : > { %7370 = vst.msk [vmem:[%s12146_s22 + $0xa8] sm:$0xff] %vm292_vm0, %v7338_v17  ;;  %v7308_v61 = vadd.f32 %v8253_v9, %v7244_v20 }
 0x5f6   : > { %7369 = vst.msk [vmem:[%s12146_s22 + $0xa0] sm:$0xff] %vm292_vm0, %v7337_v49  ;;  %v7307_v0 = vadd.f32 %v8252_v28, %v7243_v51  ;;  %v9749_v36 = vpop.f32.mrb[24].mxu1 }
 0x5f7   : > { %v7340_v25 = vmax.f32 %v7308_v61, 0.0  ;;  %v7246_v26 = vadd.f32 %v9749_v36, %v12136_v48  ;;  %v7143_v45 = vpop.f32.mrb[25].mxu1 }
 0x5f8   : > { %v7339_v47 = vmax.f32 %v7307_v0, 0.0  ;;  %v7245_v34 = vadd.f32 %v12136_v48, %v7143_v45 }
 0x5f9   : > { %7372 = vst.msk [vmem:[%s12146_s22 + $0xb8] sm:$0xff] %vm292_vm0, %v7340_v25  ;;  %v7310_v29 = vadd.f32 %v8255_v55, %v7246_v26 }
 0x5fa   : > { %7371 = vst.msk [vmem:[%s12146_s22 + $0xb0] sm:$0xff] %vm292_vm0, %v7339_v47  ;;  %v7309_v32 = vadd.f32 %v8254_v46, %v7245_v34  ;;  %v9752_v50 = vpop.f32.mrb[26].mxu1 }
 0x5fb   : > { %v7342_v56 = vmax.f32 %v7310_v29, 0.0  ;;  %v7248_v58 = vadd.f32 %v9752_v50, %v12136_v48  ;;  %v7153_v59 = vpop.f32.mrb[27].mxu1 }
 0x5fc   : > { %v7341_v62 = vmax.f32 %v7309_v32, 0.0  ;;  %v7247_v3 = vadd.f32 %v12136_v48, %v7153_v59 }
 0x5fd   : > { %7374 = vst.msk [vmem:[%s12146_s22 + $0xc8] sm:$0xff] %vm292_vm0, %v7342_v56  ;;  %v7312_v2 = vadd.f32 %v8257_v52, %v7248_v58 }
 0x5fe   : > { %7373 = vst.msk [vmem:[%s12146_s22 + $0xc0] sm:$0xff] %vm292_vm0, %v7341_v62  ;;  %v7311_v35 = vadd.f32 %v8256_v60, %v7247_v3  ;;  %v9755_v33 = vpop.f32.mrb[28].mxu1 }
 0x5ff   : > { %v7344_v4 = vmax.f32 %v7312_v2, 0.0  ;;  %v7250_v39 = vadd.f32 %v9755_v33, %v12136_v48  ;;  %v7163_v40 = vpop.f32.mrb[29].mxu1 }
 0x600   : > { %v7343_v13 = vmax.f32 %v7311_v35, 0.0  ;;  %v7249_v21 = vadd.f32 %v12136_v48, %v7163_v40 }
 0x601   : > { %7376 = vst.msk [vmem:[%s12146_s22 + $0xd8] sm:$0xff] %vm292_vm0, %v7344_v4  ;;  %v7314_v44 = vadd.f32 %v8259_v31, %v7250_v39 }
 0x602   : > { %7375 = vst.msk [vmem:[%s12146_s22 + $0xd0] sm:$0xff] %vm292_vm0, %v7343_v13  ;;  %v7313_v27 = vadd.f32 %v8258_v11, %v7249_v21  ;;  %v9758_v30 = vpop.f32.mrb[30].mxu1 }
 0x603   : > { %v7346_v57 = vmax.f32 %v7314_v44, 0.0  ;;  %v7252_v5 = vadd.f32 %v9758_v30, %v12136_v48  ;;  %v7173_v6 = vpop.f32.mrb[31].mxu1 }
 0x604   : > { %v7345_v42 = vmax.f32 %v7313_v27, 0.0  ;;  %v7251_v41 = vadd.f32 %v12136_v48, %v7173_v6 }
 0x605   : > { %7378 = vst.msk [vmem:[%s12146_s22 + $0xe8] sm:$0xff] %vm292_vm0, %v7346_v57  ;;  %v7316_v8 = vadd.f32 %v8261_v53, %v7252_v5 }
 0x606   : > { %7377 = vst.msk [vmem:[%s12146_s22 + $0xe0] sm:$0xff] %vm292_vm0, %v7345_v42  ;;  %v7315_v54 = vadd.f32 %v8260_v19, %v7251_v41 }
 0x607   : > { %v7348_v10 = vmax.f32 %v7316_v8, 0.0 }
 0x608   : > { %v7347_v12 = vmax.f32 %v7315_v54, 0.0 }
 0x609   : > { %7380 = vst.msk [vmem:[%s12146_s22 + $0xf8] sm:$0xff] %vm292_vm0, %v7348_v10 }
 0x60a   : > { %7379 = vst.msk [vmem:[%s12146_s22 + $0xf0] sm:$0xff] %vm292_vm0, %v7347_v12 }
 0x60b PF: > { %s15_s18 = sadd.s32 1, %s10287_s18  }
 0x60c   : > { %p12_p4 = scmp.ge.s32.totalorder %s15_s18, 4  }
 0x60e   :  { %14 = sbr.rel (!%p12_p4) target bundleno = 1 (0x1), region = 91 }

</bundles_post_ra>
